<compile_context>
chip_gen: v6e
topology: v6e:2x2x1
jax: 0.10.0
libtpu: 0.0.40
codegen_flags: <defaults>
</compile_context>

<pallas_src>
import functools
import math

import numpy as np

import jax
import jax.numpy as jnp
from jax import lax
from jax.experimental import pallas as pl
from jax.experimental.pallas import tpu as pltpu

_SQRT2 = math.sqrt(2.0)
_MM_DTYPE = jnp.bfloat16  # MXU operand dtype; accumulation stays f32


# ------------------------------ in-kernel math -------------------------------
def _erf_f32(u):
    # Abramowitz & Stegun 7.1.26 (max abs err ~1.5e-7) — matches PyTorch's
    # exact-erf nn.GELU() well inside the bf16-MXU noise floor.
    a1, a2, a3, a4, a5 = (0.254829592, -0.284496736, 1.421413741,
                          -1.453152027, 1.061405429)
    pc = 0.3275911
    s = jnp.where(u >= 0, 1.0, -1.0).astype(jnp.float32)
    z = jnp.abs(u)
    t = 1.0 / (1.0 + pc * z)          # divide -> EUP, off the VALU path
    poly = ((((a5 * t + a4) * t + a3) * t + a2) * t + a1) * t
    return s * (1.0 - poly * jnp.exp(-z * z))


def _gelu(x):
    # PyTorch nn.GELU() default (approximate='none'), computed in f32.
    x = x.astype(jnp.float32)
    return 0.5 * x * (1.0 + _erf_f32(x * (1.0 / _SQRT2)))


def _roll_lanes(x, shift):
    """Circular shift right by `shift` along the last (lane) axis."""
    l = x.shape[-1]
    shift %= l
    if shift == 0:
        return x
    if l % 128 == 0:
        return pltpu.roll(x, shift, axis=x.ndim - 1)   # XLU rotate (production path)
    # small / unaligned lane extents: lower via slice + concat instead
    return jnp.concatenate([x[:, l - shift:], x[:, :l - shift]], axis=1)


def _conv3x3_rolled(h, w, col, wo):
    """3x3 / stride-1 / pad-1 convolution on a lane-flattened activation.

    h   : (C, L) bf16, row-major flattened (L = rows*wo); rows that represent
          the conv's H zero padding must already be zero.
    w   : (Co, 9*C) weights, (dy, dx, cin)-major column order.
    col : (1, L) int32, column index of every flattened position.
    Returns (Co, L) f32.  The first and last flattened row of the result see
    the roll wrap-around and must be treated as invalid halo by the caller.
    """
    c = h.shape[0]
    zeros = jnp.zeros_like(h)
    shifted = (
        _roll_lanes(jnp.where(col == wo - 1, zeros, h), 1),    # reads column b-1
        h,                                                     # reads column b
        _roll_lanes(jnp.where(col == 0, zeros, h), -1),        # reads column b+1
    )
    acc = None
    for dy in range(3):
        for dx in range(3):
            src = shifted[dx]
            if dy != 1:
                src = _roll_lanes(src, (1 - dy) * wo)          # reads row a+dy-1
            wt = w[:, (3 * dy + dx) * c:(3 * dy + dx + 1) * c]
            part = jnp.dot(wt, src, preferred_element_type=jnp.float32)
            acc = part if acc is None else acc + part
    return acc


# --------------------------------- kernels ------------------------------------
def _head_kernel(xs_ref, idx_ref, w1_ref, b1_ref, w2_ref, b2_ref,
                 wsk_ref, bsk_ref, out_ref, skip_ref, *, cin, th, wo, ho):
    """Fused: conv3x3(stride 2)+bias+GELU -> conv3x3(stride 1)+bias (main path)
    and conv1x1(stride 2)+bias (skip path), for one (batch, row-tile) block."""
    f32 = jnp.float32
    re = th + 2                       # 1-row halo on each side for conv2
    l = re * wo
    t = pl.program_id(1)

    # conv1 (3x3, stride 2): 9 accumulated K=cin dots; every tap is a flat lane
    # slice of the space-to-depth input (variant = (row-par, col-par, col-off)).
    acc = None
    for dy in range(3):
        for dx in range(3):
            v = 4 * (dy & 1) + 2 * (dx & 1) + (dx >> 1)
            ay = dy >> 1
            tap = xs_ref[0, 0, v * cin:(v + 1) * cin, ay * wo:ay * wo + l]
            wt = w1_ref[:, (3 * dy + dx) * cin:(3 * dy + dx + 1) * cin]
            part = jnp.dot(wt, tap, preferred_element_type=f32)
            acc = part if acc is None else acc + part
    h1 = _gelu(acc + b1_ref[...])

    # halo rows outside the image are conv2's zero padding
    img_row = idx_ref[0:1, :] + (t * th - 1)
    h1 = jnp.where((img_row >= 0) & (img_row < ho), h1, 0.0).astype(_MM_DTYPE)

    # conv2 (3x3, stride 1) via masked-roll accumulated dots; keep central rows
    z2 = _conv3x3_rolled(h1, w2_ref[...], idx_ref[1:2, :], wo) + b2_ref[...]
    out_ref[0] = z2[:, wo:(th + 1) * wo].astype(out_ref.dtype)

    # skip: conv1x1 stride 2 == variant (p=1, q=1, ax=0) -> index 6
    xsk = xs_ref[0, 0, 6 * cin:7 * cin, wo:(th + 1) * wo]
    zsk = jnp.dot(wsk_ref[...], xsk, preferred_element_type=f32) + bsk_ref[...]
    skip_ref[0] = zsk.astype(skip_ref.dtype)


def _rbs_kernel(x_ref, skip_ref, idx_ref, w1_ref, b1_ref, w2_ref, b2_ref,
                w3_ref, b3_ref, o_ref, *, th, wo, ho, n_blocks):
    """All ResidualBottlenecks (+ the module's stride-2 skip add) for one
    (batch, row-tile) block.  An n_blocks-row halo is recomputed per tile;
    validity shrinks by one row per bottleneck, leaving the central th rows."""
    f32 = jnp.float32
    halo = n_blocks
    t = pl.program_id(1)

    img_row = idx_ref[0:1, :] + (t * th - halo)
    in_img = (img_row >= 0) & (img_row < ho)
    col = idx_ref[1:2, :]

    x = x_ref[0, 0]                                       # (cout, L), f32
    for i in range(n_blocks):
        z1 = jnp.dot(w1_ref[i], x.astype(_MM_DTYPE),
                     preferred_element_type=f32) + b1_ref[i]
        h1 = jnp.where(in_img, _gelu(z1), 0.0).astype(_MM_DTYPE)
        z2 = _conv3x3_rolled(h1, w2_ref[i], col, wo) + b2_ref[i]
        h2 = _gelu(z2).astype(_MM_DTYPE)
        x = x + jnp.dot(w3_ref[i], h2, preferred_element_type=f32) + b3_ref[i]

    out = x[:, halo * wo:(halo + th) * wo] + skip_ref[0]
    o_ref[0] = out.astype(o_ref.dtype)


# --------------------------- tiling / helper tables ----------------------------
def _pick_row_tile(ho, wo, cin, cout, half, budget_bytes=20 << 20):
    """Largest output-row tile (divisor of ho) whose estimated per-grid-step
    VMEM stays under `budget_bytes` (sized for v7x's 64 MiB physical VMEM).
    The lane extent th*wo stays 128-aligned unless the tile is the full image."""
    best = None
    for th in range(1, ho + 1):
        if ho % th:
            continue
        if th != ho and (th * wo) % 128:
            continue
        hw = th * wo
        head = (2 * 8 * cin * (th + 3) * wo * 2          # xs window (bf16, dbl-buffered)
                + 4 * 2 * cout * hw * 4                  # out + skip blocks (f32, dbl-buf)
                + 8 * cout * (th + 2) * wo * 4)          # in-flight conv1/conv2 values
        rbs = (2 * cout * (th + 6) * wo * 4              # x halo window (f32, dbl-buf)
               + 4 * 2 * cout * hw * 4                   # skip-in + out blocks
               + (cout + 8 * half) * (th + 6) * wo * 4)  # in-flight values
        if max(head, rbs) <= budget_bytes:
            best = th
    if best is None:
        # TODO(synk): very large / oddly-sized images also need a W tile.
        best = ho
    return best


def _index_planes(rows, wo):
    """(2, rows*wo) int32 constant: [0] = window row index, [1] = column index."""
    r = np.repeat(np.arange(rows, dtype=np.int32), wo)
    c = np.tile(np.arange(wo, dtype=np.int32), rows)
    return jnp.asarray(np.stack([r, c]))


# --------------------------------- wrapper ------------------------------------
def forward_pallas(x_nchw, p, stride=2):
    """ResidualBlockWithStrideRBs.forward (module default stride=2)."""
    if stride != 2:
        # TODO(synk): only the module-default stride=2 path is implemented here.
        raise NotImplementedError("forward_pallas supports stride=2 only")
    n, cin, h, w = x_nchw.shape
    assert h % 2 == 0 and w % 2 == 0, "even spatial dims required"
    cout = p["conv1_w"].shape[0]
    half = p["rbs"][0]["w1"].shape[0]
    n_blocks = len(p["rbs"])
    ho, wo = h // 2, w // 2
    hh = ho + 1
    th = _pick_row_tile(ho, wo, cin, cout, half)
    n_t = ho // th
    halo = n_blocks
    f32 = jnp.float32

    def w3x3(wt):   # OIHW -> (O, 9*I), (dy, dx, i) column order
        return jnp.transpose(wt, (0, 2, 3, 1)).reshape(
            wt.shape[0], 9 * wt.shape[1]).astype(_MM_DTYPE)

    def w1x1(wt):
        return wt.reshape(wt.shape[0], wt.shape[1]).astype(_MM_DTYPE)

    def bcol(b):
        return b.reshape(-1, 1).astype(f32)

    # Space-to-depth of the zero-padded input: 8 (row-parity, col-parity,
    # col-offset) variants of width exactly wo, row-flattened, bf16.  All
    # stride-2 3x3 taps and the 1x1 stride-2 skip become flat lane slices.
    x_pad = jnp.pad(x_nchw.astype(_MM_DTYPE), ((0, 0), (0, 0), (1, 1), (1, 1)))
    xs = x_pad.reshape(n, cin, hh, 2, wo + 1, 2).transpose(0, 3, 5, 1, 2, 4)
    xs = jnp.stack([xs[..., 0:wo], xs[..., 1:wo + 1]], axis=3)   # (n,2,2,2,cin,hh,wo)
    xs = xs.reshape(n, 8 * cin, hh, wo)
    xs = jnp.pad(xs, ((0, 0), (0, 0), (1, 1), (0, 0)))           # plane rows -1 .. hh
    xs_t = jnp.stack([xs[:, :, t * th:t * th + th + 3, :] for t in range(n_t)],
                     axis=1)
    xs_t = xs_t.reshape(n, n_t, 8 * cin, (th + 3) * wo)

    cparams = pltpu.CompilerParams(
        dimension_semantics=("parallel", "parallel"),
        vmem_limit_bytes=48 * 1024 * 1024,
    )

    # ---- call 1: fused head (conv3x3 s2 + GELU + conv3x3 s1) + conv1x1 s2 skip
    idx_head = _index_planes(th + 2, wo)
    out, skip = pl.pallas_call(
        functools.partial(_head_kernel, cin=cin, th=th, wo=wo, ho=ho),
        out_shape=(jax.ShapeDtypeStruct((n, cout, ho * wo), f32),
                   jax.ShapeDtypeStruct((n, cout, ho * wo), f32)),
        grid=(n, n_t),
        in_specs=[
            pl.BlockSpec((1, 1, 8 * cin, (th + 3) * wo), lambda b, t: (b, t, 0, 0)),
            pl.BlockSpec((2, (th + 2) * wo), lambda b, t: (0, 0)),
            pl.BlockSpec((cout, 9 * cin), lambda b, t: (0, 0)),
            pl.BlockSpec((cout, 1), lambda b, t: (0, 0)),
            pl.BlockSpec((cout, 9 * cout), lambda b, t: (0, 0)),
            pl.BlockSpec((cout, 1), lambda b, t: (0, 0)),
            pl.BlockSpec((cout, cin), lambda b, t: (0, 0)),
            pl.BlockSpec((cout, 1), lambda b, t: (0, 0)),
        ],
        out_specs=(pl.BlockSpec((1, cout, th * wo), lambda b, t: (b, 0, t)),
                   pl.BlockSpec((1, cout, th * wo), lambda b, t: (b, 0, t))),
        compiler_params=cparams,
    )(xs_t, idx_head,
      w3x3(p["conv1_w"]), bcol(p["conv1_b"]),
      w3x3(p["conv2_w"]), bcol(p["conv2_b"]),
      w1x1(p["skip_w"]), bcol(p["skip_b"]))

    # ---- call 2: the 3 ResidualBottlenecks + final skip add, fused into one call
    out4 = out.reshape(n, cout, ho, wo)
    out4 = jnp.pad(out4, ((0, 0), (0, 0), (halo, halo), (0, 0)))
    x_t = jnp.stack([out4[:, :, t * th:t * th + th + 2 * halo, :]
                     for t in range(n_t)], axis=1)
    x_t = x_t.reshape(n, n_t, cout, (th + 2 * halo) * wo)

    w1s = jnp.stack([w1x1(blk["w1"]) for blk in p["rbs"]])
    b1s = jnp.stack([bcol(blk["b1"]) for blk in p["rbs"]])
    w2s = jnp.stack([w3x3(blk["w2"]) for blk in p["rbs"]])
    b2s = jnp.stack([bcol(blk["b2"]) for blk in p["rbs"]])
    w3s = jnp.stack([w1x1(blk["w3"]) for blk in p["rbs"]])
    b3s = jnp.stack([bcol(blk["b3"]) for blk in p["rbs"]])

    idx_rbs = _index_planes(th + 2 * halo, wo)
    y = pl.pallas_call(
        functools.partial(_rbs_kernel, th=th, wo=wo, ho=ho, n_blocks=n_blocks),
        out_shape=jax.ShapeDtypeStruct((n, cout, ho * wo), f32),
        grid=(n, n_t),
        in_specs=[
            pl.BlockSpec((1, 1, cout, (th + 2 * halo) * wo), lambda b, t: (b, t, 0, 0)),
            pl.BlockSpec((1, cout, th * wo), lambda b, t: (b, 0, t)),
            pl.BlockSpec((2, (th + 2 * halo) * wo), lambda b, t: (0, 0)),
            pl.BlockSpec((n_blocks, half, cout), lambda b, t: (0, 0, 0)),
            pl.BlockSpec((n_blocks, half, 1), lambda b, t: (0, 0, 0)),
            pl.BlockSpec((n_blocks, half, 9 * half), lambda b, t: (0, 0, 0)),
            pl.BlockSpec((n_blocks, half, 1), lambda b, t: (0, 0, 0)),
            pl.BlockSpec((n_blocks, cout, half), lambda b, t: (0, 0, 0)),
            pl.BlockSpec((n_blocks, cout, 1), lambda b, t: (0, 0, 0)),
        ],
        out_specs=pl.BlockSpec((1, cout, th * wo), lambda b, t: (b, 0, t)),
        compiler_params=cparams,
    )(x_t, skip, idx_rbs, w1s, b1s, w2s, b2s, w3s, b3s)

    # TODO(synk): weight/bias BlockSpecs could use pipeline_mode=pl.Buffered(1)
    # (constant blocks need no double buffering) and the inter-call activations
    # (out / skip) could be stored bf16 once validated against the reference.
    return y.reshape(n, cout, ho, wo)


# ----------------------------- pure-JAX reference -----------------------------
def _conv_ref(x, w, b, stride, pad):
    y = lax.conv_general_dilated(
        x, w, (stride, stride), ((pad, pad), (pad, pad)),
        dimension_numbers=("NCHW", "OIHW", "NCHW"),
        precision=lax.Precision.HIGHEST)
    return y + b[None, :, None, None]


def forward_ref(x, p, stride=2):
    gelu = lambda v: 0.5 * v * (1.0 + jax.scipy.special.erf(v / _SQRT2))
    out = gelu(_conv_ref(x, p["conv1_w"], p["conv1_b"], stride, 1))
    out = _conv_ref(out, p["conv2_w"], p["conv2_b"], 1, 1)
    for blk in p["rbs"]:
        h = gelu(_conv_ref(out, blk["w1"], blk["b1"], 1, 0))
        h = gelu(_conv_ref(h, blk["w2"], blk["b2"], 1, 1))
        out = out + _conv_ref(h, blk["w3"], blk["b3"], 1, 0)
    iden = _conv_ref(x, p["skip_w"], p["skip_b"], stride, 0)
    return out + iden


# ------------------------------ parameter setup -------------------------------
def init_params(key, in_ch, out_ch):
    def conv_init(k, cout, cin, ksz, scale=0.05):
        kw, kb = jax.random.split(k)
        w = scale * jax.random.normal(kw, (cout, cin, ksz, ksz), jnp.float32)
        b = scale * jax.random.normal(kb, (cout,), jnp.float32)
        return w, b

    keys = jax.random.split(key, 12)
    p = {}
    p["conv1_w"], p["conv1_b"] = conv_init(keys[0], out_ch, in_ch, 3)   # conv3x3, stride 2
    p["conv2_w"], p["conv2_b"] = conv_init(keys[1], out_ch, out_ch, 3)  # conv3x3, stride 1
    p["skip_w"], p["skip_b"] = conv_init(keys[2], out_ch, in_ch, 1)     # conv1x1, stride 2
    half = out_ch // 2
    rbs = []
    for i in range(3):
        k1, k2, k3 = keys[3 + 3 * i: 6 + 3 * i]
        blk = {}
        blk["w1"], blk["b1"] = conv_init(k1, half, out_ch, 1)    # conv1x1 N -> N/2
        blk["w2"], blk["b2"] = conv_init(k2, half, half, 3)      # conv3x3 N/2 -> N/2
        blk["w3"], blk["b3"] = conv_init(k3, out_ch, half, 1)    # conv1x1 N/2 -> N
        rbs.append(blk)
    p["rbs"] = tuple(rbs)
    return p


if __name__ == "__main__":
    key = jax.random.PRNGKey(0)
    k_x, k_p = jax.random.split(key)
    in_ch, out_ch = 4, 8
    x = jax.random.normal(k_x, (2, in_ch, 16, 16), jnp.float32)
    params = init_params(k_p, in_ch, out_ch)

    out = jax.jit(forward_pallas)(x, params)
    out = jax.block_until_ready(out)
    assert out.shape == (2, out_ch, 8, 8), out.shape

    ref = forward_ref(x, params)
    max_err = float(jnp.max(jnp.abs(out - ref)))
    if not (bool(jnp.all(jnp.isfinite(out))) and max_err < 3e-2):
        raise AssertionError(f"Pallas output mismatch vs reference: max_err={max_err}")

    print("KERNEL_OK")
</pallas_src>

<mosaic_0001>
module attributes {stable_mosaic.version = 11 : i64} {
  func.func @_head_kernel(%arg0: i32, %arg1: i32, %arg2: memref<1x1x32x88xbf16, #tpu.memory_space<vmem>>, %arg3: memref<2x80xi32, #tpu.memory_space<vmem>>, %arg4: memref<8x36xbf16, #tpu.memory_space<vmem>>, %arg5: memref<8x1xf32, #tpu.memory_space<vmem>>, %arg6: memref<8x72xbf16, #tpu.memory_space<vmem>>, %arg7: memref<8x1xf32, #tpu.memory_space<vmem>>, %arg8: memref<8x4xbf16, #tpu.memory_space<vmem>>, %arg9: memref<8x1xf32, #tpu.memory_space<vmem>>, %arg10: memref<1x8x64xf32, #tpu.memory_space<vmem>>, %arg11: memref<1x8x64xf32, #tpu.memory_space<vmem>>) attributes {dimension_semantics = [#tpu.dimension_semantics<parallel>, #tpu.dimension_semantics<parallel>], iteration_bounds = array<i64: 2, 1>, scalar_prefetch = 0 : i64, scratch_operands = 0 : i64, tpu.core_type = #tpu.core_type<tc>, window_params = [{transform_indices = @transform_0, window_bounds = array<i64: 1, 1, 32, 88>}, {pipeline_mode = #tpu.pipeline_mode<synchronous>, transform_indices = @transform_1, window_bounds = array<i64: 2, 80>}, {pipeline_mode = #tpu.pipeline_mode<synchronous>, transform_indices = @transform_2, window_bounds = array<i64: 8, 36>}, {pipeline_mode = #tpu.pipeline_mode<synchronous>, transform_indices = @transform_3, window_bounds = array<i64: 8, 1>}, {pipeline_mode = #tpu.pipeline_mode<synchronous>, transform_indices = @transform_4, window_bounds = array<i64: 8, 72>}, {pipeline_mode = #tpu.pipeline_mode<synchronous>, transform_indices = @transform_5, window_bounds = array<i64: 8, 1>}, {pipeline_mode = #tpu.pipeline_mode<synchronous>, transform_indices = @transform_6, window_bounds = array<i64: 8, 4>}, {pipeline_mode = #tpu.pipeline_mode<synchronous>, transform_indices = @transform_7, window_bounds = array<i64: 8, 1>}, {transform_indices = @transform_8, window_bounds = array<i64: 1, 8, 64>}, {transform_indices = @transform_9, window_bounds = array<i64: 1, 8, 64>}]} {
    %c0 = arith.constant 0 : index
    %c0_0 = arith.constant 0 : index
    %c0_1 = arith.constant 0 : index
    %c0_2 = arith.constant 0 : index
    %0 = vector.load %arg2[%c0, %c0_0, %c0_1, %c0_2] : memref<1x1x32x88xbf16, #tpu.memory_space<vmem>>, vector<1x1x4x80xbf16>
    %1 = vector.shape_cast %0 : vector<1x1x4x80xbf16> to vector<4x80xbf16>
    %c0_3 = arith.constant 0 : index
    %c0_4 = arith.constant 0 : index
    %2 = vector.load %arg4[%c0_3, %c0_4] : memref<8x36xbf16, #tpu.memory_space<vmem>>, vector<8x4xbf16>
    %cst = arith.constant dense<0.000000e+00> : vector<8x80xf32>
    %3 = tpu.matmul %2, %1, %cst {dimension_numbers = #tpu.dot_dimension_numbers<[1], [0], [0], [1], [0, 0, 1, 1], [], []>} : vector<8x4xbf16>, vector<4x80xbf16>, vector<8x80xf32> -> vector<8x80xf32>
    %c0_5 = arith.constant 0 : index
    %c0_6 = arith.constant 0 : index
    %c8 = arith.constant 8 : index
    %c0_7 = arith.constant 0 : index
    %4 = vector.load %arg2[%c0_5, %c0_6, %c8, %c0_7] : memref<1x1x32x88xbf16, #tpu.memory_space<vmem>>, vector<1x1x4x80xbf16>
    %5 = vector.shape_cast %4 : vector<1x1x4x80xbf16> to vector<4x80xbf16>
    %c0_8 = arith.constant 0 : index
    %c4 = arith.constant 4 : index
    %6 = vector.load %arg4[%c0_8, %c4] : memref<8x36xbf16, #tpu.memory_space<vmem>>, vector<8x4xbf16>
    %cst_9 = arith.constant dense<0.000000e+00> : vector<8x80xf32>
    %7 = tpu.matmul %6, %5, %cst_9 {dimension_numbers = #tpu.dot_dimension_numbers<[1], [0], [0], [1], [0, 0, 1, 1], [], []>} : vector<8x4xbf16>, vector<4x80xbf16>, vector<8x80xf32> -> vector<8x80xf32>
    %8 = arith.addf %3, %7 : vector<8x80xf32>
    %c0_10 = arith.constant 0 : index
    %c0_11 = arith.constant 0 : index
    %c4_12 = arith.constant 4 : index
    %c0_13 = arith.constant 0 : index
    %9 = vector.load %arg2[%c0_10, %c0_11, %c4_12, %c0_13] : memref<1x1x32x88xbf16, #tpu.memory_space<vmem>>, vector<1x1x4x80xbf16>
    %10 = vector.shape_cast %9 : vector<1x1x4x80xbf16> to vector<4x80xbf16>
    %c0_14 = arith.constant 0 : index
    %c8_15 = arith.constant 8 : index
    %11 = vector.load %arg4[%c0_14, %c8_15] : memref<8x36xbf16, #tpu.memory_space<vmem>>, vector<8x4xbf16>
    %cst_16 = arith.constant dense<0.000000e+00> : vector<8x80xf32>
    %12 = tpu.matmul %11, %10, %cst_16 {dimension_numbers = #tpu.dot_dimension_numbers<[1], [0], [0], [1], [0, 0, 1, 1], [], []>} : vector<8x4xbf16>, vector<4x80xbf16>, vector<8x80xf32> -> vector<8x80xf32>
    %13 = arith.addf %8, %12 : vector<8x80xf32>
    %c0_17 = arith.constant 0 : index
    %c0_18 = arith.constant 0 : index
    %c16 = arith.constant 16 : index
    %c0_19 = arith.constant 0 : index
    %14 = vector.load %arg2[%c0_17, %c0_18, %c16, %c0_19] : memref<1x1x32x88xbf16, #tpu.memory_space<vmem>>, vector<1x1x4x80xbf16>
    %15 = vector.shape_cast %14 : vector<1x1x4x80xbf16> to vector<4x80xbf16>
    %c0_20 = arith.constant 0 : index
    %c12 = arith.constant 12 : index
    %16 = vector.load %arg4[%c0_20, %c12] : memref<8x36xbf16, #tpu.memory_space<vmem>>, vector<8x4xbf16>
    %cst_21 = arith.constant dense<0.000000e+00> : vector<8x80xf32>
    %17 = tpu.matmul %16, %15, %cst_21 {dimension_numbers = #tpu.dot_dimension_numbers<[1], [0], [0], [1], [0, 0, 1, 1], [], []>} : vector<8x4xbf16>, vector<4x80xbf16>, vector<8x80xf32> -> vector<8x80xf32>
    %18 = arith.addf %13, %17 : vector<8x80xf32>
    %c0_22 = arith.constant 0 : index
    %c0_23 = arith.constant 0 : index
    %c24 = arith.constant 24 : index
    %c0_24 = arith.constant 0 : index
    %19 = vector.load %arg2[%c0_22, %c0_23, %c24, %c0_24] : memref<1x1x32x88xbf16, #tpu.memory_space<vmem>>, vector<1x1x4x80xbf16>
    %20 = vector.shape_cast %19 : vector<1x1x4x80xbf16> to vector<4x80xbf16>
    %c0_25 = arith.constant 0 : index
    %c16_26 = arith.constant 16 : index
    %21 = vector.load %arg4[%c0_25, %c16_26] : memref<8x36xbf16, #tpu.memory_space<vmem>>, vector<8x4xbf16>
    %cst_27 = arith.constant dense<0.000000e+00> : vector<8x80xf32>
    %22 = tpu.matmul %21, %20, %cst_27 {dimension_numbers = #tpu.dot_dimension_numbers<[1], [0], [0], [1], [0, 0, 1, 1], [], []>} : vector<8x4xbf16>, vector<4x80xbf16>, vector<8x80xf32> -> vector<8x80xf32>
    %23 = arith.addf %18, %22 : vector<8x80xf32>
    %c0_28 = arith.constant 0 : index
    %c0_29 = arith.constant 0 : index
    %c20 = arith.constant 20 : index
    %c0_30 = arith.constant 0 : index
    %24 = vector.load %arg2[%c0_28, %c0_29, %c20, %c0_30] : memref<1x1x32x88xbf16, #tpu.memory_space<vmem>>, vector<1x1x4x80xbf16>
    %25 = vector.shape_cast %24 : vector<1x1x4x80xbf16> to vector<4x80xbf16>
    %c0_31 = arith.constant 0 : index
    %c20_32 = arith.constant 20 : index
    %26 = vector.load %arg4[%c0_31, %c20_32] : memref<8x36xbf16, #tpu.memory_space<vmem>>, vector<8x4xbf16>
    %cst_33 = arith.constant dense<0.000000e+00> : vector<8x80xf32>
    %27 = tpu.matmul %26, %25, %cst_33 {dimension_numbers = #tpu.dot_dimension_numbers<[1], [0], [0], [1], [0, 0, 1, 1], [], []>} : vector<8x4xbf16>, vector<4x80xbf16>, vector<8x80xf32> -> vector<8x80xf32>
    %28 = arith.addf %23, %27 : vector<8x80xf32>
    %c0_34 = arith.constant 0 : index
    %c0_35 = arith.constant 0 : index
    %c0_36 = arith.constant 0 : index
    %c8_37 = arith.constant 8 : index
    %29 = vector.load %arg2[%c0_34, %c0_35, %c0_36, %c8_37] : memref<1x1x32x88xbf16, #tpu.memory_space<vmem>>, vector<1x1x4x80xbf16>
    %30 = vector.shape_cast %29 : vector<1x1x4x80xbf16> to vector<4x80xbf16>
    %c0_38 = arith.constant 0 : index
    %c24_39 = arith.constant 24 : index
    %31 = vector.load %arg4[%c0_38, %c24_39] : memref<8x36xbf16, #tpu.memory_space<vmem>>, vector<8x4xbf16>
    %cst_40 = arith.constant dense<0.000000e+00> : vector<8x80xf32>
    %32 = tpu.matmul %31, %30, %cst_40 {dimension_numbers = #tpu.dot_dimension_numbers<[1], [0], [0], [1], [0, 0, 1, 1], [], []>} : vector<8x4xbf16>, vector<4x80xbf16>, vector<8x80xf32> -> vector<8x80xf32>
    %33 = arith.addf %28, %32 : vector<8x80xf32>
    %c0_41 = arith.constant 0 : index
    %c0_42 = arith.constant 0 : index
    %c8_43 = arith.constant 8 : index
    %c8_44 = arith.constant 8 : index
    %34 = vector.load %arg2[%c0_41, %c0_42, %c8_43, %c8_44] : memref<1x1x32x88xbf16, #tpu.memory_space<vmem>>, vector<1x1x4x80xbf16>
    %35 = vector.shape_cast %34 : vector<1x1x4x80xbf16> to vector<4x80xbf16>
    %c0_45 = arith.constant 0 : index
    %c28 = arith.constant 28 : index
    %36 = vector.load %arg4[%c0_45, %c28] : memref<8x36xbf16, #tpu.memory_space<vmem>>, vector<8x4xbf16>
    %cst_46 = arith.constant dense<0.000000e+00> : vector<8x80xf32>
    %37 = tpu.matmul %36, %35, %cst_46 {dimension_numbers = #tpu.dot_dimension_numbers<[1], [0], [0], [1], [0, 0, 1, 1], [], []>} : vector<8x4xbf16>, vector<4x80xbf16>, vector<8x80xf32> -> vector<8x80xf32>
    %38 = arith.addf %33, %37 : vector<8x80xf32>
    %c0_47 = arith.constant 0 : index
    %c0_48 = arith.constant 0 : index
    %c4_49 = arith.constant 4 : index
    %c8_50 = arith.constant 8 : index
    %39 = vector.load %arg2[%c0_47, %c0_48, %c4_49, %c8_50] : memref<1x1x32x88xbf16, #tpu.memory_space<vmem>>, vector<1x1x4x80xbf16>
    %40 = vector.shape_cast %39 : vector<1x1x4x80xbf16> to vector<4x80xbf16>
    %c0_51 = arith.constant 0 : index
    %c32 = arith.constant 32 : index
    %41 = vector.load %arg4[%c0_51, %c32] : memref<8x36xbf16, #tpu.memory_space<vmem>>, vector<8x4xbf16>
    %cst_52 = arith.constant dense<0.000000e+00> : vector<8x80xf32>
    %42 = tpu.matmul %41, %40, %cst_52 {dimension_numbers = #tpu.dot_dimension_numbers<[1], [0], [0], [1], [0, 0, 1, 1], [], []>} : vector<8x4xbf16>, vector<4x80xbf16>, vector<8x80xf32> -> vector<8x80xf32>
    %43 = arith.addf %38, %42 : vector<8x80xf32>
    %c0_53 = arith.constant 0 : index
    %c0_54 = arith.constant 0 : index
    %44 = vector.load %arg5[%c0_53, %c0_54] : memref<8x1xf32, #tpu.memory_space<vmem>>, vector<8x1xf32>
    %45 = vector.broadcast %44 : vector<8x1xf32> to vector<8x80xf32>
    %46 = arith.addf %43, %45 : vector<8x80xf32>
    %cst_55 = arith.constant 5.000000e-01 : f32
    %47 = vector.broadcast %cst_55 : f32 to vector<8x80xf32>
    %48 = arith.mulf %47, %46 : vector<8x80xf32>
    %cst_56 = arith.constant 0.707106769 : f32
    %49 = vector.broadcast %cst_56 : f32 to vector<8x80xf32>
    %50 = arith.mulf %46, %49 : vector<8x80xf32>
    %cst_57 = arith.constant 0.000000e+00 : f32
    %51 = vector.broadcast %cst_57 : f32 to vector<8x80xf32>
    %52 = arith.cmpf oge, %50, %51 : vector<8x80xf32>
    %cst_58 = arith.constant 1.000000e+00 : f32
    %cst_59 = arith.constant -1.000000e+00 : f32
    %53 = vector.broadcast %cst_58 : f32 to vector<8x80xf32>
    %54 = vector.broadcast %cst_59 : f32 to vector<8x80xf32>
    %55 = arith.select %52, %53, %54 : vector<8x80xi1>, vector<8x80xf32>
    %56 = math.absf %50 : vector<8x80xf32>
    %cst_60 = arith.constant 0.327591091 : f32
    %57 = vector.broadcast %cst_60 : f32 to vector<8x80xf32>
    %58 = arith.mulf %57, %56 : vector<8x80xf32>
    %cst_61 = arith.constant 1.000000e+00 : f32
    %59 = vector.broadcast %cst_61 : f32 to vector<8x80xf32>
    %60 = arith.addf %59, %58 : vector<8x80xf32>
    %cst_62 = arith.constant 1.000000e+00 : f32
    %61 = vector.broadcast %cst_62 : f32 to vector<8x80xf32>
    %62 = arith.divf %61, %60 : vector<8x80xf32>
    %cst_63 = arith.constant 1.06140542 : f32
    %63 = vector.broadcast %cst_63 : f32 to vector<8x80xf32>
    %64 = arith.mulf %63, %62 : vector<8x80xf32>
    %cst_64 = arith.constant -1.45315206 : f32
    %65 = vector.broadcast %cst_64 : f32 to vector<8x80xf32>
    %66 = arith.addf %64, %65 : vector<8x80xf32>
    %67 = arith.mulf %66, %62 : vector<8x80xf32>
    %cst_65 = arith.constant 1.42141378 : f32
    %68 = vector.broadcast %cst_65 : f32 to vector<8x80xf32>
    %69 = arith.addf %67, %68 : vector<8x80xf32>
    %70 = arith.mulf %69, %62 : vector<8x80xf32>
    %cst_66 = arith.constant -0.284496725 : f32
    %71 = vector.broadcast %cst_66 : f32 to vector<8x80xf32>
    %72 = arith.addf %70, %71 : vector<8x80xf32>
    %73 = arith.mulf %72, %62 : vector<8x80xf32>
    %cst_67 = arith.constant 0.254829586 : f32
    %74 = vector.broadcast %cst_67 : f32 to vector<8x80xf32>
    %75 = arith.addf %73, %74 : vector<8x80xf32>
    %76 = arith.mulf %75, %62 : vector<8x80xf32>
    %cst_68 = arith.constant 0.000000e+00 : f32
    %77 = vector.broadcast %cst_68 : f32 to vector<8x80xf32>
    %78 = arith.subf %77, %56 : vector<8x80xf32>
    %79 = arith.mulf %78, %56 : vector<8x80xf32>
    %80 = math.exp %79 : vector<8x80xf32>
    %81 = arith.mulf %76, %80 : vector<8x80xf32>
    %cst_69 = arith.constant 1.000000e+00 : f32
    %82 = vector.broadcast %cst_69 : f32 to vector<8x80xf32>
    %83 = arith.subf %82, %81 : vector<8x80xf32>
    %84 = arith.mulf %55, %83 : vector<8x80xf32>
    %cst_70 = arith.constant 1.000000e+00 : f32
    %85 = vector.broadcast %cst_70 : f32 to vector<8x80xf32>
    %86 = arith.addf %85, %84 : vector<8x80xf32>
    %87 = arith.mulf %48, %86 : vector<8x80xf32>
    %c0_71 = arith.constant 0 : index
    %c0_72 = arith.constant 0 : index
    %88 = vector.load %arg3[%c0_71, %c0_72] : memref<2x80xi32, #tpu.memory_space<vmem>>, vector<1x80xi32>
    %c8_i32 = arith.constant 8 : i32
    %89 = arith.muli %arg1, %c8_i32 : i32
    %c1_i32 = arith.constant 1 : i32
    %90 = arith.subi %89, %c1_i32 : i32
    %91 = vector.broadcast %90 : i32 to vector<1x80xi32>
    %92 = arith.addi %88, %91 : vector<1x80xi32>
    %c0_i32 = arith.constant 0 : i32
    %93 = vector.broadcast %c0_i32 : i32 to vector<1x80xi32>
    %94 = arith.cmpi sge, %92, %93 : vector<1x80xi32>
    %c8_i32_73 = arith.constant 8 : i32
    %95 = vector.broadcast %c8_i32_73 : i32 to vector<1x80xi32>
    %96 = arith.cmpi slt, %92, %95 : vector<1x80xi32>
    %97 = arith.andi %94, %96 : vector<1x80xi1>
    %cst_74 = arith.constant 0.000000e+00 : f32
    %98 = vector.shape_cast %97 : vector<1x80xi1> to vector<1x80xi1>
    %99 = vector.broadcast %98 : vector<1x80xi1> to vector<8x80xi1>
    %100 = vector.broadcast %cst_74 : f32 to vector<8x80xf32>
    %101 = arith.select %99, %87, %100 : vector<8x80xi1>, vector<8x80xf32>
    %102 = arith.truncf %101 : vector<8x80xf32> to vector<8x80xbf16>
    %c0_75 = arith.constant 0 : index
    %c0_76 = arith.constant 0 : index
    %103 = vector.load %arg6[%c0_75, %c0_76] : memref<8x72xbf16, #tpu.memory_space<vmem>>, vector<8x72xbf16>
    %c1 = arith.constant 1 : index
    %c0_77 = arith.constant 0 : index
    %104 = vector.load %arg3[%c1, %c0_77] : memref<2x80xi32, #tpu.memory_space<vmem>>, vector<1x80xi32>
    %cst_78 = arith.constant 0.000000e+00 : bf16
    %105 = vector.broadcast %cst_78 : bf16 to vector<8x80xbf16>
    %c7_i32 = arith.constant 7 : i32
    %106 = vector.broadcast %c7_i32 : i32 to vector<1x80xi32>
    %107 = arith.cmpi eq, %104, %106 : vector<1x80xi32>
    %108 = vector.shape_cast %107 : vector<1x80xi1> to vector<1x80xi1>
    %109 = vector.broadcast %108 : vector<1x80xi1> to vector<8x80xi1>
    %110 = arith.select %109, %105, %102 : vector<8x80xi1>, vector<8x80xbf16>
    %111 = vector.extract_strided_slice %110 {offsets = [0, 79], sizes = [8, 1], strides = [1, 1]} : vector<8x80xbf16> to vector<8x1xbf16>
    %112 = vector.extract_strided_slice %110 {offsets = [0, 0], sizes = [8, 79], strides = [1, 1]} : vector<8x80xbf16> to vector<8x79xbf16>
    %113 = tpu.concatenate %111, %112 in 1 : vector<8x1xbf16>, vector<8x79xbf16> -> vector<8x80xbf16>
    %c0_i32_79 = arith.constant 0 : i32
    %114 = vector.broadcast %c0_i32_79 : i32 to vector<1x80xi32>
    %115 = arith.cmpi eq, %104, %114 : vector<1x80xi32>
    %116 = vector.shape_cast %115 : vector<1x80xi1> to vector<1x80xi1>
    %117 = vector.broadcast %116 : vector<1x80xi1> to vector<8x80xi1>
    %118 = arith.select %117, %105, %102 : vector<8x80xi1>, vector<8x80xbf16>
    %119 = vector.extract_strided_slice %118 {offsets = [0, 1], sizes = [8, 79], strides = [1, 1]} : vector<8x80xbf16> to vector<8x79xbf16>
    %120 = vector.extract_strided_slice %118 {offsets = [0, 0], sizes = [8, 1], strides = [1, 1]} : vector<8x80xbf16> to vector<8x1xbf16>
    %121 = tpu.concatenate %119, %120 in 1 : vector<8x79xbf16>, vector<8x1xbf16> -> vector<8x80xbf16>
    %122 = vector.extract_strided_slice %113 {offsets = [0, 72], sizes = [8, 8], strides = [1, 1]} : vector<8x80xbf16> to vector<8x8xbf16>
    %123 = vector.extract_strided_slice %113 {offsets = [0, 0], sizes = [8, 72], strides = [1, 1]} : vector<8x80xbf16> to vector<8x72xbf16>
    %124 = tpu.concatenate %122, %123 in 1 : vector<8x8xbf16>, vector<8x72xbf16> -> vector<8x80xbf16>
    %125 = vector.extract_strided_slice %103 {offsets = [0, 0], sizes = [8, 8], strides = [1, 1]} : vector<8x72xbf16> to vector<8x8xbf16>
    %cst_80 = arith.constant dense<0.000000e+00> : vector<8x80xf32>
    %126 = tpu.matmul %125, %124, %cst_80 {dimension_numbers = #tpu.dot_dimension_numbers<[1], [0], [0], [1], [0, 0, 1, 1], [], []>} : vector<8x8xbf16>, vector<8x80xbf16>, vector<8x80xf32> -> vector<8x80xf32>
    %127 = vector.extract_strided_slice %102 {offsets = [0, 72], sizes = [8, 8], strides = [1, 1]} : vector<8x80xbf16> to vector<8x8xbf16>
    %128 = vector.extract_strided_slice %102 {offsets = [0, 0], sizes = [8, 72], strides = [1, 1]} : vector<8x80xbf16> to vector<8x72xbf16>
    %129 = tpu.concatenate %127, %128 in 1 : vector<8x8xbf16>, vector<8x72xbf16> -> vector<8x80xbf16>
    %130 = vector.extract_strided_slice %103 {offsets = [0, 8], sizes = [8, 8], strides = [1, 1]} : vector<8x72xbf16> to vector<8x8xbf16>
    %cst_81 = arith.constant dense<0.000000e+00> : vector<8x80xf32>
    %131 = tpu.matmul %130, %129, %cst_81 {dimension_numbers = #tpu.dot_dimension_numbers<[1], [0], [0], [1], [0, 0, 1, 1], [], []>} : vector<8x8xbf16>, vector<8x80xbf16>, vector<8x80xf32> -> vector<8x80xf32>
    %132 = arith.addf %126, %131 : vector<8x80xf32>
    %133 = vector.extract_strided_slice %121 {offsets = [0, 72], sizes = [8, 8], strides = [1, 1]} : vector<8x80xbf16> to vector<8x8xbf16>
    %134 = vector.extract_strided_slice %121 {offsets = [0, 0], sizes = [8, 72], strides = [1, 1]} : vector<8x80xbf16> to vector<8x72xbf16>
    %135 = tpu.concatenate %133, %134 in 1 : vector<8x8xbf16>, vector<8x72xbf16> -> vector<8x80xbf16>
    %136 = vector.extract_strided_slice %103 {offsets = [0, 16], sizes = [8, 8], strides = [1, 1]} : vector<8x72xbf16> to vector<8x8xbf16>
    %cst_82 = arith.constant dense<0.000000e+00> : vector<8x80xf32>
    %137 = tpu.matmul %136, %135, %cst_82 {dimension_numbers = #tpu.dot_dimension_numbers<[1], [0], [0], [1], [0, 0, 1, 1], [], []>} : vector<8x8xbf16>, vector<8x80xbf16>, vector<8x80xf32> -> vector<8x80xf32>
    %138 = arith.addf %132, %137 : vector<8x80xf32>
    %139 = vector.extract_strided_slice %103 {offsets = [0, 24], sizes = [8, 8], strides = [1, 1]} : vector<8x72xbf16> to vector<8x8xbf16>
    %cst_83 = arith.constant dense<0.000000e+00> : vector<8x80xf32>
    %140 = tpu.matmul %139, %113, %cst_83 {dimension_numbers = #tpu.dot_dimension_numbers<[1], [0], [0], [1], [0, 0, 1, 1], [], []>} : vector<8x8xbf16>, vector<8x80xbf16>, vector<8x80xf32> -> vector<8x80xf32>
    %141 = arith.addf %138, %140 : vector<8x80xf32>
    %142 = vector.extract_strided_slice %103 {offsets = [0, 32], sizes = [8, 8], strides = [1, 1]} : vector<8x72xbf16> to vector<8x8xbf16>
    %cst_84 = arith.constant dense<0.000000e+00> : vector<8x80xf32>
    %143 = tpu.matmul %142, %102, %cst_84 {dimension_numbers = #tpu.dot_dimension_numbers<[1], [0], [0], [1], [0, 0, 1, 1], [], []>} : vector<8x8xbf16>, vector<8x80xbf16>, vector<8x80xf32> -> vector<8x80xf32>
    %144 = arith.addf %141, %143 : vector<8x80xf32>
    %145 = vector.extract_strided_slice %103 {offsets = [0, 40], sizes = [8, 8], strides = [1, 1]} : vector<8x72xbf16> to vector<8x8xbf16>
    %cst_85 = arith.constant dense<0.000000e+00> : vector<8x80xf32>
    %146 = tpu.matmul %145, %121, %cst_85 {dimension_numbers = #tpu.dot_dimension_numbers<[1], [0], [0], [1], [0, 0, 1, 1], [], []>} : vector<8x8xbf16>, vector<8x80xbf16>, vector<8x80xf32> -> vector<8x80xf32>
    %147 = arith.addf %144, %146 : vector<8x80xf32>
    %148 = vector.extract_strided_slice %113 {offsets = [0, 8], sizes = [8, 72], strides = [1, 1]} : vector<8x80xbf16> to vector<8x72xbf16>
    %149 = vector.extract_strided_slice %113 {offsets = [0, 0], sizes = [8, 8], strides = [1, 1]} : vector<8x80xbf16> to vector<8x8xbf16>
    %150 = tpu.concatenate %148, %149 in 1 : vector<8x72xbf16>, vector<8x8xbf16> -> vector<8x80xbf16>
    %151 = vector.extract_strided_slice %103 {offsets = [0, 48], sizes = [8, 8], strides = [1, 1]} : vector<8x72xbf16> to vector<8x8xbf16>
    %cst_86 = arith.constant dense<0.000000e+00> : vector<8x80xf32>
    %152 = tpu.matmul %151, %150, %cst_86 {dimension_numbers = #tpu.dot_dimension_numbers<[1], [0], [0], [1], [0, 0, 1, 1], [], []>} : vector<8x8xbf16>, vector<8x80xbf16>, vector<8x80xf32> -> vector<8x80xf32>
    %153 = arith.addf %147, %152 : vector<8x80xf32>
    %154 = vector.extract_strided_slice %102 {offsets = [0, 8], sizes = [8, 72], strides = [1, 1]} : vector<8x80xbf16> to vector<8x72xbf16>
    %155 = vector.extract_strided_slice %102 {offsets = [0, 0], sizes = [8, 8], strides = [1, 1]} : vector<8x80xbf16> to vector<8x8xbf16>
    %156 = tpu.concatenate %154, %155 in 1 : vector<8x72xbf16>, vector<8x8xbf16> -> vector<8x80xbf16>
    %157 = vector.extract_strided_slice %103 {offsets = [0, 56], sizes = [8, 8], strides = [1, 1]} : vector<8x72xbf16> to vector<8x8xbf16>
    %cst_87 = arith.constant dense<0.000000e+00> : vector<8x80xf32>
    %158 = tpu.matmul %157, %156, %cst_87 {dimension_numbers = #tpu.dot_dimension_numbers<[1], [0], [0], [1], [0, 0, 1, 1], [], []>} : vector<8x8xbf16>, vector<8x80xbf16>, vector<8x80xf32> -> vector<8x80xf32>
    %159 = arith.addf %153, %158 : vector<8x80xf32>
    %160 = vector.extract_strided_slice %121 {offsets = [0, 8], sizes = [8, 72], strides = [1, 1]} : vector<8x80xbf16> to vector<8x72xbf16>
    %161 = vector.extract_strided_slice %121 {offsets = [0, 0], sizes = [8, 8], strides = [1, 1]} : vector<8x80xbf16> to vector<8x8xbf16>
    %162 = tpu.concatenate %160, %161 in 1 : vector<8x72xbf16>, vector<8x8xbf16> -> vector<8x80xbf16>
    %163 = vector.extract_strided_slice %103 {offsets = [0, 64], sizes = [8, 8], strides = [1, 1]} : vector<8x72xbf16> to vector<8x8xbf16>
    %cst_88 = arith.constant dense<0.000000e+00> : vector<8x80xf32>
    %164 = tpu.matmul %163, %162, %cst_88 {dimension_numbers = #tpu.dot_dimension_numbers<[1], [0], [0], [1], [0, 0, 1, 1], [], []>} : vector<8x8xbf16>, vector<8x80xbf16>, vector<8x80xf32> -> vector<8x80xf32>
    %165 = arith.addf %159, %164 : vector<8x80xf32>
    %c0_89 = arith.constant 0 : index
    %c0_90 = arith.constant 0 : index
    %166 = vector.load %arg7[%c0_89, %c0_90] : memref<8x1xf32, #tpu.memory_space<vmem>>, vector<8x1xf32>
    %167 = vector.broadcast %166 : vector<8x1xf32> to vector<8x80xf32>
    %168 = arith.addf %165, %167 : vector<8x80xf32>
    %169 = vector.extract_strided_slice %168 {offsets = [0, 8], sizes = [8, 64], strides = [1, 1]} : vector<8x80xf32> to vector<8x64xf32>
    %c0_91 = arith.constant 0 : index
    %c0_92 = arith.constant 0 : index
    %c0_93 = arith.constant 0 : index
    %170 = vector.load %arg10[%c0_91, %c0_92, %c0_93] : memref<1x8x64xf32, #tpu.memory_space<vmem>>, vector<1x8x64xf32>
    %171 = vector.shape_cast %170 : vector<1x8x64xf32> to vector<8x64xf32>
    %172 = vector.shape_cast %169 : vector<8x64xf32> to vector<1x8x64xf32>
    tpu.vector_store %arg10[%c0_91, %c0_92, %c0_93], %172 {strides = array<i32>} : memref<1x8x64xf32, #tpu.memory_space<vmem>>, vector<1x8x64xf32>,
    %c0_94 = arith.constant 0 : index
    %c0_95 = arith.constant 0 : index
    %c24_96 = arith.constant 24 : index
    %c8_97 = arith.constant 8 : index
    %173 = vector.load %arg2[%c0_94, %c0_95, %c24_96, %c8_97] : memref<1x1x32x88xbf16, #tpu.memory_space<vmem>>, vector<1x1x4x64xbf16>
    %174 = vector.shape_cast %173 : vector<1x1x4x64xbf16> to vector<4x64xbf16>
    %c0_98 = arith.constant 0 : index
    %c0_99 = arith.constant 0 : index
    %175 = vector.load %arg8[%c0_98, %c0_99] : memref<8x4xbf16, #tpu.memory_space<vmem>>, vector<8x4xbf16>
    %cst_100 = arith.constant dense<0.000000e+00> : vector<8x64xf32>
    %176 = tpu.matmul %175, %174, %cst_100 {dimension_numbers = #tpu.dot_dimension_numbers<[1], [0], [0], [1], [0, 0, 1, 1], [], []>} : vector<8x4xbf16>, vector<4x64xbf16>, vector<8x64xf32> -> vector<8x64xf32>
    %c0_101 = arith.constant 0 : index
    %c0_102 = arith.constant 0 : index
    %177 = vector.load %arg9[%c0_101, %c0_102] : memref<8x1xf32, #tpu.memory_space<vmem>>, vector<8x1xf32>
    %178 = vector.broadcast %177 : vector<8x1xf32> to vector<8x64xf32>
    %179 = arith.addf %176, %178 : vector<8x64xf32>
    %c0_103 = arith.constant 0 : index
    %c0_104 = arith.constant 0 : index
    %c0_105 = arith.constant 0 : index
    %180 = vector.load %arg11[%c0_103, %c0_104, %c0_105] : memref<1x8x64xf32, #tpu.memory_space<vmem>>, vector<1x8x64xf32>
    %181 = vector.shape_cast %180 : vector<1x8x64xf32> to vector<8x64xf32>
    %182 = vector.shape_cast %179 : vector<8x64xf32> to vector<1x8x64xf32>
    tpu.vector_store %arg11[%c0_103, %c0_104, %c0_105], %182 {strides = array<i32>} : memref<1x8x64xf32, #tpu.memory_space<vmem>>, vector<1x8x64xf32>,
    return
  }
  func.func @transform_0(%arg0: i32, %arg1: i32) -> (i32, i32, i32, i32) {
    %c0_i32 = arith.constant 0 : i32
    %c0_i32_0 = arith.constant 0 : i32
    %c0_i32_1 = arith.constant 0 : i32
    return %arg0, %arg1, %c0_i32, %c0_i32_0 : i32, i32, i32, i32
  }
  func.func @transform_1(%arg0: i32, %arg1: i32) -> (i32, i32) {
    %c0_i32 = arith.constant 0 : i32
    %c0_i32_0 = arith.constant 0 : i32
    %c0_i32_1 = arith.constant 0 : i32
    return %c0_i32, %c0_i32_0 : i32, i32
  }
  func.func @transform_2(%arg0: i32, %arg1: i32) -> (i32, i32) {
    %c0_i32 = arith.constant 0 : i32
    %c0_i32_0 = arith.constant 0 : i32
    %c0_i32_1 = arith.constant 0 : i32
    return %c0_i32, %c0_i32_0 : i32, i32
  }
  func.func @transform_3(%arg0: i32, %arg1: i32) -> (i32, i32) {
    %c0_i32 = arith.constant 0 : i32
    %c0_i32_0 = arith.constant 0 : i32
    %c0_i32_1 = arith.constant 0 : i32
    return %c0_i32, %c0_i32_0 : i32, i32
  }
  func.func @transform_4(%arg0: i32, %arg1: i32) -> (i32, i32) {
    %c0_i32 = arith.constant 0 : i32
    %c0_i32_0 = arith.constant 0 : i32
    %c0_i32_1 = arith.constant 0 : i32
    return %c0_i32, %c0_i32_0 : i32, i32
  }
  func.func @transform_5(%arg0: i32, %arg1: i32) -> (i32, i32) {
    %c0_i32 = arith.constant 0 : i32
    %c0_i32_0 = arith.constant 0 : i32
    %c0_i32_1 = arith.constant 0 : i32
    return %c0_i32, %c0_i32_0 : i32, i32
  }
  func.func @transform_6(%arg0: i32, %arg1: i32) -> (i32, i32) {
    %c0_i32 = arith.constant 0 : i32
    %c0_i32_0 = arith.constant 0 : i32
    %c0_i32_1 = arith.constant 0 : i32
    return %c0_i32, %c0_i32_0 : i32, i32
  }
  func.func @transform_7(%arg0: i32, %arg1: i32) -> (i32, i32) {
    %c0_i32 = arith.constant 0 : i32
    %c0_i32_0 = arith.constant 0 : i32
    %c0_i32_1 = arith.constant 0 : i32
    return %c0_i32, %c0_i32_0 : i32, i32
  }
  func.func @transform_8(%arg0: i32, %arg1: i32) -> (i32, i32, i32) {
    %c0_i32 = arith.constant 0 : i32
    %c0_i32_0 = arith.constant 0 : i32
    return %arg0, %c0_i32, %arg1 : i32, i32, i32
  }
  func.func @transform_9(%arg0: i32, %arg1: i32) -> (i32, i32, i32) {
    %c0_i32 = arith.constant 0 : i32
    %c0_i32_0 = arith.constant 0 : i32
    return %arg0, %c0_i32, %arg1 : i32, i32, i32
  }
}

module attributes {stable_mosaic.version = 11 : i64} {
  func.func @_rbs_kernel(%arg0: i32, %arg1: i32, %arg2: memref<1x1x8x112xf32, #tpu.memory_space<vmem>>, %arg3: memref<1x8x64xf32, #tpu.memory_space<vmem>>, %arg4: memref<2x112xi32, #tpu.memory_space<vmem>>, %arg5: memref<3x4x8xbf16, #tpu.memory_space<vmem>>, %arg6: memref<3x4x1xf32, #tpu.memory_space<vmem>>, %arg7: memref<3x4x36xbf16, #tpu.memory_space<vmem>>, %arg8: memref<3x4x1xf32, #tpu.memory_space<vmem>>, %arg9: memref<3x8x4xbf16, #tpu.memory_space<vmem>>, %arg10: memref<3x8x1xf32, #tpu.memory_space<vmem>>, %arg11: memref<1x8x64xf32, #tpu.memory_space<vmem>>) attributes {dimension_semantics = [#tpu.dimension_semantics<parallel>, #tpu.dimension_semantics<parallel>], iteration_bounds = array<i64: 2, 1>, scalar_prefetch = 0 : i64, scratch_operands = 0 : i64, tpu.core_type = #tpu.core_type<tc>, window_params = [{transform_indices = @transform_0, window_bounds = array<i64: 1, 1, 8, 112>}, {transform_indices = @transform_1, window_bounds = array<i64: 1, 8, 64>}, {pipeline_mode = #tpu.pipeline_mode<synchronous>, transform_indices = @transform_2, window_bounds = array<i64: 2, 112>}, {pipeline_mode = #tpu.pipeline_mode<synchronous>, transform_indices = @transform_3, window_bounds = array<i64: 3, 4, 8>}, {pipeline_mode = #tpu.pipeline_mode<synchronous>, transform_indices = @transform_4, window_bounds = array<i64: 3, 4, 1>}, {pipeline_mode = #tpu.pipeline_mode<synchronous>, transform_indices = @transform_5, window_bounds = array<i64: 3, 4, 36>}, {pipeline_mode = #tpu.pipeline_mode<synchronous>, transform_indices = @transform_6, window_bounds = array<i64: 3, 4, 1>}, {pipeline_mode = #tpu.pipeline_mode<synchronous>, transform_indices = @transform_7, window_bounds = array<i64: 3, 8, 4>}, {pipeline_mode = #tpu.pipeline_mode<synchronous>, transform_indices = @transform_8, window_bounds = array<i64: 3, 8, 1>}, {transform_indices = @transform_9, window_bounds = array<i64: 1, 8, 64>}]} {
    %c0 = arith.constant 0 : index
    %c0_0 = arith.constant 0 : index
    %0 = vector.load %arg4[%c0, %c0_0] : memref<2x112xi32, #tpu.memory_space<vmem>>, vector<1x112xi32>
    %c8_i32 = arith.constant 8 : i32
    %1 = arith.muli %arg1, %c8_i32 : i32
    %c3_i32 = arith.constant 3 : i32
    %2 = arith.subi %1, %c3_i32 : i32
    %3 = vector.broadcast %2 : i32 to vector<1x112xi32>
    %4 = arith.addi %0, %3 : vector<1x112xi32>
    %c0_i32 = arith.constant 0 : i32
    %5 = vector.broadcast %c0_i32 : i32 to vector<1x112xi32>
    %6 = arith.cmpi sge, %4, %5 : vector<1x112xi32>
    %c8_i32_1 = arith.constant 8 : i32
    %7 = vector.broadcast %c8_i32_1 : i32 to vector<1x112xi32>
    %8 = arith.cmpi slt, %4, %7 : vector<1x112xi32>
    %9 = arith.andi %6, %8 : vector<1x112xi1>
    %c1 = arith.constant 1 : index
    %c0_2 = arith.constant 0 : index
    %10 = vector.load %arg4[%c1, %c0_2] : memref<2x112xi32, #tpu.memory_space<vmem>>, vector<1x112xi32>
    %c0_3 = arith.constant 0 : index
    %c0_4 = arith.constant 0 : index
    %c0_5 = arith.constant 0 : index
    %c0_6 = arith.constant 0 : index
    %11 = vector.load %arg2[%c0_3, %c0_4, %c0_5, %c0_6] : memref<1x1x8x112xf32, #tpu.memory_space<vmem>>, vector<1x1x8x112xf32>
    %12 = vector.shape_cast %11 : vector<1x1x8x112xf32> to vector<8x112xf32>
    %c0_7 = arith.constant 0 : index
    %c0_8 = arith.constant 0 : index
    %c0_9 = arith.constant 0 : index
    %13 = vector.load %arg5[%c0_7, %c0_8, %c0_9] : memref<3x4x8xbf16, #tpu.memory_space<vmem>>, vector<1x4x8xbf16>
    %14 = vector.shape_cast %13 : vector<1x4x8xbf16> to vector<4x8xbf16>
    %15 = arith.truncf %12 : vector<8x112xf32> to vector<8x112xbf16>
    %cst = arith.constant dense<0.000000e+00> : vector<4x112xf32>
    %16 = tpu.matmul %14, %15, %cst {dimension_numbers = #tpu.dot_dimension_numbers<[1], [0], [0], [1], [0, 0, 1, 1], [], []>} : vector<4x8xbf16>, vector<8x112xbf16>, vector<4x112xf32> -> vector<4x112xf32>
    %c0_10 = arith.constant 0 : index
    %c0_11 = arith.constant 0 : index
    %c0_12 = arith.constant 0 : index
    %17 = vector.load %arg6[%c0_10, %c0_11, %c0_12] : memref<3x4x1xf32, #tpu.memory_space<vmem>>, vector<1x4x1xf32>
    %18 = vector.shape_cast %17 : vector<1x4x1xf32> to vector<4x1xf32>
    %19 = vector.broadcast %18 : vector<4x1xf32> to vector<4x112xf32>
    %20 = arith.addf %16, %19 : vector<4x112xf32>
    %cst_13 = arith.constant 5.000000e-01 : f32
    %21 = vector.broadcast %cst_13 : f32 to vector<4x112xf32>
    %22 = arith.mulf %21, %20 : vector<4x112xf32>
    %cst_14 = arith.constant 0.707106769 : f32
    %23 = vector.broadcast %cst_14 : f32 to vector<4x112xf32>
    %24 = arith.mulf %20, %23 : vector<4x112xf32>
    %cst_15 = arith.constant 0.000000e+00 : f32
    %25 = vector.broadcast %cst_15 : f32 to vector<4x112xf32>
    %26 = arith.cmpf oge, %24, %25 : vector<4x112xf32>
    %cst_16 = arith.constant 1.000000e+00 : f32
    %cst_17 = arith.constant -1.000000e+00 : f32
    %27 = vector.broadcast %cst_16 : f32 to vector<4x112xf32>
    %28 = vector.broadcast %cst_17 : f32 to vector<4x112xf32>
    %29 = arith.select %26, %27, %28 : vector<4x112xi1>, vector<4x112xf32>
    %30 = math.absf %24 : vector<4x112xf32>
    %cst_18 = arith.constant 0.327591091 : f32
    %31 = vector.broadcast %cst_18 : f32 to vector<4x112xf32>
    %32 = arith.mulf %31, %30 : vector<4x112xf32>
    %cst_19 = arith.constant 1.000000e+00 : f32
    %33 = vector.broadcast %cst_19 : f32 to vector<4x112xf32>
    %34 = arith.addf %33, %32 : vector<4x112xf32>
    %cst_20 = arith.constant 1.000000e+00 : f32
    %35 = vector.broadcast %cst_20 : f32 to vector<4x112xf32>
    %36 = arith.divf %35, %34 : vector<4x112xf32>
    %cst_21 = arith.constant 1.06140542 : f32
    %37 = vector.broadcast %cst_21 : f32 to vector<4x112xf32>
    %38 = arith.mulf %37, %36 : vector<4x112xf32>
    %cst_22 = arith.constant -1.45315206 : f32
    %39 = vector.broadcast %cst_22 : f32 to vector<4x112xf32>
    %40 = arith.addf %38, %39 : vector<4x112xf32>
    %41 = arith.mulf %40, %36 : vector<4x112xf32>
    %cst_23 = arith.constant 1.42141378 : f32
    %42 = vector.broadcast %cst_23 : f32 to vector<4x112xf32>
    %43 = arith.addf %41, %42 : vector<4x112xf32>
    %44 = arith.mulf %43, %36 : vector<4x112xf32>
    %cst_24 = arith.constant -0.284496725 : f32
    %45 = vector.broadcast %cst_24 : f32 to vector<4x112xf32>
    %46 = arith.addf %44, %45 : vector<4x112xf32>
    %47 = arith.mulf %46, %36 : vector<4x112xf32>
    %cst_25 = arith.constant 0.254829586 : f32
    %48 = vector.broadcast %cst_25 : f32 to vector<4x112xf32>
    %49 = arith.addf %47, %48 : vector<4x112xf32>
    %50 = arith.mulf %49, %36 : vector<4x112xf32>
    %cst_26 = arith.constant 0.000000e+00 : f32
    %51 = vector.broadcast %cst_26 : f32 to vector<4x112xf32>
    %52 = arith.subf %51, %30 : vector<4x112xf32>
    %53 = arith.mulf %52, %30 : vector<4x112xf32>
    %54 = math.exp %53 : vector<4x112xf32>
    %55 = arith.mulf %50, %54 : vector<4x112xf32>
    %cst_27 = arith.constant 1.000000e+00 : f32
    %56 = vector.broadcast %cst_27 : f32 to vector<4x112xf32>
    %57 = arith.subf %56, %55 : vector<4x112xf32>
    %58 = arith.mulf %29, %57 : vector<4x112xf32>
    %cst_28 = arith.constant 1.000000e+00 : f32
    %59 = vector.broadcast %cst_28 : f32 to vector<4x112xf32>
    %60 = arith.addf %59, %58 : vector<4x112xf32>
    %61 = arith.mulf %22, %60 : vector<4x112xf32>
    %cst_29 = arith.constant 0.000000e+00 : f32
    %62 = vector.shape_cast %9 : vector<1x112xi1> to vector<1x112xi1>
    %63 = vector.broadcast %62 : vector<1x112xi1> to vector<4x112xi1>
    %64 = vector.broadcast %cst_29 : f32 to vector<4x112xf32>
    %65 = arith.select %63, %61, %64 : vector<4x112xi1>, vector<4x112xf32>
    %66 = arith.truncf %65 : vector<4x112xf32> to vector<4x112xbf16>
    %c0_30 = arith.constant 0 : index
    %c0_31 = arith.constant 0 : index
    %c0_32 = arith.constant 0 : index
    %67 = vector.load %arg7[%c0_30, %c0_31, %c0_32] : memref<3x4x36xbf16, #tpu.memory_space<vmem>>, vector<1x4x36xbf16>
    %68 = vector.shape_cast %67 : vector<1x4x36xbf16> to vector<4x36xbf16>
    %cst_33 = arith.constant 0.000000e+00 : bf16
    %69 = vector.broadcast %cst_33 : bf16 to vector<4x112xbf16>
    %c7_i32 = arith.constant 7 : i32
    %70 = vector.broadcast %c7_i32 : i32 to vector<1x112xi32>
    %71 = arith.cmpi eq, %10, %70 : vector<1x112xi32>
    %72 = vector.shape_cast %71 : vector<1x112xi1> to vector<1x112xi1>
    %73 = vector.broadcast %72 : vector<1x112xi1> to vector<4x112xi1>
    %74 = arith.select %73, %69, %66 : vector<4x112xi1>, vector<4x112xbf16>
    %75 = vector.extract_strided_slice %74 {offsets = [0, 111], sizes = [4, 1], strides = [1, 1]} : vector<4x112xbf16> to vector<4x1xbf16>
    %76 = vector.extract_strided_slice %74 {offsets = [0, 0], sizes = [4, 111], strides = [1, 1]} : vector<4x112xbf16> to vector<4x111xbf16>
    %77 = tpu.concatenate %75, %76 in 1 : vector<4x1xbf16>, vector<4x111xbf16> -> vector<4x112xbf16>
    %c0_i32_34 = arith.constant 0 : i32
    %78 = vector.broadcast %c0_i32_34 : i32 to vector<1x112xi32>
    %79 = arith.cmpi eq, %10, %78 : vector<1x112xi32>
    %80 = vector.shape_cast %79 : vector<1x112xi1> to vector<1x112xi1>
    %81 = vector.broadcast %80 : vector<1x112xi1> to vector<4x112xi1>
    %82 = arith.select %81, %69, %66 : vector<4x112xi1>, vector<4x112xbf16>
    %83 = vector.extract_strided_slice %82 {offsets = [0, 1], sizes = [4, 111], strides = [1, 1]} : vector<4x112xbf16> to vector<4x111xbf16>
    %84 = vector.extract_strided_slice %82 {offsets = [0, 0], sizes = [4, 1], strides = [1, 1]} : vector<4x112xbf16> to vector<4x1xbf16>
    %85 = tpu.concatenate %83, %84 in 1 : vector<4x111xbf16>, vector<4x1xbf16> -> vector<4x112xbf16>
    %86 = vector.extract_strided_slice %77 {offsets = [0, 104], sizes = [4, 8], strides = [1, 1]} : vector<4x112xbf16> to vector<4x8xbf16>
    %87 = vector.extract_strided_slice %77 {offsets = [0, 0], sizes = [4, 104], strides = [1, 1]} : vector<4x112xbf16> to vector<4x104xbf16>
    %88 = tpu.concatenate %86, %87 in 1 : vector<4x8xbf16>, vector<4x104xbf16> -> vector<4x112xbf16>
    %89 = vector.extract_strided_slice %68 {offsets = [0, 0], sizes = [4, 4], strides = [1, 1]} : vector<4x36xbf16> to vector<4x4xbf16>
    %cst_35 = arith.constant dense<0.000000e+00> : vector<4x112xf32>
    %90 = tpu.matmul %89, %88, %cst_35 {dimension_numbers = #tpu.dot_dimension_numbers<[1], [0], [0], [1], [0, 0, 1, 1], [], []>} : vector<4x4xbf16>, vector<4x112xbf16>, vector<4x112xf32> -> vector<4x112xf32>
    %91 = vector.extract_strided_slice %66 {offsets = [0, 104], sizes = [4, 8], strides = [1, 1]} : vector<4x112xbf16> to vector<4x8xbf16>
    %92 = vector.extract_strided_slice %66 {offsets = [0, 0], sizes = [4, 104], strides = [1, 1]} : vector<4x112xbf16> to vector<4x104xbf16>
    %93 = tpu.concatenate %91, %92 in 1 : vector<4x8xbf16>, vector<4x104xbf16> -> vector<4x112xbf16>
    %94 = vector.extract_strided_slice %68 {offsets = [0, 4], sizes = [4, 4], strides = [1, 1]} : vector<4x36xbf16> to vector<4x4xbf16>
    %cst_36 = arith.constant dense<0.000000e+00> : vector<4x112xf32>
    %95 = tpu.matmul %94, %93, %cst_36 {dimension_numbers = #tpu.dot_dimension_numbers<[1], [0], [0], [1], [0, 0, 1, 1], [], []>} : vector<4x4xbf16>, vector<4x112xbf16>, vector<4x112xf32> -> vector<4x112xf32>
    %96 = arith.addf %90, %95 : vector<4x112xf32>
    %97 = vector.extract_strided_slice %85 {offsets = [0, 104], sizes = [4, 8], strides = [1, 1]} : vector<4x112xbf16> to vector<4x8xbf16>
    %98 = vector.extract_strided_slice %85 {offsets = [0, 0], sizes = [4, 104], strides = [1, 1]} : vector<4x112xbf16> to vector<4x104xbf16>
    %99 = tpu.concatenate %97, %98 in 1 : vector<4x8xbf16>, vector<4x104xbf16> -> vector<4x112xbf16>
    %100 = vector.extract_strided_slice %68 {offsets = [0, 8], sizes = [4, 4], strides = [1, 1]} : vector<4x36xbf16> to vector<4x4xbf16>
    %cst_37 = arith.constant dense<0.000000e+00> : vector<4x112xf32>
    %101 = tpu.matmul %100, %99, %cst_37 {dimension_numbers = #tpu.dot_dimension_numbers<[1], [0], [0], [1], [0, 0, 1, 1], [], []>} : vector<4x4xbf16>, vector<4x112xbf16>, vector<4x112xf32> -> vector<4x112xf32>
    %102 = arith.addf %96, %101 : vector<4x112xf32>
    %103 = vector.extract_strided_slice %68 {offsets = [0, 12], sizes = [4, 4], strides = [1, 1]} : vector<4x36xbf16> to vector<4x4xbf16>
    %cst_38 = arith.constant dense<0.000000e+00> : vector<4x112xf32>
    %104 = tpu.matmul %103, %77, %cst_38 {dimension_numbers = #tpu.dot_dimension_numbers<[1], [0], [0], [1], [0, 0, 1, 1], [], []>} : vector<4x4xbf16>, vector<4x112xbf16>, vector<4x112xf32> -> vector<4x112xf32>
    %105 = arith.addf %102, %104 : vector<4x112xf32>
    %106 = vector.extract_strided_slice %68 {offsets = [0, 16], sizes = [4, 4], strides = [1, 1]} : vector<4x36xbf16> to vector<4x4xbf16>
    %cst_39 = arith.constant dense<0.000000e+00> : vector<4x112xf32>
    %107 = tpu.matmul %106, %66, %cst_39 {dimension_numbers = #tpu.dot_dimension_numbers<[1], [0], [0], [1], [0, 0, 1, 1], [], []>} : vector<4x4xbf16>, vector<4x112xbf16>, vector<4x112xf32> -> vector<4x112xf32>
    %108 = arith.addf %105, %107 : vector<4x112xf32>
    %109 = vector.extract_strided_slice %68 {offsets = [0, 20], sizes = [4, 4], strides = [1, 1]} : vector<4x36xbf16> to vector<4x4xbf16>
    %cst_40 = arith.constant dense<0.000000e+00> : vector<4x112xf32>
    %110 = tpu.matmul %109, %85, %cst_40 {dimension_numbers = #tpu.dot_dimension_numbers<[1], [0], [0], [1], [0, 0, 1, 1], [], []>} : vector<4x4xbf16>, vector<4x112xbf16>, vector<4x112xf32> -> vector<4x112xf32>
    %111 = arith.addf %108, %110 : vector<4x112xf32>
    %112 = vector.extract_strided_slice %77 {offsets = [0, 8], sizes = [4, 104], strides = [1, 1]} : vector<4x112xbf16> to vector<4x104xbf16>
    %113 = vector.extract_strided_slice %77 {offsets = [0, 0], sizes = [4, 8], strides = [1, 1]} : vector<4x112xbf16> to vector<4x8xbf16>
    %114 = tpu.concatenate %112, %113 in 1 : vector<4x104xbf16>, vector<4x8xbf16> -> vector<4x112xbf16>
    %115 = vector.extract_strided_slice %68 {offsets = [0, 24], sizes = [4, 4], strides = [1, 1]} : vector<4x36xbf16> to vector<4x4xbf16>
    %cst_41 = arith.constant dense<0.000000e+00> : vector<4x112xf32>
    %116 = tpu.matmul %115, %114, %cst_41 {dimension_numbers = #tpu.dot_dimension_numbers<[1], [0], [0], [1], [0, 0, 1, 1], [], []>} : vector<4x4xbf16>, vector<4x112xbf16>, vector<4x112xf32> -> vector<4x112xf32>
    %117 = arith.addf %111, %116 : vector<4x112xf32>
    %118 = vector.extract_strided_slice %66 {offsets = [0, 8], sizes = [4, 104], strides = [1, 1]} : vector<4x112xbf16> to vector<4x104xbf16>
    %119 = vector.extract_strided_slice %66 {offsets = [0, 0], sizes = [4, 8], strides = [1, 1]} : vector<4x112xbf16> to vector<4x8xbf16>
    %120 = tpu.concatenate %118, %119 in 1 : vector<4x104xbf16>, vector<4x8xbf16> -> vector<4x112xbf16>
    %121 = vector.extract_strided_slice %68 {offsets = [0, 28], sizes = [4, 4], strides = [1, 1]} : vector<4x36xbf16> to vector<4x4xbf16>
    %cst_42 = arith.constant dense<0.000000e+00> : vector<4x112xf32>
    %122 = tpu.matmul %121, %120, %cst_42 {dimension_numbers = #tpu.dot_dimension_numbers<[1], [0], [0], [1], [0, 0, 1, 1], [], []>} : vector<4x4xbf16>, vector<4x112xbf16>, vector<4x112xf32> -> vector<4x112xf32>
    %123 = arith.addf %117, %122 : vector<4x112xf32>
    %124 = vector.extract_strided_slice %85 {offsets = [0, 8], sizes = [4, 104], strides = [1, 1]} : vector<4x112xbf16> to vector<4x104xbf16>
    %125 = vector.extract_strided_slice %85 {offsets = [0, 0], sizes = [4, 8], strides = [1, 1]} : vector<4x112xbf16> to vector<4x8xbf16>
    %126 = tpu.concatenate %124, %125 in 1 : vector<4x104xbf16>, vector<4x8xbf16> -> vector<4x112xbf16>
    %127 = vector.extract_strided_slice %68 {offsets = [0, 32], sizes = [4, 4], strides = [1, 1]} : vector<4x36xbf16> to vector<4x4xbf16>
    %cst_43 = arith.constant dense<0.000000e+00> : vector<4x112xf32>
    %128 = tpu.matmul %127, %126, %cst_43 {dimension_numbers = #tpu.dot_dimension_numbers<[1], [0], [0], [1], [0, 0, 1, 1], [], []>} : vector<4x4xbf16>, vector<4x112xbf16>, vector<4x112xf32> -> vector<4x112xf32>
    %129 = arith.addf %123, %128 : vector<4x112xf32>
    %c0_44 = arith.constant 0 : index
    %c0_45 = arith.constant 0 : index
    %c0_46 = arith.constant 0 : index
    %130 = vector.load %arg8[%c0_44, %c0_45, %c0_46] : memref<3x4x1xf32, #tpu.memory_space<vmem>>, vector<1x4x1xf32>
    %131 = vector.shape_cast %130 : vector<1x4x1xf32> to vector<4x1xf32>
    %132 = vector.broadcast %131 : vector<4x1xf32> to vector<4x112xf32>
    %133 = arith.addf %129, %132 : vector<4x112xf32>
    %cst_47 = arith.constant 5.000000e-01 : f32
    %134 = vector.broadcast %cst_47 : f32 to vector<4x112xf32>
    %135 = arith.mulf %134, %133 : vector<4x112xf32>
    %cst_48 = arith.constant 0.707106769 : f32
    %136 = vector.broadcast %cst_48 : f32 to vector<4x112xf32>
    %137 = arith.mulf %133, %136 : vector<4x112xf32>
    %cst_49 = arith.constant 0.000000e+00 : f32
    %138 = vector.broadcast %cst_49 : f32 to vector<4x112xf32>
    %139 = arith.cmpf oge, %137, %138 : vector<4x112xf32>
    %cst_50 = arith.constant 1.000000e+00 : f32
    %cst_51 = arith.constant -1.000000e+00 : f32
    %140 = vector.broadcast %cst_50 : f32 to vector<4x112xf32>
    %141 = vector.broadcast %cst_51 : f32 to vector<4x112xf32>
    %142 = arith.select %139, %140, %141 : vector<4x112xi1>, vector<4x112xf32>
    %143 = math.absf %137 : vector<4x112xf32>
    %cst_52 = arith.constant 0.327591091 : f32
    %144 = vector.broadcast %cst_52 : f32 to vector<4x112xf32>
    %145 = arith.mulf %144, %143 : vector<4x112xf32>
    %cst_53 = arith.constant 1.000000e+00 : f32
    %146 = vector.broadcast %cst_53 : f32 to vector<4x112xf32>
    %147 = arith.addf %146, %145 : vector<4x112xf32>
    %cst_54 = arith.constant 1.000000e+00 : f32
    %148 = vector.broadcast %cst_54 : f32 to vector<4x112xf32>
    %149 = arith.divf %148, %147 : vector<4x112xf32>
    %cst_55 = arith.constant 1.06140542 : f32
    %150 = vector.broadcast %cst_55 : f32 to vector<4x112xf32>
    %151 = arith.mulf %150, %149 : vector<4x112xf32>
    %cst_56 = arith.constant -1.45315206 : f32
    %152 = vector.broadcast %cst_56 : f32 to vector<4x112xf32>
    %153 = arith.addf %151, %152 : vector<4x112xf32>
    %154 = arith.mulf %153, %149 : vector<4x112xf32>
    %cst_57 = arith.constant 1.42141378 : f32
    %155 = vector.broadcast %cst_57 : f32 to vector<4x112xf32>
    %156 = arith.addf %154, %155 : vector<4x112xf32>
    %157 = arith.mulf %156, %149 : vector<4x112xf32>
    %cst_58 = arith.constant -0.284496725 : f32
    %158 = vector.broadcast %cst_58 : f32 to vector<4x112xf32>
    %159 = arith.addf %157, %158 : vector<4x112xf32>
    %160 = arith.mulf %159, %149 : vector<4x112xf32>
    %cst_59 = arith.constant 0.254829586 : f32
    %161 = vector.broadcast %cst_59 : f32 to vector<4x112xf32>
    %162 = arith.addf %160, %161 : vector<4x112xf32>
    %163 = arith.mulf %162, %149 : vector<4x112xf32>
    %cst_60 = arith.constant 0.000000e+00 : f32
    %164 = vector.broadcast %cst_60 : f32 to vector<4x112xf32>
    %165 = arith.subf %164, %143 : vector<4x112xf32>
    %166 = arith.mulf %165, %143 : vector<4x112xf32>
    %167 = math.exp %166 : vector<4x112xf32>
    %168 = arith.mulf %163, %167 : vector<4x112xf32>
    %cst_61 = arith.constant 1.000000e+00 : f32
    %169 = vector.broadcast %cst_61 : f32 to vector<4x112xf32>
    %170 = arith.subf %169, %168 : vector<4x112xf32>
    %171 = arith.mulf %142, %170 : vector<4x112xf32>
    %cst_62 = arith.constant 1.000000e+00 : f32
    %172 = vector.broadcast %cst_62 : f32 to vector<4x112xf32>
    %173 = arith.addf %172, %171 : vector<4x112xf32>
    %174 = arith.mulf %135, %173 : vector<4x112xf32>
    %175 = arith.truncf %174 : vector<4x112xf32> to vector<4x112xbf16>
    %c0_63 = arith.constant 0 : index
    %c0_64 = arith.constant 0 : index
    %c0_65 = arith.constant 0 : index
    %176 = vector.load %arg9[%c0_63, %c0_64, %c0_65] : memref<3x8x4xbf16, #tpu.memory_space<vmem>>, vector<1x8x4xbf16>
    %177 = vector.shape_cast %176 : vector<1x8x4xbf16> to vector<8x4xbf16>
    %cst_66 = arith.constant dense<0.000000e+00> : vector<8x112xf32>
    %178 = tpu.matmul %177, %175, %cst_66 {dimension_numbers = #tpu.dot_dimension_numbers<[1], [0], [0], [1], [0, 0, 1, 1], [], []>} : vector<8x4xbf16>, vector<4x112xbf16>, vector<8x112xf32> -> vector<8x112xf32>
    %179 = arith.addf %12, %178 : vector<8x112xf32>
    %c0_67 = arith.constant 0 : index
    %c0_68 = arith.constant 0 : index
    %c0_69 = arith.constant 0 : index
    %180 = vector.load %arg10[%c0_67, %c0_68, %c0_69] : memref<3x8x1xf32, #tpu.memory_space<vmem>>, vector<1x8x1xf32>
    %181 = vector.shape_cast %180 : vector<1x8x1xf32> to vector<8x1xf32>
    %182 = vector.broadcast %181 : vector<8x1xf32> to vector<8x112xf32>
    %183 = arith.addf %179, %182 : vector<8x112xf32>
    %c1_70 = arith.constant 1 : index
    %c0_71 = arith.constant 0 : index
    %c0_72 = arith.constant 0 : index
    %184 = vector.load %arg5[%c1_70, %c0_71, %c0_72] : memref<3x4x8xbf16, #tpu.memory_space<vmem>>, vector<1x4x8xbf16>
    %185 = vector.shape_cast %184 : vector<1x4x8xbf16> to vector<4x8xbf16>
    %186 = arith.truncf %183 : vector<8x112xf32> to vector<8x112xbf16>
    %cst_73 = arith.constant dense<0.000000e+00> : vector<4x112xf32>
    %187 = tpu.matmul %185, %186, %cst_73 {dimension_numbers = #tpu.dot_dimension_numbers<[1], [0], [0], [1], [0, 0, 1, 1], [], []>} : vector<4x8xbf16>, vector<8x112xbf16>, vector<4x112xf32> -> vector<4x112xf32>
    %c1_74 = arith.constant 1 : index
    %c0_75 = arith.constant 0 : index
    %c0_76 = arith.constant 0 : index
    %188 = vector.load %arg6[%c1_74, %c0_75, %c0_76] : memref<3x4x1xf32, #tpu.memory_space<vmem>>, vector<1x4x1xf32>
    %189 = vector.shape_cast %188 : vector<1x4x1xf32> to vector<4x1xf32>
    %190 = vector.broadcast %189 : vector<4x1xf32> to vector<4x112xf32>
    %191 = arith.addf %187, %190 : vector<4x112xf32>
    %cst_77 = arith.constant 5.000000e-01 : f32
    %192 = vector.broadcast %cst_77 : f32 to vector<4x112xf32>
    %193 = arith.mulf %192, %191 : vector<4x112xf32>
    %cst_78 = arith.constant 0.707106769 : f32
    %194 = vector.broadcast %cst_78 : f32 to vector<4x112xf32>
    %195 = arith.mulf %191, %194 : vector<4x112xf32>
    %cst_79 = arith.constant 0.000000e+00 : f32
    %196 = vector.broadcast %cst_79 : f32 to vector<4x112xf32>
    %197 = arith.cmpf oge, %195, %196 : vector<4x112xf32>
    %cst_80 = arith.constant 1.000000e+00 : f32
    %cst_81 = arith.constant -1.000000e+00 : f32
    %198 = vector.broadcast %cst_80 : f32 to vector<4x112xf32>
    %199 = vector.broadcast %cst_81 : f32 to vector<4x112xf32>
    %200 = arith.select %197, %198, %199 : vector<4x112xi1>, vector<4x112xf32>
    %201 = math.absf %195 : vector<4x112xf32>
    %cst_82 = arith.constant 0.327591091 : f32
    %202 = vector.broadcast %cst_82 : f32 to vector<4x112xf32>
    %203 = arith.mulf %202, %201 : vector<4x112xf32>
    %cst_83 = arith.constant 1.000000e+00 : f32
    %204 = vector.broadcast %cst_83 : f32 to vector<4x112xf32>
    %205 = arith.addf %204, %203 : vector<4x112xf32>
    %cst_84 = arith.constant 1.000000e+00 : f32
    %206 = vector.broadcast %cst_84 : f32 to vector<4x112xf32>
    %207 = arith.divf %206, %205 : vector<4x112xf32>
    %cst_85 = arith.constant 1.06140542 : f32
    %208 = vector.broadcast %cst_85 : f32 to vector<4x112xf32>
    %209 = arith.mulf %208, %207 : vector<4x112xf32>
    %cst_86 = arith.constant -1.45315206 : f32
    %210 = vector.broadcast %cst_86 : f32 to vector<4x112xf32>
    %211 = arith.addf %209, %210 : vector<4x112xf32>
    %212 = arith.mulf %211, %207 : vector<4x112xf32>
    %cst_87 = arith.constant 1.42141378 : f32
    %213 = vector.broadcast %cst_87 : f32 to vector<4x112xf32>
    %214 = arith.addf %212, %213 : vector<4x112xf32>
    %215 = arith.mulf %214, %207 : vector<4x112xf32>
    %cst_88 = arith.constant -0.284496725 : f32
    %216 = vector.broadcast %cst_88 : f32 to vector<4x112xf32>
    %217 = arith.addf %215, %216 : vector<4x112xf32>
    %218 = arith.mulf %217, %207 : vector<4x112xf32>
    %cst_89 = arith.constant 0.254829586 : f32
    %219 = vector.broadcast %cst_89 : f32 to vector<4x112xf32>
    %220 = arith.addf %218, %219 : vector<4x112xf32>
    %221 = arith.mulf %220, %207 : vector<4x112xf32>
    %cst_90 = arith.constant 0.000000e+00 : f32
    %222 = vector.broadcast %cst_90 : f32 to vector<4x112xf32>
    %223 = arith.subf %222, %201 : vector<4x112xf32>
    %224 = arith.mulf %223, %201 : vector<4x112xf32>
    %225 = math.exp %224 : vector<4x112xf32>
    %226 = arith.mulf %221, %225 : vector<4x112xf32>
    %cst_91 = arith.constant 1.000000e+00 : f32
    %227 = vector.broadcast %cst_91 : f32 to vector<4x112xf32>
    %228 = arith.subf %227, %226 : vector<4x112xf32>
    %229 = arith.mulf %200, %228 : vector<4x112xf32>
    %cst_92 = arith.constant 1.000000e+00 : f32
    %230 = vector.broadcast %cst_92 : f32 to vector<4x112xf32>
    %231 = arith.addf %230, %229 : vector<4x112xf32>
    %232 = arith.mulf %193, %231 : vector<4x112xf32>
    %cst_93 = arith.constant 0.000000e+00 : f32
    %233 = vector.shape_cast %9 : vector<1x112xi1> to vector<1x112xi1>
    %234 = vector.broadcast %233 : vector<1x112xi1> to vector<4x112xi1>
    %235 = vector.broadcast %cst_93 : f32 to vector<4x112xf32>
    %236 = arith.select %234, %232, %235 : vector<4x112xi1>, vector<4x112xf32>
    %237 = arith.truncf %236 : vector<4x112xf32> to vector<4x112xbf16>
    %c1_94 = arith.constant 1 : index
    %c0_95 = arith.constant 0 : index
    %c0_96 = arith.constant 0 : index
    %238 = vector.load %arg7[%c1_94, %c0_95, %c0_96] : memref<3x4x36xbf16, #tpu.memory_space<vmem>>, vector<1x4x36xbf16>
    %239 = vector.shape_cast %238 : vector<1x4x36xbf16> to vector<4x36xbf16>
    %cst_97 = arith.constant 0.000000e+00 : bf16
    %240 = vector.broadcast %cst_97 : bf16 to vector<4x112xbf16>
    %c7_i32_98 = arith.constant 7 : i32
    %241 = vector.broadcast %c7_i32_98 : i32 to vector<1x112xi32>
    %242 = arith.cmpi eq, %10, %241 : vector<1x112xi32>
    %243 = vector.shape_cast %242 : vector<1x112xi1> to vector<1x112xi1>
    %244 = vector.broadcast %243 : vector<1x112xi1> to vector<4x112xi1>
    %245 = arith.select %244, %240, %237 : vector<4x112xi1>, vector<4x112xbf16>
    %246 = vector.extract_strided_slice %245 {offsets = [0, 111], sizes = [4, 1], strides = [1, 1]} : vector<4x112xbf16> to vector<4x1xbf16>
    %247 = vector.extract_strided_slice %245 {offsets = [0, 0], sizes = [4, 111], strides = [1, 1]} : vector<4x112xbf16> to vector<4x111xbf16>
    %248 = tpu.concatenate %246, %247 in 1 : vector<4x1xbf16>, vector<4x111xbf16> -> vector<4x112xbf16>
    %c0_i32_99 = arith.constant 0 : i32
    %249 = vector.broadcast %c0_i32_99 : i32 to vector<1x112xi32>
    %250 = arith.cmpi eq, %10, %249 : vector<1x112xi32>
    %251 = vector.shape_cast %250 : vector<1x112xi1> to vector<1x112xi1>
    %252 = vector.broadcast %251 : vector<1x112xi1> to vector<4x112xi1>
    %253 = arith.select %252, %240, %237 : vector<4x112xi1>, vector<4x112xbf16>
    %254 = vector.extract_strided_slice %253 {offsets = [0, 1], sizes = [4, 111], strides = [1, 1]} : vector<4x112xbf16> to vector<4x111xbf16>
    %255 = vector.extract_strided_slice %253 {offsets = [0, 0], sizes = [4, 1], strides = [1, 1]} : vector<4x112xbf16> to vector<4x1xbf16>
    %256 = tpu.concatenate %254, %255 in 1 : vector<4x111xbf16>, vector<4x1xbf16> -> vector<4x112xbf16>
    %257 = vector.extract_strided_slice %248 {offsets = [0, 104], sizes = [4, 8], strides = [1, 1]} : vector<4x112xbf16> to vector<4x8xbf16>
    %258 = vector.extract_strided_slice %248 {offsets = [0, 0], sizes = [4, 104], strides = [1, 1]} : vector<4x112xbf16> to vector<4x104xbf16>
    %259 = tpu.concatenate %257, %258 in 1 : vector<4x8xbf16>, vector<4x104xbf16> -> vector<4x112xbf16>
    %260 = vector.extract_strided_slice %239 {offsets = [0, 0], sizes = [4, 4], strides = [1, 1]} : vector<4x36xbf16> to vector<4x4xbf16>
    %cst_100 = arith.constant dense<0.000000e+00> : vector<4x112xf32>
    %261 = tpu.matmul %260, %259, %cst_100 {dimension_numbers = #tpu.dot_dimension_numbers<[1], [0], [0], [1], [0, 0, 1, 1], [], []>} : vector<4x4xbf16>, vector<4x112xbf16>, vector<4x112xf32> -> vector<4x112xf32>
    %262 = vector.extract_strided_slice %237 {offsets = [0, 104], sizes = [4, 8], strides = [1, 1]} : vector<4x112xbf16> to vector<4x8xbf16>
    %263 = vector.extract_strided_slice %237 {offsets = [0, 0], sizes = [4, 104], strides = [1, 1]} : vector<4x112xbf16> to vector<4x104xbf16>
    %264 = tpu.concatenate %262, %263 in 1 : vector<4x8xbf16>, vector<4x104xbf16> -> vector<4x112xbf16>
    %265 = vector.extract_strided_slice %239 {offsets = [0, 4], sizes = [4, 4], strides = [1, 1]} : vector<4x36xbf16> to vector<4x4xbf16>
    %cst_101 = arith.constant dense<0.000000e+00> : vector<4x112xf32>
    %266 = tpu.matmul %265, %264, %cst_101 {dimension_numbers = #tpu.dot_dimension_numbers<[1], [0], [0], [1], [0, 0, 1, 1], [], []>} : vector<4x4xbf16>, vector<4x112xbf16>, vector<4x112xf32> -> vector<4x112xf32>
    %267 = arith.addf %261, %266 : vector<4x112xf32>
    %268 = vector.extract_strided_slice %256 {offsets = [0, 104], sizes = [4, 8], strides = [1, 1]} : vector<4x112xbf16> to vector<4x8xbf16>
    %269 = vector.extract_strided_slice %256 {offsets = [0, 0], sizes = [4, 104], strides = [1, 1]} : vector<4x112xbf16> to vector<4x104xbf16>
    %270 = tpu.concatenate %268, %269 in 1 : vector<4x8xbf16>, vector<4x104xbf16> -> vector<4x112xbf16>
    %271 = vector.extract_strided_slice %239 {offsets = [0, 8], sizes = [4, 4], strides = [1, 1]} : vector<4x36xbf16> to vector<4x4xbf16>
    %cst_102 = arith.constant dense<0.000000e+00> : vector<4x112xf32>
    %272 = tpu.matmul %271, %270, %cst_102 {dimension_numbers = #tpu.dot_dimension_numbers<[1], [0], [0], [1], [0, 0, 1, 1], [], []>} : vector<4x4xbf16>, vector<4x112xbf16>, vector<4x112xf32> -> vector<4x112xf32>
    %273 = arith.addf %267, %272 : vector<4x112xf32>
    %274 = vector.extract_strided_slice %239 {offsets = [0, 12], sizes = [4, 4], strides = [1, 1]} : vector<4x36xbf16> to vector<4x4xbf16>
    %cst_103 = arith.constant dense<0.000000e+00> : vector<4x112xf32>
    %275 = tpu.matmul %274, %248, %cst_103 {dimension_numbers = #tpu.dot_dimension_numbers<[1], [0], [0], [1], [0, 0, 1, 1], [], []>} : vector<4x4xbf16>, vector<4x112xbf16>, vector<4x112xf32> -> vector<4x112xf32>
    %276 = arith.addf %273, %275 : vector<4x112xf32>
    %277 = vector.extract_strided_slice %239 {offsets = [0, 16], sizes = [4, 4], strides = [1, 1]} : vector<4x36xbf16> to vector<4x4xbf16>
    %cst_104 = arith.constant dense<0.000000e+00> : vector<4x112xf32>
    %278 = tpu.matmul %277, %237, %cst_104 {dimension_numbers = #tpu.dot_dimension_numbers<[1], [0], [0], [1], [0, 0, 1, 1], [], []>} : vector<4x4xbf16>, vector<4x112xbf16>, vector<4x112xf32> -> vector<4x112xf32>
    %279 = arith.addf %276, %278 : vector<4x112xf32>
    %280 = vector.extract_strided_slice %239 {offsets = [0, 20], sizes = [4, 4], strides = [1, 1]} : vector<4x36xbf16> to vector<4x4xbf16>
    %cst_105 = arith.constant dense<0.000000e+00> : vector<4x112xf32>
    %281 = tpu.matmul %280, %256, %cst_105 {dimension_numbers = #tpu.dot_dimension_numbers<[1], [0], [0], [1], [0, 0, 1, 1], [], []>} : vector<4x4xbf16>, vector<4x112xbf16>, vector<4x112xf32> -> vector<4x112xf32>
    %282 = arith.addf %279, %281 : vector<4x112xf32>
    %283 = vector.extract_strided_slice %248 {offsets = [0, 8], sizes = [4, 104], strides = [1, 1]} : vector<4x112xbf16> to vector<4x104xbf16>
    %284 = vector.extract_strided_slice %248 {offsets = [0, 0], sizes = [4, 8], strides = [1, 1]} : vector<4x112xbf16> to vector<4x8xbf16>
    %285 = tpu.concatenate %283, %284 in 1 : vector<4x104xbf16>, vector<4x8xbf16> -> vector<4x112xbf16>
    %286 = vector.extract_strided_slice %239 {offsets = [0, 24], sizes = [4, 4], strides = [1, 1]} : vector<4x36xbf16> to vector<4x4xbf16>
    %cst_106 = arith.constant dense<0.000000e+00> : vector<4x112xf32>
    %287 = tpu.matmul %286, %285, %cst_106 {dimension_numbers = #tpu.dot_dimension_numbers<[1], [0], [0], [1], [0, 0, 1, 1], [], []>} : vector<4x4xbf16>, vector<4x112xbf16>, vector<4x112xf32> -> vector<4x112xf32>
    %288 = arith.addf %282, %287 : vector<4x112xf32>
    %289 = vector.extract_strided_slice %237 {offsets = [0, 8], sizes = [4, 104], strides = [1, 1]} : vector<4x112xbf16> to vector<4x104xbf16>
    %290 = vector.extract_strided_slice %237 {offsets = [0, 0], sizes = [4, 8], strides = [1, 1]} : vector<4x112xbf16> to vector<4x8xbf16>
    %291 = tpu.concatenate %289, %290 in 1 : vector<4x104xbf16>, vector<4x8xbf16> -> vector<4x112xbf16>
    %292 = vector.extract_strided_slice %239 {offsets = [0, 28], sizes = [4, 4], strides = [1, 1]} : vector<4x36xbf16> to vector<4x4xbf16>
    %cst_107 = arith.constant dense<0.000000e+00> : vector<4x112xf32>
    %293 = tpu.matmul %292, %291, %cst_107 {dimension_numbers = #tpu.dot_dimension_numbers<[1], [0], [0], [1], [0, 0, 1, 1], [], []>} : vector<4x4xbf16>, vector<4x112xbf16>, vector<4x112xf32> -> vector<4x112xf32>
    %294 = arith.addf %288, %293 : vector<4x112xf32>
    %295 = vector.extract_strided_slice %256 {offsets = [0, 8], sizes = [4, 104], strides = [1, 1]} : vector<4x112xbf16> to vector<4x104xbf16>
    %296 = vector.extract_strided_slice %256 {offsets = [0, 0], sizes = [4, 8], strides = [1, 1]} : vector<4x112xbf16> to vector<4x8xbf16>
    %297 = tpu.concatenate %295, %296 in 1 : vector<4x104xbf16>, vector<4x8xbf16> -> vector<4x112xbf16>
    %298 = vector.extract_strided_slice %239 {offsets = [0, 32], sizes = [4, 4], strides = [1, 1]} : vector<4x36xbf16> to vector<4x4xbf16>
    %cst_108 = arith.constant dense<0.000000e+00> : vector<4x112xf32>
    %299 = tpu.matmul %298, %297, %cst_108 {dimension_numbers = #tpu.dot_dimension_numbers<[1], [0], [0], [1], [0, 0, 1, 1], [], []>} : vector<4x4xbf16>, vector<4x112xbf16>, vector<4x112xf32> -> vector<4x112xf32>
    %300 = arith.addf %294, %299 : vector<4x112xf32>
    %c1_109 = arith.constant 1 : index
    %c0_110 = arith.constant 0 : index
    %c0_111 = arith.constant 0 : index
    %301 = vector.load %arg8[%c1_109, %c0_110, %c0_111] : memref<3x4x1xf32, #tpu.memory_space<vmem>>, vector<1x4x1xf32>
    %302 = vector.shape_cast %301 : vector<1x4x1xf32> to vector<4x1xf32>
    %303 = vector.broadcast %302 : vector<4x1xf32> to vector<4x112xf32>
    %304 = arith.addf %300, %303 : vector<4x112xf32>
    %cst_112 = arith.constant 5.000000e-01 : f32
    %305 = vector.broadcast %cst_112 : f32 to vector<4x112xf32>
    %306 = arith.mulf %305, %304 : vector<4x112xf32>
    %cst_113 = arith.constant 0.707106769 : f32
    %307 = vector.broadcast %cst_113 : f32 to vector<4x112xf32>
    %308 = arith.mulf %304, %307 : vector<4x112xf32>
    %cst_114 = arith.constant 0.000000e+00 : f32
    %309 = vector.broadcast %cst_114 : f32 to vector<4x112xf32>
    %310 = arith.cmpf oge, %308, %309 : vector<4x112xf32>
    %cst_115 = arith.constant 1.000000e+00 : f32
    %cst_116 = arith.constant -1.000000e+00 : f32
    %311 = vector.broadcast %cst_115 : f32 to vector<4x112xf32>
    %312 = vector.broadcast %cst_116 : f32 to vector<4x112xf32>
    %313 = arith.select %310, %311, %312 : vector<4x112xi1>, vector<4x112xf32>
    %314 = math.absf %308 : vector<4x112xf32>
    %cst_117 = arith.constant 0.327591091 : f32
    %315 = vector.broadcast %cst_117 : f32 to vector<4x112xf32>
    %316 = arith.mulf %315, %314 : vector<4x112xf32>
    %cst_118 = arith.constant 1.000000e+00 : f32
    %317 = vector.broadcast %cst_118 : f32 to vector<4x112xf32>
    %318 = arith.addf %317, %316 : vector<4x112xf32>
    %cst_119 = arith.constant 1.000000e+00 : f32
    %319 = vector.broadcast %cst_119 : f32 to vector<4x112xf32>
    %320 = arith.divf %319, %318 : vector<4x112xf32>
    %cst_120 = arith.constant 1.06140542 : f32
    %321 = vector.broadcast %cst_120 : f32 to vector<4x112xf32>
    %322 = arith.mulf %321, %320 : vector<4x112xf32>
    %cst_121 = arith.constant -1.45315206 : f32
    %323 = vector.broadcast %cst_121 : f32 to vector<4x112xf32>
    %324 = arith.addf %322, %323 : vector<4x112xf32>
    %325 = arith.mulf %324, %320 : vector<4x112xf32>
    %cst_122 = arith.constant 1.42141378 : f32
    %326 = vector.broadcast %cst_122 : f32 to vector<4x112xf32>
    %327 = arith.addf %325, %326 : vector<4x112xf32>
    %328 = arith.mulf %327, %320 : vector<4x112xf32>
    %cst_123 = arith.constant -0.284496725 : f32
    %329 = vector.broadcast %cst_123 : f32 to vector<4x112xf32>
    %330 = arith.addf %328, %329 : vector<4x112xf32>
    %331 = arith.mulf %330, %320 : vector<4x112xf32>
    %cst_124 = arith.constant 0.254829586 : f32
    %332 = vector.broadcast %cst_124 : f32 to vector<4x112xf32>
    %333 = arith.addf %331, %332 : vector<4x112xf32>
    %334 = arith.mulf %333, %320 : vector<4x112xf32>
    %cst_125 = arith.constant 0.000000e+00 : f32
    %335 = vector.broadcast %cst_125 : f32 to vector<4x112xf32>
    %336 = arith.subf %335, %314 : vector<4x112xf32>
    %337 = arith.mulf %336, %314 : vector<4x112xf32>
    %338 = math.exp %337 : vector<4x112xf32>
    %339 = arith.mulf %334, %338 : vector<4x112xf32>
    %cst_126 = arith.constant 1.000000e+00 : f32
    %340 = vector.broadcast %cst_126 : f32 to vector<4x112xf32>
    %341 = arith.subf %340, %339 : vector<4x112xf32>
    %342 = arith.mulf %313, %341 : vector<4x112xf32>
    %cst_127 = arith.constant 1.000000e+00 : f32
    %343 = vector.broadcast %cst_127 : f32 to vector<4x112xf32>
    %344 = arith.addf %343, %342 : vector<4x112xf32>
    %345 = arith.mulf %306, %344 : vector<4x112xf32>
    %346 = arith.truncf %345 : vector<4x112xf32> to vector<4x112xbf16>
    %c1_128 = arith.constant 1 : index
    %c0_129 = arith.constant 0 : index
    %c0_130 = arith.constant 0 : index
    %347 = vector.load %arg9[%c1_128, %c0_129, %c0_130] : memref<3x8x4xbf16, #tpu.memory_space<vmem>>, vector<1x8x4xbf16>
    %348 = vector.shape_cast %347 : vector<1x8x4xbf16> to vector<8x4xbf16>
    %cst_131 = arith.constant dense<0.000000e+00> : vector<8x112xf32>
    %349 = tpu.matmul %348, %346, %cst_131 {dimension_numbers = #tpu.dot_dimension_numbers<[1], [0], [0], [1], [0, 0, 1, 1], [], []>} : vector<8x4xbf16>, vector<4x112xbf16>, vector<8x112xf32> -> vector<8x112xf32>
    %350 = arith.addf %183, %349 : vector<8x112xf32>
    %c1_132 = arith.constant 1 : index
    %c0_133 = arith.constant 0 : index
    %c0_134 = arith.constant 0 : index
    %351 = vector.load %arg10[%c1_132, %c0_133, %c0_134] : memref<3x8x1xf32, #tpu.memory_space<vmem>>, vector<1x8x1xf32>
    %352 = vector.shape_cast %351 : vector<1x8x1xf32> to vector<8x1xf32>
    %353 = vector.broadcast %352 : vector<8x1xf32> to vector<8x112xf32>
    %354 = arith.addf %350, %353 : vector<8x112xf32>
    %c2 = arith.constant 2 : index
    %c0_135 = arith.constant 0 : index
    %c0_136 = arith.constant 0 : index
    %355 = vector.load %arg5[%c2, %c0_135, %c0_136] : memref<3x4x8xbf16, #tpu.memory_space<vmem>>, vector<1x4x8xbf16>
    %356 = vector.shape_cast %355 : vector<1x4x8xbf16> to vector<4x8xbf16>
    %357 = arith.truncf %354 : vector<8x112xf32> to vector<8x112xbf16>
    %cst_137 = arith.constant dense<0.000000e+00> : vector<4x112xf32>
    %358 = tpu.matmul %356, %357, %cst_137 {dimension_numbers = #tpu.dot_dimension_numbers<[1], [0], [0], [1], [0, 0, 1, 1], [], []>} : vector<4x8xbf16>, vector<8x112xbf16>, vector<4x112xf32> -> vector<4x112xf32>
    %c2_138 = arith.constant 2 : index
    %c0_139 = arith.constant 0 : index
    %c0_140 = arith.constant 0 : index
    %359 = vector.load %arg6[%c2_138, %c0_139, %c0_140] : memref<3x4x1xf32, #tpu.memory_space<vmem>>, vector<1x4x1xf32>
    %360 = vector.shape_cast %359 : vector<1x4x1xf32> to vector<4x1xf32>
    %361 = vector.broadcast %360 : vector<4x1xf32> to vector<4x112xf32>
    %362 = arith.addf %358, %361 : vector<4x112xf32>
    %cst_141 = arith.constant 5.000000e-01 : f32
    %363 = vector.broadcast %cst_141 : f32 to vector<4x112xf32>
    %364 = arith.mulf %363, %362 : vector<4x112xf32>
    %cst_142 = arith.constant 0.707106769 : f32
    %365 = vector.broadcast %cst_142 : f32 to vector<4x112xf32>
    %366 = arith.mulf %362, %365 : vector<4x112xf32>
    %cst_143 = arith.constant 0.000000e+00 : f32
    %367 = vector.broadcast %cst_143 : f32 to vector<4x112xf32>
    %368 = arith.cmpf oge, %366, %367 : vector<4x112xf32>
    %cst_144 = arith.constant 1.000000e+00 : f32
    %cst_145 = arith.constant -1.000000e+00 : f32
    %369 = vector.broadcast %cst_144 : f32 to vector<4x112xf32>
    %370 = vector.broadcast %cst_145 : f32 to vector<4x112xf32>
    %371 = arith.select %368, %369, %370 : vector<4x112xi1>, vector<4x112xf32>
    %372 = math.absf %366 : vector<4x112xf32>
    %cst_146 = arith.constant 0.327591091 : f32
    %373 = vector.broadcast %cst_146 : f32 to vector<4x112xf32>
    %374 = arith.mulf %373, %372 : vector<4x112xf32>
    %cst_147 = arith.constant 1.000000e+00 : f32
    %375 = vector.broadcast %cst_147 : f32 to vector<4x112xf32>
    %376 = arith.addf %375, %374 : vector<4x112xf32>
    %cst_148 = arith.constant 1.000000e+00 : f32
    %377 = vector.broadcast %cst_148 : f32 to vector<4x112xf32>
    %378 = arith.divf %377, %376 : vector<4x112xf32>
    %cst_149 = arith.constant 1.06140542 : f32
    %379 = vector.broadcast %cst_149 : f32 to vector<4x112xf32>
    %380 = arith.mulf %379, %378 : vector<4x112xf32>
    %cst_150 = arith.constant -1.45315206 : f32
    %381 = vector.broadcast %cst_150 : f32 to vector<4x112xf32>
    %382 = arith.addf %380, %381 : vector<4x112xf32>
    %383 = arith.mulf %382, %378 : vector<4x112xf32>
    %cst_151 = arith.constant 1.42141378 : f32
    %384 = vector.broadcast %cst_151 : f32 to vector<4x112xf32>
    %385 = arith.addf %383, %384 : vector<4x112xf32>
    %386 = arith.mulf %385, %378 : vector<4x112xf32>
    %cst_152 = arith.constant -0.284496725 : f32
    %387 = vector.broadcast %cst_152 : f32 to vector<4x112xf32>
    %388 = arith.addf %386, %387 : vector<4x112xf32>
    %389 = arith.mulf %388, %378 : vector<4x112xf32>
    %cst_153 = arith.constant 0.254829586 : f32
    %390 = vector.broadcast %cst_153 : f32 to vector<4x112xf32>
    %391 = arith.addf %389, %390 : vector<4x112xf32>
    %392 = arith.mulf %391, %378 : vector<4x112xf32>
    %cst_154 = arith.constant 0.000000e+00 : f32
    %393 = vector.broadcast %cst_154 : f32 to vector<4x112xf32>
    %394 = arith.subf %393, %372 : vector<4x112xf32>
    %395 = arith.mulf %394, %372 : vector<4x112xf32>
    %396 = math.exp %395 : vector<4x112xf32>
    %397 = arith.mulf %392, %396 : vector<4x112xf32>
    %cst_155 = arith.constant 1.000000e+00 : f32
    %398 = vector.broadcast %cst_155 : f32 to vector<4x112xf32>
    %399 = arith.subf %398, %397 : vector<4x112xf32>
    %400 = arith.mulf %371, %399 : vector<4x112xf32>
    %cst_156 = arith.constant 1.000000e+00 : f32
    %401 = vector.broadcast %cst_156 : f32 to vector<4x112xf32>
    %402 = arith.addf %401, %400 : vector<4x112xf32>
    %403 = arith.mulf %364, %402 : vector<4x112xf32>
    %cst_157 = arith.constant 0.000000e+00 : f32
    %404 = vector.shape_cast %9 : vector<1x112xi1> to vector<1x112xi1>
    %405 = vector.broadcast %404 : vector<1x112xi1> to vector<4x112xi1>
    %406 = vector.broadcast %cst_157 : f32 to vector<4x112xf32>
    %407 = arith.select %405, %403, %406 : vector<4x112xi1>, vector<4x112xf32>
    %408 = arith.truncf %407 : vector<4x112xf32> to vector<4x112xbf16>
    %c2_158 = arith.constant 2 : index
    %c0_159 = arith.constant 0 : index
    %c0_160 = arith.constant 0 : index
    %409 = vector.load %arg7[%c2_158, %c0_159, %c0_160] : memref<3x4x36xbf16, #tpu.memory_space<vmem>>, vector<1x4x36xbf16>
    %410 = vector.shape_cast %409 : vector<1x4x36xbf16> to vector<4x36xbf16>
    %cst_161 = arith.constant 0.000000e+00 : bf16
    %411 = vector.broadcast %cst_161 : bf16 to vector<4x112xbf16>
    %c7_i32_162 = arith.constant 7 : i32
    %412 = vector.broadcast %c7_i32_162 : i32 to vector<1x112xi32>
    %413 = arith.cmpi eq, %10, %412 : vector<1x112xi32>
    %414 = vector.shape_cast %413 : vector<1x112xi1> to vector<1x112xi1>
    %415 = vector.broadcast %414 : vector<1x112xi1> to vector<4x112xi1>
    %416 = arith.select %415, %411, %408 : vector<4x112xi1>, vector<4x112xbf16>
    %417 = vector.extract_strided_slice %416 {offsets = [0, 111], sizes = [4, 1], strides = [1, 1]} : vector<4x112xbf16> to vector<4x1xbf16>
    %418 = vector.extract_strided_slice %416 {offsets = [0, 0], sizes = [4, 111], strides = [1, 1]} : vector<4x112xbf16> to vector<4x111xbf16>
    %419 = tpu.concatenate %417, %418 in 1 : vector<4x1xbf16>, vector<4x111xbf16> -> vector<4x112xbf16>
    %c0_i32_163 = arith.constant 0 : i32
    %420 = vector.broadcast %c0_i32_163 : i32 to vector<1x112xi32>
    %421 = arith.cmpi eq, %10, %420 : vector<1x112xi32>
    %422 = vector.shape_cast %421 : vector<1x112xi1> to vector<1x112xi1>
    %423 = vector.broadcast %422 : vector<1x112xi1> to vector<4x112xi1>
    %424 = arith.select %423, %411, %408 : vector<4x112xi1>, vector<4x112xbf16>
    %425 = vector.extract_strided_slice %424 {offsets = [0, 1], sizes = [4, 111], strides = [1, 1]} : vector<4x112xbf16> to vector<4x111xbf16>
    %426 = vector.extract_strided_slice %424 {offsets = [0, 0], sizes = [4, 1], strides = [1, 1]} : vector<4x112xbf16> to vector<4x1xbf16>
    %427 = tpu.concatenate %425, %426 in 1 : vector<4x111xbf16>, vector<4x1xbf16> -> vector<4x112xbf16>
    %428 = vector.extract_strided_slice %419 {offsets = [0, 104], sizes = [4, 8], strides = [1, 1]} : vector<4x112xbf16> to vector<4x8xbf16>
    %429 = vector.extract_strided_slice %419 {offsets = [0, 0], sizes = [4, 104], strides = [1, 1]} : vector<4x112xbf16> to vector<4x104xbf16>
    %430 = tpu.concatenate %428, %429 in 1 : vector<4x8xbf16>, vector<4x104xbf16> -> vector<4x112xbf16>
    %431 = vector.extract_strided_slice %410 {offsets = [0, 0], sizes = [4, 4], strides = [1, 1]} : vector<4x36xbf16> to vector<4x4xbf16>
    %cst_164 = arith.constant dense<0.000000e+00> : vector<4x112xf32>
    %432 = tpu.matmul %431, %430, %cst_164 {dimension_numbers = #tpu.dot_dimension_numbers<[1], [0], [0], [1], [0, 0, 1, 1], [], []>} : vector<4x4xbf16>, vector<4x112xbf16>, vector<4x112xf32> -> vector<4x112xf32>
    %433 = vector.extract_strided_slice %408 {offsets = [0, 104], sizes = [4, 8], strides = [1, 1]} : vector<4x112xbf16> to vector<4x8xbf16>
    %434 = vector.extract_strided_slice %408 {offsets = [0, 0], sizes = [4, 104], strides = [1, 1]} : vector<4x112xbf16> to vector<4x104xbf16>
    %435 = tpu.concatenate %433, %434 in 1 : vector<4x8xbf16>, vector<4x104xbf16> -> vector<4x112xbf16>
    %436 = vector.extract_strided_slice %410 {offsets = [0, 4], sizes = [4, 4], strides = [1, 1]} : vector<4x36xbf16> to vector<4x4xbf16>
    %cst_165 = arith.constant dense<0.000000e+00> : vector<4x112xf32>
    %437 = tpu.matmul %436, %435, %cst_165 {dimension_numbers = #tpu.dot_dimension_numbers<[1], [0], [0], [1], [0, 0, 1, 1], [], []>} : vector<4x4xbf16>, vector<4x112xbf16>, vector<4x112xf32> -> vector<4x112xf32>
    %438 = arith.addf %432, %437 : vector<4x112xf32>
    %439 = vector.extract_strided_slice %427 {offsets = [0, 104], sizes = [4, 8], strides = [1, 1]} : vector<4x112xbf16> to vector<4x8xbf16>
    %440 = vector.extract_strided_slice %427 {offsets = [0, 0], sizes = [4, 104], strides = [1, 1]} : vector<4x112xbf16> to vector<4x104xbf16>
    %441 = tpu.concatenate %439, %440 in 1 : vector<4x8xbf16>, vector<4x104xbf16> -> vector<4x112xbf16>
    %442 = vector.extract_strided_slice %410 {offsets = [0, 8], sizes = [4, 4], strides = [1, 1]} : vector<4x36xbf16> to vector<4x4xbf16>
    %cst_166 = arith.constant dense<0.000000e+00> : vector<4x112xf32>
    %443 = tpu.matmul %442, %441, %cst_166 {dimension_numbers = #tpu.dot_dimension_numbers<[1], [0], [0], [1], [0, 0, 1, 1], [], []>} : vector<4x4xbf16>, vector<4x112xbf16>, vector<4x112xf32> -> vector<4x112xf32>
    %444 = arith.addf %438, %443 : vector<4x112xf32>
    %445 = vector.extract_strided_slice %410 {offsets = [0, 12], sizes = [4, 4], strides = [1, 1]} : vector<4x36xbf16> to vector<4x4xbf16>
    %cst_167 = arith.constant dense<0.000000e+00> : vector<4x112xf32>
    %446 = tpu.matmul %445, %419, %cst_167 {dimension_numbers = #tpu.dot_dimension_numbers<[1], [0], [0], [1], [0, 0, 1, 1], [], []>} : vector<4x4xbf16>, vector<4x112xbf16>, vector<4x112xf32> -> vector<4x112xf32>
    %447 = arith.addf %444, %446 : vector<4x112xf32>
    %448 = vector.extract_strided_slice %410 {offsets = [0, 16], sizes = [4, 4], strides = [1, 1]} : vector<4x36xbf16> to vector<4x4xbf16>
    %cst_168 = arith.constant dense<0.000000e+00> : vector<4x112xf32>
    %449 = tpu.matmul %448, %408, %cst_168 {dimension_numbers = #tpu.dot_dimension_numbers<[1], [0], [0], [1], [0, 0, 1, 1], [], []>} : vector<4x4xbf16>, vector<4x112xbf16>, vector<4x112xf32> -> vector<4x112xf32>
    %450 = arith.addf %447, %449 : vector<4x112xf32>
    %451 = vector.extract_strided_slice %410 {offsets = [0, 20], sizes = [4, 4], strides = [1, 1]} : vector<4x36xbf16> to vector<4x4xbf16>
    %cst_169 = arith.constant dense<0.000000e+00> : vector<4x112xf32>
    %452 = tpu.matmul %451, %427, %cst_169 {dimension_numbers = #tpu.dot_dimension_numbers<[1], [0], [0], [1], [0, 0, 1, 1], [], []>} : vector<4x4xbf16>, vector<4x112xbf16>, vector<4x112xf32> -> vector<4x112xf32>
    %453 = arith.addf %450, %452 : vector<4x112xf32>
    %454 = vector.extract_strided_slice %419 {offsets = [0, 8], sizes = [4, 104], strides = [1, 1]} : vector<4x112xbf16> to vector<4x104xbf16>
    %455 = vector.extract_strided_slice %419 {offsets = [0, 0], sizes = [4, 8], strides = [1, 1]} : vector<4x112xbf16> to vector<4x8xbf16>
    %456 = tpu.concatenate %454, %455 in 1 : vector<4x104xbf16>, vector<4x8xbf16> -> vector<4x112xbf16>
    %457 = vector.extract_strided_slice %410 {offsets = [0, 24], sizes = [4, 4], strides = [1, 1]} : vector<4x36xbf16> to vector<4x4xbf16>
    %cst_170 = arith.constant dense<0.000000e+00> : vector<4x112xf32>
    %458 = tpu.matmul %457, %456, %cst_170 {dimension_numbers = #tpu.dot_dimension_numbers<[1], [0], [0], [1], [0, 0, 1, 1], [], []>} : vector<4x4xbf16>, vector<4x112xbf16>, vector<4x112xf32> -> vector<4x112xf32>
    %459 = arith.addf %453, %458 : vector<4x112xf32>
    %460 = vector.extract_strided_slice %408 {offsets = [0, 8], sizes = [4, 104], strides = [1, 1]} : vector<4x112xbf16> to vector<4x104xbf16>
    %461 = vector.extract_strided_slice %408 {offsets = [0, 0], sizes = [4, 8], strides = [1, 1]} : vector<4x112xbf16> to vector<4x8xbf16>
    %462 = tpu.concatenate %460, %461 in 1 : vector<4x104xbf16>, vector<4x8xbf16> -> vector<4x112xbf16>
    %463 = vector.extract_strided_slice %410 {offsets = [0, 28], sizes = [4, 4], strides = [1, 1]} : vector<4x36xbf16> to vector<4x4xbf16>
    %cst_171 = arith.constant dense<0.000000e+00> : vector<4x112xf32>
    %464 = tpu.matmul %463, %462, %cst_171 {dimension_numbers = #tpu.dot_dimension_numbers<[1], [0], [0], [1], [0, 0, 1, 1], [], []>} : vector<4x4xbf16>, vector<4x112xbf16>, vector<4x112xf32> -> vector<4x112xf32>
    %465 = arith.addf %459, %464 : vector<4x112xf32>
    %466 = vector.extract_strided_slice %427 {offsets = [0, 8], sizes = [4, 104], strides = [1, 1]} : vector<4x112xbf16> to vector<4x104xbf16>
    %467 = vector.extract_strided_slice %427 {offsets = [0, 0], sizes = [4, 8], strides = [1, 1]} : vector<4x112xbf16> to vector<4x8xbf16>
    %468 = tpu.concatenate %466, %467 in 1 : vector<4x104xbf16>, vector<4x8xbf16> -> vector<4x112xbf16>
    %469 = vector.extract_strided_slice %410 {offsets = [0, 32], sizes = [4, 4], strides = [1, 1]} : vector<4x36xbf16> to vector<4x4xbf16>
    %cst_172 = arith.constant dense<0.000000e+00> : vector<4x112xf32>
    %470 = tpu.matmul %469, %468, %cst_172 {dimension_numbers = #tpu.dot_dimension_numbers<[1], [0], [0], [1], [0, 0, 1, 1], [], []>} : vector<4x4xbf16>, vector<4x112xbf16>, vector<4x112xf32> -> vector<4x112xf32>
    %471 = arith.addf %465, %470 : vector<4x112xf32>
    %c2_173 = arith.constant 2 : index
    %c0_174 = arith.constant 0 : index
    %c0_175 = arith.constant 0 : index
    %472 = vector.load %arg8[%c2_173, %c0_174, %c0_175] : memref<3x4x1xf32, #tpu.memory_space<vmem>>, vector<1x4x1xf32>
    %473 = vector.shape_cast %472 : vector<1x4x1xf32> to vector<4x1xf32>
    %474 = vector.broadcast %473 : vector<4x1xf32> to vector<4x112xf32>
    %475 = arith.addf %471, %474 : vector<4x112xf32>
    %cst_176 = arith.constant 5.000000e-01 : f32
    %476 = vector.broadcast %cst_176 : f32 to vector<4x112xf32>
    %477 = arith.mulf %476, %475 : vector<4x112xf32>
    %cst_177 = arith.constant 0.707106769 : f32
    %478 = vector.broadcast %cst_177 : f32 to vector<4x112xf32>
    %479 = arith.mulf %475, %478 : vector<4x112xf32>
    %cst_178 = arith.constant 0.000000e+00 : f32
    %480 = vector.broadcast %cst_178 : f32 to vector<4x112xf32>
    %481 = arith.cmpf oge, %479, %480 : vector<4x112xf32>
    %cst_179 = arith.constant 1.000000e+00 : f32
    %cst_180 = arith.constant -1.000000e+00 : f32
    %482 = vector.broadcast %cst_179 : f32 to vector<4x112xf32>
    %483 = vector.broadcast %cst_180 : f32 to vector<4x112xf32>
    %484 = arith.select %481, %482, %483 : vector<4x112xi1>, vector<4x112xf32>
    %485 = math.absf %479 : vector<4x112xf32>
    %cst_181 = arith.constant 0.327591091 : f32
    %486 = vector.broadcast %cst_181 : f32 to vector<4x112xf32>
    %487 = arith.mulf %486, %485 : vector<4x112xf32>
    %cst_182 = arith.constant 1.000000e+00 : f32
    %488 = vector.broadcast %cst_182 : f32 to vector<4x112xf32>
    %489 = arith.addf %488, %487 : vector<4x112xf32>
    %cst_183 = arith.constant 1.000000e+00 : f32
    %490 = vector.broadcast %cst_183 : f32 to vector<4x112xf32>
    %491 = arith.divf %490, %489 : vector<4x112xf32>
    %cst_184 = arith.constant 1.06140542 : f32
    %492 = vector.broadcast %cst_184 : f32 to vector<4x112xf32>
    %493 = arith.mulf %492, %491 : vector<4x112xf32>
    %cst_185 = arith.constant -1.45315206 : f32
    %494 = vector.broadcast %cst_185 : f32 to vector<4x112xf32>
    %495 = arith.addf %493, %494 : vector<4x112xf32>
    %496 = arith.mulf %495, %491 : vector<4x112xf32>
    %cst_186 = arith.constant 1.42141378 : f32
    %497 = vector.broadcast %cst_186 : f32 to vector<4x112xf32>
    %498 = arith.addf %496, %497 : vector<4x112xf32>
    %499 = arith.mulf %498, %491 : vector<4x112xf32>
    %cst_187 = arith.constant -0.284496725 : f32
    %500 = vector.broadcast %cst_187 : f32 to vector<4x112xf32>
    %501 = arith.addf %499, %500 : vector<4x112xf32>
    %502 = arith.mulf %501, %491 : vector<4x112xf32>
    %cst_188 = arith.constant 0.254829586 : f32
    %503 = vector.broadcast %cst_188 : f32 to vector<4x112xf32>
    %504 = arith.addf %502, %503 : vector<4x112xf32>
    %505 = arith.mulf %504, %491 : vector<4x112xf32>
    %cst_189 = arith.constant 0.000000e+00 : f32
    %506 = vector.broadcast %cst_189 : f32 to vector<4x112xf32>
    %507 = arith.subf %506, %485 : vector<4x112xf32>
    %508 = arith.mulf %507, %485 : vector<4x112xf32>
    %509 = math.exp %508 : vector<4x112xf32>
    %510 = arith.mulf %505, %509 : vector<4x112xf32>
    %cst_190 = arith.constant 1.000000e+00 : f32
    %511 = vector.broadcast %cst_190 : f32 to vector<4x112xf32>
    %512 = arith.subf %511, %510 : vector<4x112xf32>
    %513 = arith.mulf %484, %512 : vector<4x112xf32>
    %cst_191 = arith.constant 1.000000e+00 : f32
    %514 = vector.broadcast %cst_191 : f32 to vector<4x112xf32>
    %515 = arith.addf %514, %513 : vector<4x112xf32>
    %516 = arith.mulf %477, %515 : vector<4x112xf32>
    %517 = arith.truncf %516 : vector<4x112xf32> to vector<4x112xbf16>
    %c2_192 = arith.constant 2 : index
    %c0_193 = arith.constant 0 : index
    %c0_194 = arith.constant 0 : index
    %518 = vector.load %arg9[%c2_192, %c0_193, %c0_194] : memref<3x8x4xbf16, #tpu.memory_space<vmem>>, vector<1x8x4xbf16>
    %519 = vector.shape_cast %518 : vector<1x8x4xbf16> to vector<8x4xbf16>
    %cst_195 = arith.constant dense<0.000000e+00> : vector<8x112xf32>
    %520 = tpu.matmul %519, %517, %cst_195 {dimension_numbers = #tpu.dot_dimension_numbers<[1], [0], [0], [1], [0, 0, 1, 1], [], []>} : vector<8x4xbf16>, vector<4x112xbf16>, vector<8x112xf32> -> vector<8x112xf32>
    %521 = arith.addf %354, %520 : vector<8x112xf32>
    %c2_196 = arith.constant 2 : index
    %c0_197 = arith.constant 0 : index
    %c0_198 = arith.constant 0 : index
    %522 = vector.load %arg10[%c2_196, %c0_197, %c0_198] : memref<3x8x1xf32, #tpu.memory_space<vmem>>, vector<1x8x1xf32>
    %523 = vector.shape_cast %522 : vector<1x8x1xf32> to vector<8x1xf32>
    %524 = vector.broadcast %523 : vector<8x1xf32> to vector<8x112xf32>
    %525 = arith.addf %521, %524 : vector<8x112xf32>
    %526 = vector.extract_strided_slice %525 {offsets = [0, 24], sizes = [8, 64], strides = [1, 1]} : vector<8x112xf32> to vector<8x64xf32>
    %c0_199 = arith.constant 0 : index
    %c0_200 = arith.constant 0 : index
    %c0_201 = arith.constant 0 : index
    %527 = vector.load %arg3[%c0_199, %c0_200, %c0_201] : memref<1x8x64xf32, #tpu.memory_space<vmem>>, vector<1x8x64xf32>
    %528 = vector.shape_cast %527 : vector<1x8x64xf32> to vector<8x64xf32>
    %529 = arith.addf %526, %528 : vector<8x64xf32>
    %c0_202 = arith.constant 0 : index
    %c0_203 = arith.constant 0 : index
    %c0_204 = arith.constant 0 : index
    %530 = vector.load %arg11[%c0_202, %c0_203, %c0_204] : memref<1x8x64xf32, #tpu.memory_space<vmem>>, vector<1x8x64xf32>
    %531 = vector.shape_cast %530 : vector<1x8x64xf32> to vector<8x64xf32>
    %532 = vector.shape_cast %529 : vector<8x64xf32> to vector<1x8x64xf32>
    tpu.vector_store %arg11[%c0_202, %c0_203, %c0_204], %532 {strides = array<i32>} : memref<1x8x64xf32, #tpu.memory_space<vmem>>, vector<1x8x64xf32>,
    return
  }
  func.func @transform_0(%arg0: i32, %arg1: i32) -> (i32, i32, i32, i32) {
    %c0_i32 = arith.constant 0 : i32
    %c0_i32_0 = arith.constant 0 : i32
    %c0_i32_1 = arith.constant 0 : i32
    return %arg0, %arg1, %c0_i32, %c0_i32_0 : i32, i32, i32, i32
  }
  func.func @transform_1(%arg0: i32, %arg1: i32) -> (i32, i32, i32) {
    %c0_i32 = arith.constant 0 : i32
    %c0_i32_0 = arith.constant 0 : i32
    return %arg0, %c0_i32, %arg1 : i32, i32, i32
  }
  func.func @transform_2(%arg0: i32, %arg1: i32) -> (i32, i32) {
    %c0_i32 = arith.constant 0 : i32
    %c0_i32_0 = arith.constant 0 : i32
    %c0_i32_1 = arith.constant 0 : i32
    return %c0_i32, %c0_i32_0 : i32, i32
  }
  func.func @transform_3(%arg0: i32, %arg1: i32) -> (i32, i32, i32) {
    %c0_i32 = arith.constant 0 : i32
    %c0_i32_0 = arith.constant 0 : i32
    %c0_i32_1 = arith.constant 0 : i32
    %c0_i32_2 = arith.constant 0 : i32
    return %c0_i32, %c0_i32_0, %c0_i32_1 : i32, i32, i32
  }
  func.func @transform_4(%arg0: i32, %arg1: i32) -> (i32, i32, i32) {
    %c0_i32 = arith.constant 0 : i32
    %c0_i32_0 = arith.constant 0 : i32
    %c0_i32_1 = arith.constant 0 : i32
    %c0_i32_2 = arith.constant 0 : i32
    return %c0_i32, %c0_i32_0, %c0_i32_1 : i32, i32, i32
  }
  func.func @transform_5(%arg0: i32, %arg1: i32) -> (i32, i32, i32) {
    %c0_i32 = arith.constant 0 : i32
    %c0_i32_0 = arith.constant 0 : i32
    %c0_i32_1 = arith.constant 0 : i32
    %c0_i32_2 = arith.constant 0 : i32
    return %c0_i32, %c0_i32_0, %c0_i32_1 : i32, i32, i32
  }
  func.func @transform_6(%arg0: i32, %arg1: i32) -> (i32, i32, i32) {
    %c0_i32 = arith.constant 0 : i32
    %c0_i32_0 = arith.constant 0 : i32
    %c0_i32_1 = arith.constant 0 : i32
    %c0_i32_2 = arith.constant 0 : i32
    return %c0_i32, %c0_i32_0, %c0_i32_1 : i32, i32, i32
  }
  func.func @transform_7(%arg0: i32, %arg1: i32) -> (i32, i32, i32) {
    %c0_i32 = arith.constant 0 : i32
    %c0_i32_0 = arith.constant 0 : i32
    %c0_i32_1 = arith.constant 0 : i32
    %c0_i32_2 = arith.constant 0 : i32
    return %c0_i32, %c0_i32_0, %c0_i32_1 : i32, i32, i32
  }
  func.func @transform_8(%arg0: i32, %arg1: i32) -> (i32, i32, i32) {
    %c0_i32 = arith.constant 0 : i32
    %c0_i32_0 = arith.constant 0 : i32
    %c0_i32_1 = arith.constant 0 : i32
    %c0_i32_2 = arith.constant 0 : i32
    return %c0_i32, %c0_i32_0, %c0_i32_1 : i32, i32, i32
  }
  func.func @transform_9(%arg0: i32, %arg1: i32) -> (i32, i32, i32) {
    %c0_i32 = arith.constant 0 : i32
    %c0_i32_0 = arith.constant 0 : i32
    return %arg0, %c0_i32, %arg1 : i32, i32, i32
  }
}

</mosaic_0001>

<bundles_post_ra>
// kernel: forward_pallas.2
= control target key start
LH: loop header
LB: loop body
LE: loop exit
PB: predicated region body
PF: predicated region fallthrough
CT: control target
= control target key end

     0   :  { %s1961_s30 = smov 0   ;;  %s1963_s10 = smov 0   ;;  %s2165_s0 = inlined_call_operand.vmem [shape: bf16[2,1,32,88], index: 0, kind: input, shape index: {}]   ;;  %s2166_s1 = inlined_call_operand.vmem [shape: s32[2,80], index: 1, kind: input, shape index: {}]   ;;  %s2167_s2 = inlined_call_operand.vmem [shape: bf16[8,36], index: 2, kind: input, shape index: {}]   ;;  %s2168_s3 = inlined_call_operand.vmem [shape: f32[8,1], index: 3, kind: input, shape index: {}]   ;;  %s2169_s4 = inlined_call_operand.vmem [shape: bf16[8,72], index: 4, kind: input, shape index: {}]   ;;  %s2170_s5 = inlined_call_operand.vmem [shape: f32[8,1], index: 5, kind: input, shape index: {}]   ;;  %s2171_s6 = inlined_call_operand.vmem [shape: bf16[8,4], index: 6, kind: input, shape index: {}]   ;;  %s2172_s7 = inlined_call_operand.vmem [shape: f32[8,1], index: 7, kind: input, shape index: {}]   ;;  %s2173_s8 = inlined_call_operand.vmem [shape: f32[2,8,64], index: 8, kind: output, shape index: {0}]   ;;  %s2174_s9 = inlined_call_operand.vmem [shape: f32[2,8,64], index: 9, kind: output, shape index: {1}]  }
   0x1   :  { %s1965_s11 = smov 0  }
   0x2 LB: > { %s32_s12 = sadd.s32 1, %s1883_s10  ;;  %p1620_p0 = scmp.ge.s32.totalorder %s1887_s11, 1  ;;  %s1887_s11 = sphi %s1965_s11, %s20_s11   ;;  %s1883_s10 = sphi %s1963_s10, %s2176_s10   ;;  %s1879_s30 = sphi %s1961_s30, %s2175_s30  }
   0x3   : > { %p34_p1 = scmp.ge.s32.totalorder %s32_s12, 2  ;;  %p312_p2 = scmp.lt.s32.totalorder %s1887_s11, 3 }
   0x5   : > { %s2178_s12 = smov (%p34_p1, %s32_s12), 0  ;;  %p313_p3 = pnand %p1620_p0, %p312_p2 }
   0x6   : > { %p361_p4 = scmp.lt.s32.totalorder (!%p313_p3), %s1879_s30, 1  ;;  %s1891_s15 = smov (!%p313_p3), 124  }
   0x7   : > { %316 = sbr.rel (%p313_p3) target bundleno = 990 (0x3de), region = 52  ;;  %s1892_s16 = smov (!%p313_p3), 116  }
   0x8   : > { %s1893_s18 = smov (!%p313_p3), 120   ;;  %s1894_s19 = smov (!%p313_p3), 112  }
   0x9   : > { %s1895_s23 = smov (!%p313_p3), 108   ;;  %s1896_s24 = smov (!%p313_p3), 104  }
   0xa   : > { %s1897_s25 = smov (!%p313_p3), 100   ;;  %s1898_s28 = smov (!%p313_p3), 96  }
   0xb   : > { %s1903_s20 = smov (!%p313_p3), 79   ;;  %s1904_s21 = smov (!%p313_p3), 127  }
   0xc   : > { %v386_v0 = vld [vmem:[%s2167_s2] sm:$0xf]  ;;  %v1889_v2 = vmov 0.0   ;;  %vm1890_vm0 = vmmov 0   ;;  %s2180_s30 = smov (!%p361_p4, %s1879_s30), 1  ;;  %vm397_vm1 = vcmask 1041408  }
   0xd   : > { %v1625_v1 = vcombine.low %v386_v0, %v386_v0  ;;  %1698 = vmatprep.subr.bf16.mxu1 %v1889_v2  ;;  %1692 = vmatprep.subr.bf16.mxu0 %v1889_v2  ;;  %s1653_s17 = sshll.u32 %s2180_s30, 4  ;;  %vm393_vm2 = vcmask 31744   ;;  %v854_v13 = vld [vmem:[%s2168_s3] sm:$0xff]  ;;  %v1899_v14 = vmov 0   ;;  %s1905_s26 = smov 8   ;;  %vm920_vm14 = vcmask 7168  }
   0xe   : > { %1700 = vmatprep.mubr.msk.bf16.mxu1 %vm1890_vm0, %v1889_v2  ;;  %1694 = vmatprep.mubr.msk.bf16.mxu0 %vm1890_vm0, %v1889_v2  ;;  %s1996_s22 = scalar_lea.vmem %s2165_s0, %s1653_s17  ;;  %s1902_s17 = smov 49   ;;  %vm938_vm15 = vcmask 646144  }
   0xf   : > { %391 = vrot.lane.b32.xlu0 %v1625_v1, %s1891_s15  ;;  %542 = vrot.lane.b32.xlu1 %v1625_v1, %s1892_s16  ;;  %v387_v3 = vld [vmem:[%s1996_s22 + $0x4] sm:$0x3]  ;;  %v385_v4 = vld [vmem:[%s1996_s22] sm:$0x3]  ;;  %s1901_s16 = smov 1   ;;  %s1906_s27 = smov 56  }
  0x10   : > { %v1634_v5 = vcombine.low %v385_v4, %v385_v4  ;;  %v445_v6 = vsel %vm397_vm1, %v385_v4, 0  ;;  %v399_v7 = vsel %vm397_vm1, %v387_v3, 0  ;;  %v541_v8 = vld [vmem:[%s1996_s22 + $0x8] sm:$0x3]  ;;  %v1636_v9 = vcombine.low %v387_v3, %v387_v3  ;;  %1852 = vset.pattern.permute.xlu1 %v1899_v14  ;;  %1853 = vset.pattern.permute.xlu0 %v1899_v14  ;;  %v591_v23 = vld [vmem:[%s1996_s22 + $0xc] sm:$0x3] }
  0x11   : > { %1699 = vmatpush3.bf16.msra.mxu1 %v445_v6  ;;  %1693 = vmatpush3.bf16.msra.mxu0 %v399_v7  ;;  %v1857_v10 = vld [vmem:[%s1996_s22] ss:$0 sps:$4 sm:$0xcc]   ;;  %v548_v11 = vsel %vm397_vm1, %v541_v8, 0  ;;  %v598_v24 = vsel %vm397_vm1, %v591_v23, 0  ;;  %s1907_s29 = smov 88  }
  0x12   : > { %1710 = vmatprep.subr.bf16.mxu1 %v1889_v2  ;;  %1704 = vmatprep.subr.bf16.mxu0 %v1889_v2  ;;  %v493_v12 = vrot.slane %v1857_v10, 2  ;;  %v1858_v15 = vld [vmem:[%s1996_s22 + $0x8] ss:$0 sps:$4 sm:$0xcc]   ;;  %s1908_s13 = smov 80  }
  0x13   : > { %488 = vrot.lane.b32.xlu0 %v1625_v1, %s1893_s18  ;;  %592 = vrot.lane.b32.xlu1 %v1625_v1, %s1894_s19  ;;  %v647_v16 = vrot.slane %v1858_v15, 2 }
  0x14   : > { %1701 = vmatmul.mubr.msk.bf16.vlgmr.msra.gmra.mxu1 %vm393_vm2, %v386_v0  ;;  %v498_v17 = vsel %vm397_vm1, %v493_v12, 0 }
  0x15   : > { %1711 = vmatpush3.bf16.msra.mxu1 %v548_v11  ;;  %1712 = vmatprep.mubr.msk.bf16.mxu1 %vm1890_vm0, %v1889_v2  ;;  %v652_v20 = vsel %vm397_vm1, %v647_v16, 0 }
  0x16   : > { %1722 = vmatprep.subr.bf16.mxu1 %v1889_v2 }
  0x17   : > { %642 = vrot.lane.b32.xlu1 %v1625_v1, %s1895_s23  ;;  %700 = vrot.lane.b32.xlu0 %v1634_v5, %s1893_s18 }
  0x1b   : > { %754 = vrot.lane.b32.xlu1 %v1636_v9, %s1893_s18  ;;  %695 = vrot.lane.b32.xlu0 %v1625_v1, %s1896_s24 }
  0x1f   : > { %749 = vrot.lane.b32.xlu1 %v1625_v1, %s1897_s25  ;;  %805 = vrot.lane.b32.xlu0 %v493_v12, %s1893_s18 }
  0x23   : > { %803 = vrot.lane.b32.xlu0 %v1625_v1, %s1898_s28  ;;  %857 = vperm.xlu1 %1852, %v854_v13  }
  0x81   : > { %v392_v18 = vpop.permute.xlu0 %391  ;;  %v543_v19 = vpop.permute.xlu1 %542 }
  0x82   : > { %1695 = vmatmul.mubr.msk.bf16.vlgmr.msra.gmra.mxu0 %vm393_vm2, %v392_v18  ;;  %1713 = vmatmul.mubr.msk.bf16.vlgmr.msra.gmra.mxu1 %vm393_vm2, %v543_v19 }
  0x83   : > { %1705 = vmatpush3.bf16.msra.mxu0 %v498_v17  ;;  %1706 = vmatprep.mubr.msk.bf16.mxu0 %vm1890_vm0, %v1889_v2 }
  0x84   : > { %1716 = vmatprep.subr.bf16.mxu0 %v1889_v2  ;;  %1723 = vmatpush3.bf16.msra.mxu1 %v652_v20 }
  0x85   : > { %v489_v21 = vpop.permute.xlu0 %488  ;;  %v593_v22 = vpop.permute.xlu1 %592  ;;  %1724 = vmatprep.mubr.msk.bf16.mxu1 %vm1890_vm0, %v1889_v2  ;;  %1734 = vmatprep.subr.bf16.mxu1 %v1889_v2 }
  0x89   : > { %v643_v25 = vpop.permute.xlu1 %642  ;;  %v701_v26 = vpop.permute.xlu0 %700 }
  0x8a   : > { %1707 = vmatmul.mubr.msk.bf16.vlgmr.msra.gmra.mxu0 %vm393_vm2, %v489_v21  ;;  %1725 = vmatmul.mubr.msk.bf16.vlgmr.msra.gmra.mxu1 %vm393_vm2, %v643_v25  ;;  %v706_v30 = vsel %vm397_vm1, %v701_v26, 0 }
  0x8b   : > { %1717 = vmatpush3.bf16.msra.mxu0 %v598_v24  ;;  %1718 = vmatprep.mubr.msk.bf16.mxu0 %vm1890_vm0, %v1889_v2 }
  0x8c   : > { %1728 = vmatprep.subr.bf16.mxu0 %v1889_v2  ;;  %1736 = vmatprep.mubr.msk.bf16.mxu1 %vm1890_vm0, %v1889_v2 }
  0x8d   : > { %v755_v27 = vpop.permute.xlu1 %754  ;;  %v696_v29 = vpop.permute.xlu0 %695 }
  0x8e   : > { %v760_v28 = vsel %vm397_vm1, %v755_v27, 0 }
  0x8f   : > { %1735 = vmatpush3.bf16.msra.mxu1 %v760_v28 }
  0x90   : > { %1746 = vmatprep.subr.bf16.mxu1 %v1889_v2 }
  0x91   : > { %v750_v31 = vpop.permute.xlu1 %749  ;;  %v806_v32 = vpop.permute.xlu0 %805 }
  0x92   : > { %1719 = vmatmul.mubr.msk.bf16.vlgmr.msra.gmra.mxu0 %vm393_vm2, %v593_v22  ;;  %1737 = vmatmul.mubr.msk.bf16.vlgmr.msra.gmra.mxu1 %vm393_vm2, %v750_v31  ;;  %v811_v33 = vsel %vm397_vm1, %v806_v32, 0 }
  0x93   : > { %1729 = vmatpush3.bf16.msra.mxu0 %v706_v30  ;;  %1730 = vmatprep.mubr.msk.bf16.mxu0 %vm1890_vm0, %v1889_v2  ;;  %v888_v30 = vld [vmem:[%s2166_s1] sm:$0x1] }
  0x94   : > { %1740 = vmatprep.subr.bf16.mxu0 %v1889_v2  ;;  %1748 = vmatprep.mubr.msk.bf16.mxu1 %vm1890_vm0, %v1889_v2  ;;  %v892_v32 = vadd.s32 4294967295, %v888_v30 }
  0x95   : > { %v804_v34 = vpop.permute.xlu0 %803 }
  0x96   : > { %vm893_vm3 = vcmp.ge.s32.totalorder %v892_v32, 0  ;;  %vm894_vm4 = vcmp.lt.s32.totalorder %v892_v32, 8 }
  0x97   : > { %vm895_vm5 = vmand %vm893_vm3, %vm894_vm4  ;;  %vm947_vm3 = vcmask 64512   ;;  %vm967_vm4 = vcmask 1043456  }
  0x9a   : > { %1731 = vmatmul.mubr.msk.bf16.vlgmr.msra.gmra.mxu0 %vm393_vm2, %v696_v29 }
  0x9b   : > { %1741 = vmatpush3.bf16.msra.mxu0 %v811_v33  ;;  %1742 = vmatprep.mubr.msk.bf16.mxu0 %vm1890_vm0, %v1889_v2 }
  0x9c   : > { %1752 = vmatprep.subr.bf16.mxu0 %v1889_v2 }
  0x9e   : > { %v858_v12 = vpop.permute.xlu1 %857 }
  0xa2   : > { %1743 = vmatmul.mubr.msk.bf16.vlgmr.msra.gmra.mxu0 %vm393_vm2, %v804_v34  ;;  %v897_v34 = vlaneseq }
  0xa3   : > { %1754 = vmatprep.mubr.msk.bf16.mxu0 %vm1890_vm0, %v1889_v2 }
  0xd4   : > { %v481_v35 = vpop.f32.mrf.mxu1 }
  0xd6   : > { %v1702_v36 = vpop.f32.mrf.mxu1 }
  0xd8   : > { %v484_v37 = vpop.f32.mrf.mxu1 }
  0xd9   : > { %v905_v37 = vld [vmem:[%s2166_s1 + $0x1] sm:$0x1] }
  0xda   : > { %v1703_v38 = vpop.f32.mrf.mxu1  ;;  %vm906_vm6 = vcmp.eq.s32.totalorder %v905_v37, 7  ;;  %vm924_vm8 = vcmp.eq.s32.totalorder %v905_v37, 0 }
  0xdb   : > { %v898_v38 = vshrl.u32 %v897_v34, 7 }
 0x142   : > { %v435_v39 = vpop.f32.mrf.mxu0  ;;  %v584_v40 = vpop.f32.mrf.mxu1 }
 0x143   : > { %v482_v53 = vadd.f32 %v481_v35, %v435_v39 }
 0x144   : > { %v1696_v41 = vpop.f32.mrf.mxu0  ;;  %v1714_v42 = vpop.f32.mrf.mxu1 }
 0x145   : > { %v899_v42 = vsub.s32 0, %v898_v38 }
 0x146   : > { %v438_v43 = vpop.f32.mrf.mxu0  ;;  %v587_v44 = vpop.f32.mrf.mxu1 }
 0x147   : > { %v896_v43 = vsel %vm895_vm5, 1, %v1899_v14  ;;  %vm1260_vm5 = vcmask 588800  }
 0x148   : > { %v1697_v45 = vpop.f32.mrf.mxu0  ;;  %v1715_v46 = vpop.f32.mrf.mxu1 }
 0x149   : > { %v907_v45 = vsel %vm906_vm6, 1, %v1899_v14 }
 0x14a   : > { %v534_v47 = vpop.f32.mrf.mxu0  ;;  %v688_v48 = vpop.f32.mrf.mxu1 }
 0x14b   : > { %v540_v56 = vadd.f32 %v534_v47, %v482_v53  ;;  %v900_v47 = vrot.slane %v896_v43, %v899_v42 }
 0x14c   : > { %v1708_v49 = vpop.f32.mrf.mxu0  ;;  %v1726_v50 = vpop.f32.mrf.mxu1 }
 0x14d   : > { %v590_v61 = vadd.f32 %v584_v40, %v540_v56  ;;  %v911_v50 = vrot.slane %v907_v45, %v899_v42  ;;  %vm901_vm9 = vcmp.eq.s32.totalorder %v900_v47, 1  ;;  %v1436_v45 = vld [vmem:[%s2171_s6] sm:$0xf] }
 0x14e   : > { %v537_v51 = vpop.f32.mrf.mxu0  ;;  %v691_v52 = vpop.f32.mrf.mxu1 }
 0x14f   : > { %v925_v52 = vsel %vm924_vm8, 1, %v1899_v14  ;;  %vm912_vm10 = vcmp.eq.s32.totalorder %v911_v50, 1 }
 0x150   : > { %v1709_v54 = vpop.f32.mrf.mxu0  ;;  %v1727_v55 = vpop.f32.mrf.mxu1  ;;  %vm913_vm11 = vmpackc.low %vm912_vm10, %vm912_vm10 }
 0x151   : > { %v929_v55 = vrot.slane %v925_v52, %v899_v42 }
 0x152   : > { %v634_v57 = vpop.f32.mrf.mxu0  ;;  %v796_v58 = vpop.f32.mrf.mxu1 }
 0x153   : > { %v640_v0 = vadd.f32 %v634_v57, %v590_v61  ;;  %vm930_vm12 = vcmp.eq.s32.totalorder %v929_v55, 1 }
 0x154   : > { %v1720_v59 = vpop.f32.mrf.mxu0  ;;  %v1738_v60 = vpop.f32.mrf.mxu1  ;;  %vm931_vm13 = vmpackc.low %vm930_vm12, %vm930_vm12 }
 0x155   : > { %v694_v5 = vadd.f32 %v688_v48, %v640_v0  ;;  %v1900_v48 = vmov -1.0   ;;  %v904_v60 = vld [vmem:[%s2169_s4] sm:$0xf] }
 0x156   : > { %v637_v62 = vpop.f32.mrf.mxu0  ;;  %v799_v63 = vpop.f32.mrf.mxu1  ;;  %v1639_v61 = vcombine.low %v904_v60, %v904_v60 }
 0x158   : > { %v1721_v1 = vpop.f32.mrf.mxu0  ;;  %v1739_v3 = vpop.f32.mrf.mxu1 }
 0x15a   : > { %v742_v4 = vpop.f32.mrf.mxu0 }
 0x15b   : > { %v748_v7 = vadd.f32 %v742_v4, %v694_v5 }
 0x15c   : > { %v1732_v6 = vpop.f32.mrf.mxu0 }
 0x15d   : > { %v802_v10 = vadd.f32 %v796_v58, %v748_v7 }
 0x15e   : > { %v745_v8 = vpop.f32.mrf.mxu0 }
 0x160   : > { %v1733_v9 = vpop.f32.mrf.mxu0 }
 0x162   : > { %v847_v11 = vpop.f32.mrf.mxu0 }
 0x163   : > { %v853_v13 = vadd.f32 %v847_v11, %v802_v10  ;;  %v1860_v10 = vld [vmem:[%s1996_s22 + $0xc] ss:$0 sps:$4 sm:$0x33]   ;;  %v1422_v11 = vld [vmem:[%s2170_s5] sm:$0xff] }
 0x164   : > { %v1744_v15 = vpop.f32.mrf.mxu0 }
 0x165   : > { %v860_v16 = vadd.f32 %v858_v12, %v853_v13 }
 0x166   : > { %v850_v17 = vpop.f32.mrf.mxu0 }
 0x167   : > { %v862_v18 = vmul.f32 0.70710677, %v860_v16  ;;  %v861_v53 = vmul.f32 0.5, %v860_v16 }
 0x168   : > { %v1745_v19 = vpop.f32.mrf.mxu0 }
 0x169   : > { %v865_v20 = vand.u32 2147483647, %v862_v18  ;;  %vm863_vm7 = vcmp.ge.f32.partialorder %v862_v18, 0.0 }
 0x16a   : > { %v864_v49 = vsel %vm863_vm7, 1.0, %v1900_v48 }
 0x16b   : > { %v866_v21 = vmul.f32 0.3275911, %v865_v20  ;;  %v879_v23 = vsub.f32 0.0, %v865_v20 }
 0x16d   : > { %v867_v22 = vadd.f32 1.0, %v866_v21  ;;  %v880_v24 = vmul.f32 %v879_v23, %v865_v20 }
 0x16f   : > { %1861 = vrcp.f32 %v867_v22  ;;  %v881_v27 = vmul.f32 1.442695, %v880_v24 }
 0x171   : > { %1863 = vpow2.f32 %v881_v27 }
 0x17c   : > { %v1862_v25 = vpop.eup %1861 }
 0x17d   : > { %v870_v26 = vmul.f32 1.0614054, %v1862_v25 }
 0x17e   : > { %v1864_v41 = vpop.eup %1863 }
 0x17f   : > { %v871_v28 = vadd.f32 -1.4531521, %v870_v26 }
 0x181   : > { %v872_v29 = vmul.f32 %v1862_v25, %v871_v28 }
 0x183   : > { %v873_v31 = vadd.f32 1.4214138, %v872_v29 }
 0x185   : > { %v874_v33 = vmul.f32 %v1862_v25, %v873_v31 }
 0x187   : > { %v875_v35 = vadd.f32 -0.28449672, %v874_v33 }
 0x189   : > { %v876_v36 = vmul.f32 %v1862_v25, %v875_v35 }
 0x18b   : > { %v877_v39 = vadd.f32 0.2548296, %v876_v36 }
 0x18d   : > { %v878_v40 = vmul.f32 %v1862_v25, %v877_v39 }
 0x18f   : > { %v883_v44 = vmul.f32 %v1864_v41, %v878_v40 }
 0x191   : > { %v884_v46 = vsub.f32 1.0, %v883_v44 }
 0x193   : > { %v885_v51 = vmul.f32 %v884_v46, %v864_v49  ;;  %v1437_v46 = vld [vmem:[%s2172_s7] sm:$0xff] }
 0x195   : > { %v886_v54 = vadd.f32 1.0, %v885_v51 }
 0x197   : > { %v887_v56 = vmul.f32 %v886_v54, %v861_v53 }
 0x199   : > { %v902_v57 = vsel %vm901_vm9, %v887_v56, 0.0 }
 0x19a   : > { %v2068_v58 = vpack.c.bf16 %v902_v57, %v902_v57 }
 0x19c   : > { %v914_v59 = vsel %vm913_vm11, 0, %v2068_v58  ;;  %v932_v14 = vsel %vm931_vm13, 0, %v2068_v58  ;;  %v1165_v24 = vsel %vm967_vm4, %v2068_v58, 0 }
 0x19d   : > { %918 = vrot.lane.b32.xlu1 %v914_v59, %s1901_s16  ;;  %916 = vrot.lane.b32.xlu0 %v914_v59, %s1902_s17 }
 0x1a1   : > { %936 = vrot.lane.b32.xlu1 %v932_v14, %s1903_s20  ;;  %934 = vrot.lane.b32.xlu0 %v932_v14, %s1904_s21  ;;  %s1623_s20 = sshll.u32 %s2180_s30, 3 }
 0x1a2   : > { %s383_s25 = scalar_lea.vmem %s2174_s9, %s1623_s20 }
 0x1a5   : > { %954 = vrot.lane.b32.xlu1 %v2068_v58, %s1905_s26  ;;  %952 = vrot.lane.b32.xlu0 %v2068_v58, %s1906_s27 }
 0x1a9   : > { %962 = vrot.lane.b32.xlu0 %v1639_v61, %s1893_s18 }
 0x20f   : > { %v919_v62 = vpop.permute.xlu1 %918  ;;  %v917_v63 = vpop.permute.xlu0 %916 }
 0x210   : > { %v923_v0 = vsel %vm920_vm14, %v917_v63, %v919_v62 }
 0x211   : > { %945 = vrot.lane.b32.xlu0 %v923_v0, %s1905_s26  ;;  %943 = vrot.lane.b32.xlu1 %v923_v0, %s1906_s27  ;;  %v1116_v21 = vsel %vm967_vm4, %v923_v0, 0 }
 0x213   : > { %v937_v1 = vpop.permute.xlu1 %936  ;;  %v935_v3 = vpop.permute.xlu0 %934 }
 0x214   : > { %v941_v4 = vsel %vm938_vm15, %v935_v3, %v937_v1 }
 0x215   : > { %1058 = vrot.lane.b32.xlu0 %v941_v4, %s1905_s26  ;;  %1056 = vrot.lane.b32.xlu1 %v941_v4, %s1906_s27  ;;  %v1213_v27 = vsel %vm967_vm4, %v941_v4, 0  ;;  %s376_s27 = scalar_lea.vmem %s2173_s8, %s1623_s20 }
 0x217   : > { %v955_v5 = vpop.permute.xlu1 %954  ;;  %v953_v6 = vpop.permute.xlu0 %952 }
 0x218   : > { %v958_v7 = vsel %vm947_vm3, %v953_v6, %v955_v5 }
 0x219   : > { %v968_v8 = vsel %vm967_vm4, %v958_v7, 0  ;;  %1111 = vrot.lane.b32.xlu0 %v1639_v61, %s1896_s24  ;;  %1063 = vrot.lane.b32.xlu1 %v1639_v61, %s1894_s19  ;;  %s1909_s19 = smov 72   ;;  %s1910_s24 = smov 64  }
 0x21a   : > { %1747 = vmatpush3.bf16.msra.mxu1 %v968_v8 }
 0x21b   : > { %v963_v9 = vpop.permute.xlu0 %962  ;;  %1758 = vmatprep.subr.bf16.mxu1 %v1889_v2 }
 0x21d   : > { %1208 = vrot.lane.b32.xlu0 %v1639_v61, %s1907_s29  ;;  %1159 = vrot.lane.b32.xlu1 %v1639_v61, %s1898_s28 }
 0x21e   : > { %1749 = vmatmul.mubr.msk.bf16.vlgmr.msra.gmra.mxu1 %vm947_vm3, %v963_v9 }
 0x21f   : > { %1760 = vmatprep.mubr.msk.bf16.mxu1 %vm1890_vm0, %v1889_v2 }
 0x221   : > { %1256 = vrot.lane.b32.xlu0 %v923_v0, %s1893_s18  ;;  %1264 = vrot.lane.b32.xlu1 %v1639_v61, %s1908_s13 }
 0x225   : > { %1312 = vrot.lane.b32.xlu0 %v2068_v58, %s1893_s18  ;;  %1258 = vrot.lane.b32.xlu1 %v923_v0, %s1909_s19 }
 0x229   : > { %1367 = vrot.lane.b32.xlu0 %v941_v4, %s1893_s18  ;;  %1314 = vrot.lane.b32.xlu1 %v2068_v58, %s1909_s19 }
 0x22d   : > { %1369 = vrot.lane.b32.xlu1 %v941_v4, %s1909_s19  ;;  %1319 = vrot.lane.b32.xlu0 %v1639_v61, %s1909_s19 }
 0x231   : > { %1374 = vrot.lane.b32.xlu1 %v1639_v61, %s1910_s24  ;;  %1446 = vrot.lane.b32.xlu0 %v1860_v10, %s1893_s18 }
 0x235   : > { %1425 = vperm.xlu1 %1852, %v1422_v11   ;;  %1440 = vperm.xlu0 %1853, %v1437_v46  }
 0x283   : > { %v944_v12 = vpop.permute.xlu1 %943  ;;  %v946_v13 = vpop.permute.xlu0 %945 }
 0x284   : > { %v950_v15 = vsel %vm947_vm3, %v944_v12, %v946_v13 }
 0x285   : > { %v1013_v16 = vsel %vm967_vm4, %v950_v15, 0 }
 0x286   : > { %1753 = vmatpush3.bf16.msra.mxu0 %v1013_v16 }
 0x287   : > { %v1057_v17 = vpop.permute.xlu1 %1056  ;;  %v1059_v18 = vpop.permute.xlu0 %1058  ;;  %1764 = vmatprep.subr.bf16.mxu0 %v1889_v2 }
 0x288   : > { %v1062_v19 = vsel %vm947_vm3, %v1057_v17, %v1059_v18 }
 0x289   : > { %v1068_v20 = vsel %vm967_vm4, %v1062_v19, 0  ;;  %1755 = vmatmul.mubr.msk.bf16.vlgmr.msra.gmra.mxu0 %vm947_vm3, %v904_v60 }
 0x28a   : > { %1759 = vmatpush3.bf16.msra.mxu1 %v1068_v20  ;;  %1765 = vmatpush3.bf16.msra.mxu0 %v1116_v21 }
 0x28b   : > { %v1064_v22 = vpop.permute.xlu1 %1063  ;;  %v1112_v23 = vpop.permute.xlu0 %1111  ;;  %1770 = vmatprep.subr.bf16.mxu1 %v1889_v2  ;;  %1766 = vmatprep.mubr.msk.bf16.mxu0 %vm1890_vm0, %v1889_v2 }
 0x28c   : > { %1776 = vmatprep.subr.bf16.mxu0 %v1889_v2 }
 0x28d   : > { %1761 = vmatmul.mubr.msk.bf16.vlgmr.msra.gmra.mxu1 %vm947_vm3, %v1064_v22 }
 0x28e   : > { %1771 = vmatpush3.bf16.msra.mxu1 %v1165_v24  ;;  %1772 = vmatprep.mubr.msk.bf16.mxu1 %vm1890_vm0, %v1889_v2 }
 0x28f   : > { %v1160_v25 = vpop.permute.xlu1 %1159  ;;  %v1209_v26 = vpop.permute.xlu0 %1208  ;;  %1782 = vmatprep.subr.bf16.mxu1 %v1889_v2 }
 0x291   : > { %1767 = vmatmul.mubr.msk.bf16.vlgmr.msra.gmra.mxu0 %vm947_vm3, %v1112_v23 }
 0x292   : > { %1777 = vmatpush3.bf16.msra.mxu0 %v1213_v27  ;;  %1778 = vmatprep.mubr.msk.bf16.mxu0 %vm1890_vm0, %v1889_v2 }
 0x293   : > { %v1265_v28 = vpop.permute.xlu1 %1264  ;;  %v1257_v29 = vpop.permute.xlu0 %1256  ;;  %1788 = vmatprep.subr.bf16.mxu0 %v1889_v2 }
 0x295   : > { %1773 = vmatmul.mubr.msk.bf16.vlgmr.msra.gmra.mxu1 %vm947_vm3, %v1160_v25 }
 0x296   : > { %1784 = vmatprep.mubr.msk.bf16.mxu1 %vm1890_vm0, %v1889_v2 }
 0x297   : > { %v1259_v30 = vpop.permute.xlu1 %1258  ;;  %v1313_v31 = vpop.permute.xlu0 %1312 }
 0x298   : > { %v1263_v32 = vsel %vm1260_vm5, %v1257_v29, %v1259_v30 }
 0x299   : > { %v1269_v33 = vsel %vm967_vm4, %v1263_v32, 0  ;;  %1779 = vmatmul.mubr.msk.bf16.vlgmr.msra.gmra.mxu0 %vm947_vm3, %v1209_v26 }
 0x29a   : > { %1783 = vmatpush3.bf16.msra.mxu1 %v1269_v33  ;;  %1790 = vmatprep.mubr.msk.bf16.mxu0 %vm1890_vm0, %v1889_v2 }
 0x29b   : > { %v1315_v34 = vpop.permute.xlu1 %1314  ;;  %v1368_v35 = vpop.permute.xlu0 %1367  ;;  %1794 = vmatprep.subr.bf16.mxu1 %v1889_v2 }
 0x29c   : > { %v1318_v36 = vsel %vm1260_vm5, %v1313_v31, %v1315_v34 }
 0x29d   : > { %v1324_v37 = vsel %vm967_vm4, %v1318_v36, 0  ;;  %1785 = vmatmul.mubr.msk.bf16.vlgmr.msra.gmra.mxu1 %vm947_vm3, %v1265_v28 }
 0x29e   : > { %1789 = vmatpush3.bf16.msra.mxu0 %v1324_v37  ;;  %1796 = vmatprep.mubr.msk.bf16.mxu1 %vm1890_vm0, %v1889_v2 }
 0x29f   : > { %v1370_v38 = vpop.permute.xlu1 %1369  ;;  %v1320_v39 = vpop.permute.xlu0 %1319  ;;  %1800 = vmatprep.subr.bf16.mxu0 %v1889_v2 }
 0x2a0   : > { %v1373_v40 = vsel %vm1260_vm5, %v1368_v35, %v1370_v38 }
 0x2a1   : > { %v1379_v41 = vsel %vm967_vm4, %v1373_v40, 0  ;;  %1791 = vmatmul.mubr.msk.bf16.vlgmr.msra.gmra.mxu0 %vm947_vm3, %v1320_v39 }
 0x2a2   : > { %1795 = vmatpush3.bf16.msra.mxu1 %v1379_v41  ;;  %1802 = vmatprep.mubr.msk.bf16.mxu0 %vm1890_vm0, %v1889_v2  ;;  %vm1433_vm0 = vcmask 523264  }
 0x2a3   : > { %v1375_v42 = vpop.permute.xlu1 %1374  ;;  %v1447_v43 = vpop.permute.xlu0 %1446 }
 0x2a4   : > { %v1452_v44 = vsel %vm397_vm1, %v1447_v43, 0 }
 0x2a5   : > { %1797 = vmatmul.mubr.msk.bf16.vlgmr.msra.gmra.mxu1 %vm947_vm3, %v1375_v42  ;;  %1801 = vmatpush3.bf16.msra.mxu0 %v1452_v44 }
 0x2a9   : > { %1803 = vmatmul.mubr.msk.bf16.vlgmr.msra.gmra.mxu0 %vm393_vm2, %v1436_v45 }
 0x2b0   : > { %v1426_v22 = vpop.permute.xlu1 %1425  ;;  %v1441_v24 = vpop.permute.xlu0 %1440 }
 0x2de   : > { %v1004_v47 = vpop.f32.mrf.mxu1 }
 0x2e0   : > { %v1750_v2 = vpop.f32.mrf.mxu1 }
 0x2e2   : > { %v1007_v48 = vpop.f32.mrf.mxu1 }
 0x2e4   : > { %v1751_v49 = vpop.f32.mrf.mxu1 }
 0x349   : > { %v1049_v50 = vpop.f32.mrf.mxu0 }
 0x34a   : > { %v1050_v63 = vadd.f32 %v1049_v50, %v1004_v47 }
 0x34b   : > { %v1756_v51 = vpop.f32.mrf.mxu0 }
 0x34d   : > { %v1052_v52 = vpop.f32.mrf.mxu0  ;;  %v1104_v53 = vpop.f32.mrf.mxu1 }
 0x34e   : > { %v1110_v3 = vadd.f32 %v1104_v53, %v1050_v63 }
 0x34f   : > { %v1757_v54 = vpop.f32.mrf.mxu0  ;;  %v1762_v55 = vpop.f32.mrf.mxu1 }
 0x351   : > { %v1107_v56 = vpop.f32.mrf.mxu1  ;;  %v1152_v57 = vpop.f32.mrf.mxu0 }
 0x352   : > { %v1158_v6 = vadd.f32 %v1152_v57, %v1110_v3 }
 0x353   : > { %v1763_v58 = vpop.f32.mrf.mxu1  ;;  %v1768_v59 = vpop.f32.mrf.mxu0 }
 0x355   : > { %v1155_v14 = vpop.f32.mrf.mxu0  ;;  %v1201_v60 = vpop.f32.mrf.mxu1 }
 0x356   : > { %v1207_v9 = vadd.f32 %v1201_v60, %v1158_v6 }
 0x357   : > { %v1769_v61 = vpop.f32.mrf.mxu0  ;;  %v1774_v62 = vpop.f32.mrf.mxu1 }
 0x359   : > { %v1204_v0 = vpop.f32.mrf.mxu1  ;;  %v1249_v1 = vpop.f32.mrf.mxu0 }
 0x35a   : > { %v1255_v12 = vadd.f32 %v1249_v1, %v1207_v9 }
 0x35b   : > { %v1775_v4 = vpop.f32.mrf.mxu1  ;;  %v1780_v5 = vpop.f32.mrf.mxu0 }
 0x35d   : > { %v1252_v7 = vpop.f32.mrf.mxu0  ;;  %v1305_v8 = vpop.f32.mrf.mxu1 }
 0x35e   : > { %v1311_v16 = vadd.f32 %v1305_v8, %v1255_v12 }
 0x35f   : > { %v1781_v10 = vpop.f32.mrf.mxu0  ;;  %v1786_v11 = vpop.f32.mrf.mxu1 }
 0x361   : > { %v1308_v13 = vpop.f32.mrf.mxu1  ;;  %v1360_v15 = vpop.f32.mrf.mxu0 }
 0x362   : > { %v1366_v19 = vadd.f32 %v1360_v15, %v1311_v16 }
 0x363   : > { %v1787_v17 = vpop.f32.mrf.mxu1  ;;  %v1792_v18 = vpop.f32.mrf.mxu0 }
 0x365   : > { %v1415_v20 = vpop.f32.mrf.mxu1  ;;  %v1363_v21 = vpop.f32.mrf.mxu0 }
 0x366   : > { %v1421_v23 = vadd.f32 %v1415_v20, %v1366_v19 }
 0x367   : > { %v1798_v25 = vpop.f32.mrf.mxu1  ;;  %v1793_v26 = vpop.f32.mrf.mxu0 }
 0x368   : > { %v1428_v27 = vadd.f32 %v1426_v22, %v1421_v23 }
 0x369   : > { %v1418_v28 = vpop.f32.mrf.mxu1  ;;  %v1488_v29 = vpop.f32.mrf.mxu0 }
 0x36a   : > { %1430 = vrot.lane.b32.xlu1 %v1428_v27, %s1893_s18  ;;  %v1489_v30 = vadd.f32 %v1488_v29, %v1441_v24 }
 0x36b   : > { %v1799_v31 = vpop.f32.mrf.mxu1  ;;  %v1804_v32 = vpop.f32.mrf.mxu0 }
 0x36c   : > { %1494 = vst.msk [vmem:[%s383_s25] sm:$0xff] %vm1433_vm0, %v1489_v30 }
 0x36d   : > { %v1491_v33 = vpop.f32.mrf.mxu0 }
 0x36f   : > { %v1805_v34 = vpop.f32.mrf.mxu0 }
 0x3dc   : > { %v1431_v35 = vpop.permute.xlu1 %1430 }
 0x3dd   : > { %1434 = vst.msk [vmem:[%s376_s27] sm:$0xff] %vm1433_vm0, %v1431_v35 }
 0x3de PF: > { %s20_s11 = sadd.s32 1, %s1887_s11   ;;  %s2175_s30 = smov %s1883_s10 }
 0x3df   : > { %p17_p5 = scmp.ge.s32.totalorder %s20_s11, 4   ;;  %s2176_s10 = smov %s2178_s12 }
 0x3e1   :  { %19 = sbr.rel (!%p17_p5) target bundleno = 2 (0x2), region = 94 }

// kernel: forward_pallas.3
= control target key start
LH: loop header
LB: loop body
LE: loop exit
PB: predicated region body
PF: predicated region fallthrough
CT: control target
= control target key end

     0   :  { %s3043_s30 = smov 0   ;;  %s3045_s10 = smov 0   ;;  %s3506_s0 = inlined_call_operand.vmem [shape: f32[2,1,8,112], index: 0, kind: input, shape index: {}]   ;;  %s3507_s1 = inlined_call_operand.vmem [shape: f32[2,8,64], index: 1, kind: input, shape index: {}]   ;;  %s3508_s2 = inlined_call_operand.vmem [shape: s32[2,112], index: 2, kind: input, shape index: {}]   ;;  %s3509_s3 = inlined_call_operand.vmem [shape: bf16[3,4,8], index: 3, kind: input, shape index: {}]   ;;  %s3510_s4 = inlined_call_operand.vmem [shape: f32[3,4,1], index: 4, kind: input, shape index: {}]   ;;  %s3511_s5 = inlined_call_operand.vmem [shape: bf16[3,4,36], index: 5, kind: input, shape index: {}]   ;;  %s3512_s6 = inlined_call_operand.vmem [shape: f32[3,4,1], index: 6, kind: input, shape index: {}]   ;;  %s3513_s7 = inlined_call_operand.vmem [shape: bf16[3,8,4], index: 7, kind: input, shape index: {}]   ;;  %s3514_s8 = inlined_call_operand.vmem [shape: f32[3,8,1], index: 8, kind: input, shape index: {}]   ;;  %s3515_s9 = inlined_call_operand.vmem [shape: f32[2,8,64], index: 9, kind: output, shape index: {}]  }
   0x1   :  { %s3047_s11 = smov 0  }
   0x2 LB: > { %s31_s12 = sadd.s32 1, %s2968_s10  ;;  %p2566_p0 = scmp.ge.s32.totalorder %s2972_s11, 1  ;;  %s2972_s11 = sphi %s3047_s11, %s19_s11   ;;  %s2968_s10 = sphi %s3045_s10, %s3539_s10   ;;  %s2964_s30 = sphi %s3043_s30, %s3538_s30  }
   0x3   : > { %p33_p1 = scmp.ge.s32.totalorder %s31_s12, 2  ;;  %p319_p2 = scmp.lt.s32.totalorder %s2972_s11, 3 }
   0x5   : > { %s3541_s12 = smov (%p33_p1, %s31_s12), 0  ;;  %p320_p3 = pnand %p2566_p0, %p319_p2 }
   0x6   : > { %p366_p4 = scmp.lt.s32.totalorder (!%p320_p3), %s2964_s30, 1  ;;  %s2979_s25 = smov (!%p320_p3), 1  }
   0x7   : > { %323 = sbr.rel (%p320_p3) target bundleno = 3041 (0xbe1), region = 56  ;;  %s2980_s26 = smov (!%p320_p3), 17  }
   0x8   : > { %s2981_s27 = smov (!%p320_p3), 127   ;;  %s2982_s28 = smov (!%p320_p3), 111  }
   0x9   : > { %s3524_s13 = smov (!%p320_p3), 24   ;;  %s2984_s14 = smov (!%p320_p3), 8  }
   0xa   : > { %s3523_s16 = smov (!%p320_p3), 124   ;;  %s3522_s17 = smov (!%p320_p3), 116  }
   0xb   : > { %s3518_s19 = smov (!%p320_p3), 108   ;;  %s3516_s20 = smov (!%p320_p3), 112  }
   0xc   : > { %v2974_v0 = vmov 0.0   ;;  %vm2975_vm0 = vmmov 0   ;;  %v400_v1 = vld [vmem:[%s3510_s4] sm:$0xf]  ;;  %s3543_s30 = smov (!%p366_p4, %s2964_s30), 1  ;;  %v2976_v2 = vmov 0   ;;  %v482_v28 = vlaneseq }
   0xd   : > { %2683 = vmatprep.subr.bf16.mxu0 %v2974_v0  ;;  %2685 = vmatprep.mubr.msk.bf16.mxu0 %vm2975_vm0, %v2974_v0  ;;  %s3071_s15 = sshll.u32 %s3543_s30, 3  ;;  %vm410_vm1 = vcmask 1043456   ;;  %v398_v6 = vld [vmem:[%s3509_s3] sm:$0x3]  ;;  %vm406_vm2 = vcmask 64512   ;;  %v2977_v41 = vmov -1.0  }
   0xe   : > { %2924 = vset.pattern.permute.xlu0 %v2976_v2  ;;  %2689 = vmatprep.subr.bf16.mxu1 %v2974_v0  ;;  %s372_s18 = scalar_lea.vmem %s3506_s0, %s3071_s15  ;;  %v388_v24 = vld [vmem:[%s3508_s2] sm:$0x1]  ;;  %v396_v31 = vld [vmem:[%s3508_s2 + $0x1] sm:$0x1]  ;;  %v483_v32 = vshrl.u32 %v482_v28, 7  ;;  %vm504_vm14 = vcmask 7168   ;;  %s386_s24 = scalar_lea.vmem %s3515_s9, %s3071_s15 }
   0xf   : > { %403 = vperm.xlu0 %2924, %v400_v1   ;;  %2691 = vmatprep.mubr.msk.bf16.mxu1 %vm2975_vm0, %v2974_v0  ;;  %v3078_v3 = vld [vmem:[%s372_s18] sm:$0xff]  ;;  %v392_v26 = vadd.s32 4294967293, %v388_v24  ;;  %vm490_vm6 = vcmp.eq.s32.totalorder %v396_v31, 7  ;;  %vm508_vm8 = vcmp.eq.s32.totalorder %v396_v31, 0  ;;  %v2978_v53 = vmov 1983009808  }
  0x10   : > { %2925 = vset.pattern.permute.xlu1 %v2976_v2  ;;  %v399_v4 = vpack.c.bf16 %v3078_v3, %v3078_v3  ;;  %v484_v36 = vsub.s32 0, %v483_v32  ;;  %v491_v39 = vsel %vm490_vm6, 1, %v2976_v2  ;;  %v509_v46 = vsel %vm508_vm8, 1, %v2976_v2  ;;  %v3131_v62 = vld [vmem:[%s3511_s5] sm:$0x3]  ;;  %s3520_s18 = smov 120  }
  0x11   : > { %vm393_vm3 = vcmp.ge.s32.totalorder %v392_v26, 0  ;;  %vm394_vm4 = vcmp.lt.s32.totalorder %v392_v26, 8  ;;  %v544_v54 = vunpack.c.l.s4 %v2978_v53  ;;  %vm522_vm15 = vcmask 908288   ;;  %s2990_s21 = smov 104   ;;  %s2991_s22 = smov 100  }
  0x12   : > { %v412_v5 = vsel %vm410_vm1, %v399_v4, 0  ;;  %vm395_vm5 = vmand %vm393_vm3, %vm394_vm4  ;;  %v495_v44 = vrot.slane %v491_v39, %v484_v36  ;;  %v513_v50 = vrot.slane %v509_v46, %v484_v36  ;;  %vm556_vm3 = vcmask 1041408   ;;  %s2992_s29 = smov 96   ;;  %v2601_v49 = vld [vmem:[%s3511_s5 + $0x4] sm:$0x3] }
  0x13   : > { %2684 = vmatpush3.bf16.msra.mxu0 %v412_v5  ;;  %v481_v38 = vsel %vm395_vm5, 1, %v2976_v2  ;;  %v545_v58 = vunpack.c.0.s8 %v544_v54  ;;  %vm552_vm4 = vcmask 31744   ;;  %vm849_vm5 = vcmask 850944  }
  0x14   : > { %2695 = vmatprep.subr.bf16.mxu0 %v2974_v0  ;;  %v485_v43 = vrot.slane %v481_v38, %v484_v36  ;;  %vm496_vm10 = vcmp.eq.s32.totalorder %v495_v44, 1  ;;  %vm514_vm12 = vcmp.eq.s32.totalorder %v513_v50, 1 }
  0x15   : > { %vm3106_vm11 = vmpackc.low %vm496_vm10, %vm496_vm10  ;;  %v3124_v61 = vsub.s32 %v545_v58, %v483_v32 }
  0x16   : > { %2686 = vmatmul.mubr.msk.bf16.vlgmr.msra.gmra.mxu0 %vm406_vm2, %v398_v6  ;;  %vm3100_vm9 = vcmp.eq.s32.totalorder %v485_v43, 1  ;;  %vm3117_vm13 = vmpackc.low %vm514_vm12, %vm514_vm12 }
  0x17   : > { %2697 = vmatprep.mubr.msk.bf16.mxu0 %vm2975_vm0, %v2974_v0  ;;  %v549_v63 = vrot.slane %v3131_v62, %v3124_v61 }
  0x8a   : > { %v404_v7 = vpop.permute.xlu0 %403 }
  0xd6   : > { %v448_v8 = vpop.f32.mrf.mxu0 }
  0xd7   : > { %v449_v9 = vadd.f32 %v448_v8, %v404_v7 }
  0xd8   : > { %v2687_v10 = vpop.f32.mrf.mxu0 }
  0xd9   : > { %v455_v11 = vmul.f32 0.70710677, %v449_v9  ;;  %v454_v47 = vmul.f32 0.5, %v449_v9 }
  0xda   : > { %v451_v12 = vpop.f32.mrf.mxu0 }
  0xdb   : > { %v458_v13 = vand.u32 2147483647, %v455_v11  ;;  %vm456_vm7 = vcmp.ge.f32.partialorder %v455_v11, 0.0 }
  0xdc   : > { %v2688_v14 = vpop.f32.mrf.mxu0  ;;  %v457_v42 = vsel %vm456_vm7, 1.0, %v2977_v41 }
  0xdd   : > { %v459_v15 = vmul.f32 0.3275911, %v458_v13  ;;  %v472_v17 = vsub.f32 0.0, %v458_v13  ;;  %v1094_v14 = vld [vmem:[%s3514_s8] sm:$0xff] }
  0xdf   : > { %v460_v16 = vadd.f32 1.0, %v459_v15  ;;  %v473_v18 = vmul.f32 %v472_v17, %v458_v13  ;;  %v1011_v13 = vld [vmem:[%s3512_s6] sm:$0xf]  ;;  %v2582_v15 = vld [vmem:[%s3510_s4 + $0x4] sm:$0xf] }
  0xe1   : > { %2926 = vrcp.f32 %v460_v16  ;;  %v474_v21 = vmul.f32 1.442695, %v473_v18 }
  0xe3   : > { %2928 = vpow2.f32 %v474_v21 }
  0xee   : > { %v2927_v19 = vpop.eup %2926 }
  0xef   : > { %v463_v20 = vmul.f32 1.0614054, %v2927_v19 }
  0xf0   : > { %v2929_v35 = vpop.eup %2928 }
  0xf1   : > { %v464_v22 = vadd.f32 -1.4531521, %v463_v20 }
  0xf3   : > { %v465_v23 = vmul.f32 %v2927_v19, %v464_v22 }
  0xf5   : > { %v466_v25 = vadd.f32 1.4214138, %v465_v23 }
  0xf7   : > { %v467_v27 = vmul.f32 %v2927_v19, %v466_v25 }
  0xf9   : > { %v468_v29 = vadd.f32 -0.28449672, %v467_v27 }
  0xfb   : > { %v469_v30 = vmul.f32 %v2927_v19, %v468_v29 }
  0xfd   : > { %v470_v33 = vadd.f32 0.2548296, %v469_v30 }
  0xff   : > { %v471_v34 = vmul.f32 %v2927_v19, %v470_v33 }
 0x101   : > { %v476_v37 = vmul.f32 %v2929_v35, %v471_v34 }
 0x103   : > { %v477_v40 = vsub.f32 1.0, %v476_v37 }
 0x105   : > { %v478_v45 = vmul.f32 %v477_v40, %v457_v42 }
 0x107   : > { %v479_v48 = vadd.f32 1.0, %v478_v45 }
 0x109   : > { %v480_v51 = vmul.f32 %v479_v48, %v454_v47 }
 0x10b   : > { %v487_v52 = vsel %vm3100_vm9, %v480_v51, 0.0 }
 0x10c   : > { %v3110_v56 = vpack.c.bf16 %v487_v52, %v487_v52 }
 0x10e   : > { %v498_v57 = vsel %vm3106_vm11, 0, %v3110_v56  ;;  %v516_v60 = vsel %vm3117_vm13, 0, %v3110_v56  ;;  %v754_v27 = vsel %vm556_vm3, %v3110_v56, 0 }
 0x10f   : > { %502 = vrot.lane.b32.xlu1 %v498_v57, %s2979_s25  ;;  %500 = vrot.lane.b32.xlu0 %v498_v57, %s2980_s26 }
 0x113   : > { %518 = vrot.lane.b32.xlu1 %v516_v60, %s2981_s27  ;;  %520 = vrot.lane.b32.xlu0 %v516_v60, %s2982_s28 }
 0x117   : > { %535 = vrot.lane.b32.xlu1 %v3110_v56, %s3524_s13  ;;  %537 = vrot.lane.b32.xlu0 %v3110_v56, %s2984_s14 }
 0x11b   : > { %550 = vrot.lane.b32.xlu1 %v549_v63, %s3523_s16 }
 0x181   : > { %v503_v1 = vpop.permute.xlu1 %502  ;;  %v501_v2 = vpop.permute.xlu0 %500 }
 0x182   : > { %v507_v4 = vsel %vm504_vm14, %v501_v2, %v503_v1 }
 0x183   : > { %529 = vrot.lane.b32.xlu1 %v507_v4, %s2984_s14  ;;  %527 = vrot.lane.b32.xlu0 %v507_v4, %s3524_s13  ;;  %v705_v24 = vsel %vm556_vm3, %v507_v4, 0 }
 0x185   : > { %v519_v5 = vpop.permute.xlu1 %518  ;;  %v521_v6 = vpop.permute.xlu0 %520 }
 0x186   : > { %v3144_v7 = vsel %vm522_vm15, %v519_v5, %v521_v6 }
 0x187   : > { %647 = vrot.lane.b32.xlu1 %v3144_v7, %s2984_s14  ;;  %645 = vrot.lane.b32.xlu0 %v3144_v7, %s3524_s13  ;;  %v802_v30 = vsel %vm556_vm3, %v3144_v7, 0 }
 0x189   : > { %v536_v8 = vpop.permute.xlu1 %535  ;;  %v538_v9 = vpop.permute.xlu0 %537 }
 0x18a   : > { %v541_v10 = vsel %vm406_vm2, %v536_v8, %v538_v9 }
 0x18b   : > { %700 = vrot.lane.b32.xlu1 %v549_v63, %s3522_s17  ;;  %652 = vrot.lane.b32.xlu0 %v549_v63, %s3520_s18  ;;  %v557_v11 = vsel %vm556_vm3, %v541_v10, 0 }
 0x18c   : > { %2690 = vmatpush3.bf16.msra.mxu1 %v557_v11 }
 0x18d   : > { %v551_v12 = vpop.permute.xlu1 %550  ;;  %2701 = vmatprep.subr.bf16.mxu1 %v2974_v0 }
 0x18f   : > { %797 = vrot.lane.b32.xlu1 %v549_v63, %s3518_s19  ;;  %748 = vrot.lane.b32.xlu0 %v549_v63, %s3516_s20  ;;  %s3533_s19 = smov 108   ;;  %s3534_s20 = smov 112  }
 0x190   : > { %2692 = vmatmul.mubr.msk.bf16.vlgmr.msra.gmra.mxu1 %vm552_vm4, %v551_v12 }
 0x191   : > { %2703 = vmatprep.mubr.msk.bf16.mxu1 %vm2975_vm0, %v2974_v0 }
 0x193   : > { %845 = vrot.lane.b32.xlu1 %v507_v4, %s3520_s18  ;;  %853 = vrot.lane.b32.xlu0 %v549_v63, %s2990_s21 }
 0x197   : > { %901 = vrot.lane.b32.xlu1 %v3110_v56, %s3520_s18  ;;  %847 = vrot.lane.b32.xlu0 %v507_v4, %s2990_s21 }
 0x19b   : > { %956 = vrot.lane.b32.xlu1 %v3144_v7, %s3520_s18  ;;  %903 = vrot.lane.b32.xlu0 %v3110_v56, %s2990_s21  ;;  %s3532_s18 = smov 120  }
 0x19f   : > { %958 = vrot.lane.b32.xlu0 %v3144_v7, %s2990_s21  ;;  %908 = vrot.lane.b32.xlu1 %v549_v63, %s2991_s22 }
 0x1a3   : > { %963 = vrot.lane.b32.xlu0 %v549_v63, %s2992_s29  ;;  %1014 = vperm.xlu1 %2925, %v1011_v13  }
 0x1a7   : > { %1097 = vperm.xlu0 %2924, %v1094_v14   ;;  %1108 = vperm.xlu1 %2925, %v2582_v15  }
 0x1f5   : > { %v530_v16 = vpop.permute.xlu1 %529  ;;  %v528_v17 = vpop.permute.xlu0 %527 }
 0x1f6   : > { %v533_v18 = vsel %vm406_vm2, %v528_v17, %v530_v16 }
 0x1f7   : > { %v602_v19 = vsel %vm556_vm3, %v533_v18, 0 }
 0x1f8   : > { %2696 = vmatpush3.bf16.msra.mxu0 %v602_v19 }
 0x1f9   : > { %v648_v20 = vpop.permute.xlu1 %647  ;;  %v646_v21 = vpop.permute.xlu0 %645  ;;  %2707 = vmatprep.subr.bf16.mxu0 %v2974_v0 }
 0x1fa   : > { %v651_v22 = vsel %vm406_vm2, %v646_v21, %v648_v20 }
 0x1fb   : > { %v657_v23 = vsel %vm556_vm3, %v651_v22, 0  ;;  %2698 = vmatmul.mubr.msk.bf16.vlgmr.msra.gmra.mxu0 %vm552_vm4, %v3131_v62 }
 0x1fc   : > { %2702 = vmatpush3.bf16.msra.mxu1 %v657_v23  ;;  %2708 = vmatpush3.bf16.msra.mxu0 %v705_v24 }
 0x1fd   : > { %v701_v25 = vpop.permute.xlu1 %700  ;;  %v653_v26 = vpop.permute.xlu0 %652  ;;  %2713 = vmatprep.subr.bf16.mxu1 %v2974_v0  ;;  %2709 = vmatprep.mubr.msk.bf16.mxu0 %vm2975_vm0, %v2974_v0 }
 0x1fe   : > { %2719 = vmatprep.subr.bf16.mxu0 %v2974_v0 }
 0x1ff   : > { %2704 = vmatmul.mubr.msk.bf16.vlgmr.msra.gmra.mxu1 %vm552_vm4, %v653_v26 }
 0x200   : > { %2714 = vmatpush3.bf16.msra.mxu1 %v754_v27  ;;  %2715 = vmatprep.mubr.msk.bf16.mxu1 %vm2975_vm0, %v2974_v0 }
 0x201   : > { %v798_v28 = vpop.permute.xlu1 %797  ;;  %v749_v29 = vpop.permute.xlu0 %748  ;;  %2725 = vmatprep.subr.bf16.mxu1 %v2974_v0 }
 0x203   : > { %2710 = vmatmul.mubr.msk.bf16.vlgmr.msra.gmra.mxu0 %vm552_vm4, %v701_v25 }
 0x204   : > { %2720 = vmatpush3.bf16.msra.mxu0 %v802_v30  ;;  %2721 = vmatprep.mubr.msk.bf16.mxu0 %vm2975_vm0, %v2974_v0 }
 0x205   : > { %v846_v31 = vpop.permute.xlu1 %845  ;;  %v854_v32 = vpop.permute.xlu0 %853  ;;  %2731 = vmatprep.subr.bf16.mxu0 %v2974_v0 }
 0x207   : > { %2716 = vmatmul.mubr.msk.bf16.vlgmr.msra.gmra.mxu1 %vm552_vm4, %v749_v29 }
 0x208   : > { %2727 = vmatprep.mubr.msk.bf16.mxu1 %vm2975_vm0, %v2974_v0 }
 0x209   : > { %v902_v33 = vpop.permute.xlu1 %901  ;;  %v848_v34 = vpop.permute.xlu0 %847 }
 0x20a   : > { %v852_v35 = vsel %vm849_vm5, %v846_v31, %v848_v34 }
 0x20b   : > { %v858_v36 = vsel %vm556_vm3, %v852_v35, 0  ;;  %2722 = vmatmul.mubr.msk.bf16.vlgmr.msra.gmra.mxu0 %vm552_vm4, %v798_v28 }
 0x20c   : > { %2726 = vmatpush3.bf16.msra.mxu1 %v858_v36  ;;  %2733 = vmatprep.mubr.msk.bf16.mxu0 %vm2975_vm0, %v2974_v0 }
 0x20d   : > { %v957_v37 = vpop.permute.xlu1 %956  ;;  %v904_v38 = vpop.permute.xlu0 %903  ;;  %2737 = vmatprep.subr.bf16.mxu1 %v2974_v0 }
 0x20e   : > { %v907_v39 = vsel %vm849_vm5, %v902_v33, %v904_v38 }
 0x20f   : > { %v913_v40 = vsel %vm556_vm3, %v907_v39, 0  ;;  %2728 = vmatmul.mubr.msk.bf16.vlgmr.msra.gmra.mxu1 %vm552_vm4, %v854_v32 }
 0x210   : > { %2732 = vmatpush3.bf16.msra.mxu0 %v913_v40  ;;  %2739 = vmatprep.mubr.msk.bf16.mxu1 %vm2975_vm0, %v2974_v0 }
 0x211   : > { %v959_v42 = vpop.permute.xlu0 %958  ;;  %v909_v43 = vpop.permute.xlu1 %908  ;;  %2743 = vmatprep.subr.bf16.mxu0 %v2974_v0 }
 0x212   : > { %v962_v44 = vsel %vm849_vm5, %v957_v37, %v959_v42 }
 0x213   : > { %v968_v45 = vsel %vm556_vm3, %v962_v44, 0  ;;  %2734 = vmatmul.mubr.msk.bf16.vlgmr.msra.gmra.mxu0 %vm552_vm4, %v909_v43 }
 0x214   : > { %2738 = vmatpush3.bf16.msra.mxu1 %v968_v45  ;;  %2745 = vmatprep.mubr.msk.bf16.mxu0 %vm2975_vm0, %v2974_v0 }
 0x215   : > { %v964_v46 = vpop.permute.xlu0 %963  ;;  %2749 = vmatprep.subr.bf16.mxu1 %v2974_v0 }
 0x217   : > { %2740 = vmatmul.mubr.msk.bf16.vlgmr.msra.gmra.mxu1 %vm552_vm4, %v964_v46 }
 0x218   : > { %2751 = vmatprep.mubr.msk.bf16.mxu1 %vm2975_vm0, %v2974_v0 }
 0x21e   : > { %v1015_v28 = vpop.permute.xlu1 %1014 }
 0x250   : > { %v593_v47 = vpop.f32.mrf.mxu1 }
 0x252   : > { %v2693_v48 = vpop.f32.mrf.mxu1 }
 0x254   : > { %v596_v50 = vpop.f32.mrf.mxu1 }
 0x256   : > { %v2694_v51 = vpop.f32.mrf.mxu1 }
 0x2bb   : > { %v638_v52 = vpop.f32.mrf.mxu0 }
 0x2bc   : > { %v639_v7 = vadd.f32 %v638_v52, %v593_v47 }
 0x2bd   : > { %v2699_v53 = vpop.f32.mrf.mxu0 }
 0x2bf   : > { %v641_v54 = vpop.f32.mrf.mxu0  ;;  %v693_v56 = vpop.f32.mrf.mxu1 }
 0x2c0   : > { %v699_v10 = vadd.f32 %v693_v56, %v639_v7 }
 0x2c1   : > { %v2700_v57 = vpop.f32.mrf.mxu0  ;;  %v2705_v58 = vpop.f32.mrf.mxu1 }
 0x2c3   : > { %v696_v60 = vpop.f32.mrf.mxu1  ;;  %v741_v62 = vpop.f32.mrf.mxu0 }
 0x2c4   : > { %v747_v13 = vadd.f32 %v741_v62, %v699_v10 }
 0x2c5   : > { %v2706_v63 = vpop.f32.mrf.mxu1  ;;  %v2711_v1 = vpop.f32.mrf.mxu0 }
 0x2c7   : > { %v744_v2 = vpop.f32.mrf.mxu0  ;;  %v790_v4 = vpop.f32.mrf.mxu1 }
 0x2c8   : > { %v796_v16 = vadd.f32 %v790_v4, %v747_v13 }
 0x2c9   : > { %v2712_v5 = vpop.f32.mrf.mxu0  ;;  %v2717_v6 = vpop.f32.mrf.mxu1 }
 0x2ca   : > { %v1046_v5 = vld [vmem:[%s3513_s7] sm:$0xf] }
 0x2cb   : > { %v793_v8 = vpop.f32.mrf.mxu1  ;;  %v838_v9 = vpop.f32.mrf.mxu0 }
 0x2cc   : > { %v844_v19 = vadd.f32 %v838_v9, %v796_v16  ;;  %v1098_v8 = vpop.permute.xlu0 %1097 }
 0x2cd   : > { %v2718_v11 = vpop.f32.mrf.mxu1  ;;  %v2723_v12 = vpop.f32.mrf.mxu0 }
 0x2cf   : > { %v841_v14 = vpop.f32.mrf.mxu0  ;;  %v894_v15 = vpop.f32.mrf.mxu1 }
 0x2d0   : > { %v900_v22 = vadd.f32 %v894_v15, %v844_v19  ;;  %v2581_v15 = vld [vmem:[%s3509_s3 + $0x2] sm:$0x3] }
 0x2d1   : > { %v2724_v17 = vpop.f32.mrf.mxu0  ;;  %v2729_v18 = vpop.f32.mrf.mxu1 }
 0x2d3   : > { %v897_v20 = vpop.f32.mrf.mxu1  ;;  %v949_v21 = vpop.f32.mrf.mxu0 }
 0x2d4   : > { %v955_v25 = vadd.f32 %v949_v21, %v900_v22 }
 0x2d5   : > { %v2730_v23 = vpop.f32.mrf.mxu1  ;;  %v2735_v24 = vpop.f32.mrf.mxu0 }
 0x2d7   : > { %v952_v26 = vpop.f32.mrf.mxu0  ;;  %v1004_v27 = vpop.f32.mrf.mxu1 }
 0x2d8   : > { %v1010_v29 = vadd.f32 %v1004_v27, %v955_v25 }
 0x2d9   : > { %v2736_v30 = vpop.f32.mrf.mxu0  ;;  %v2741_v31 = vpop.f32.mrf.mxu1 }
 0x2da   : > { %v1017_v32 = vadd.f32 %v1015_v28, %v1010_v29 }
 0x2db   : > { %v1007_v33 = vpop.f32.mrf.mxu1 }
 0x2dc   : > { %v1019_v34 = vmul.f32 0.70710677, %v1017_v32  ;;  %v1018_v62 = vmul.f32 0.5, %v1017_v32 }
 0x2dd   : > { %v2742_v35 = vpop.f32.mrf.mxu1 }
 0x2de   : > { %v1022_v36 = vand.u32 2147483647, %v1019_v34  ;;  %vm1020_vm6 = vcmp.ge.f32.partialorder %v1019_v34, 0.0 }
 0x2df   : > { %v1021_v58 = vsel %vm1020_vm6, 1.0, %v2977_v41 }
 0x2e0   : > { %v1023_v37 = vmul.f32 0.3275911, %v1022_v36  ;;  %v1036_v39 = vsub.f32 0.0, %v1022_v36 }
 0x2e2   : > { %v1024_v38 = vadd.f32 1.0, %v1023_v37  ;;  %v1037_v40 = vmul.f32 %v1036_v39, %v1022_v36 }
 0x2e4   : > { %2930 = vrcp.f32 %v1024_v38  ;;  %v1038_v43 = vmul.f32 1.442695, %v1037_v40 }
 0x2e6   : > { %2932 = vpow2.f32 %v1038_v43 }
 0x2f1   : > { %v2931_v42 = vpop.eup %2930 }
 0x2f2   : > { %v1027_v44 = vmul.f32 1.0614054, %v2931_v42 }
 0x2f3   : > { %v2933_v54 = vpop.eup %2932 }
 0x2f4   : > { %v1028_v45 = vadd.f32 -1.4531521, %v1027_v44 }
 0x2f6   : > { %v1029_v46 = vmul.f32 %v2931_v42, %v1028_v45 }
 0x2f8   : > { %v1030_v47 = vadd.f32 1.4214138, %v1029_v46 }
 0x2fa   : > { %v1031_v48 = vmul.f32 %v2931_v42, %v1030_v47 }
 0x2fc   : > { %v1032_v50 = vadd.f32 -0.28449672, %v1031_v48 }
 0x2fe   : > { %v1033_v51 = vmul.f32 %v2931_v42, %v1032_v50 }
 0x300   : > { %v1034_v52 = vadd.f32 0.2548296, %v1033_v51 }
 0x302   : > { %v1035_v53 = vmul.f32 %v2931_v42, %v1034_v52  ;;  %v2584_v52 = vld [vmem:[%s3511_s5 + $0x2] sm:$0x3] }
 0x304   : > { %v1040_v56 = vmul.f32 %v2933_v54, %v1035_v53  ;;  %v1229_v53 = vrot.slane %v2584_v52, %v3124_v61 }
 0x306   : > { %v1041_v57 = vsub.f32 1.0, %v1040_v56 }
 0x308   : > { %v1042_v60 = vmul.f32 %v1041_v57, %v1021_v58 }
 0x30a   : > { %v1043_v63 = vadd.f32 1.0, %v1042_v60 }
 0x30c   : > { %v1044_v1 = vmul.f32 %v1043_v63, %v1018_v62 }
 0x30e   : > { %v1045_v2 = vpack.c.bf16 %v1044_v1, %v1044_v1 }
 0x310   : > { %v1051_v4 = vsel %vm556_vm3, %v1045_v2, 0 }
 0x311   : > { %2744 = vmatpush3.bf16.msra.mxu0 %v1051_v4 }
 0x312   : > { %2755 = vmatprep.subr.bf16.mxu0 %v2974_v0 }
 0x314   : > { %2746 = vmatmul.mubr.msk.bf16.vlgmr.msra.gmra.mxu0 %vm552_vm4, %v1046_v5 }
 0x315   : > { %2757 = vmatprep.mubr.msk.bf16.mxu0 %vm2975_vm0, %v2974_v0 }
 0x3d4   : > { %v1087_v6 = vpop.f32.mrf.mxu0 }
 0x3d5   : > { %v1093_v7 = vadd.f32 %v1087_v6, %v3078_v3  ;;  %v1109_v3 = vpop.permute.xlu1 %1108  ;;  %v2594_v6 = vld [vmem:[%s3512_s6 + $0x4] sm:$0xf] }
 0x3d6   : > { %v2747_v9 = vpop.f32.mrf.mxu0 }
 0x3d7   : > { %v3240_v10 = vadd.f32 %v1098_v8, %v1093_v7  ;;  %v2599_v7 = vld [vmem:[%s3510_s4 + $0x8] sm:$0xf] }
 0x3d8   : > { %v1090_v11 = vpop.f32.mrf.mxu0  ;;  %v2597_v8 = vld [vmem:[%s3514_s8 + $0x8] sm:$0xff] }
 0x3d9   : > { %v1103_v12 = vpack.c.bf16 %v3240_v10, %v3240_v10 }
 0x3da   : > { %v2748_v13 = vpop.f32.mrf.mxu0 }
 0x3db   : > { %v1115_v14 = vsel %vm410_vm1, %v1103_v12, 0 }
 0x3dc   : > { %2750 = vmatpush3.bf16.msra.mxu1 %v1115_v14 }
 0x3dd   : > { %2761 = vmatprep.subr.bf16.mxu1 %v2974_v0 }
 0x3df   : > { %2752 = vmatmul.mubr.msk.bf16.vlgmr.msra.gmra.mxu1 %vm406_vm2, %v2581_v15 }
 0x3e0   : > { %2763 = vmatprep.mubr.msk.bf16.mxu1 %vm2975_vm0, %v2974_v0 }
 0x49f   : > { %v1151_v16 = vpop.f32.mrf.mxu1 }
 0x4a0   : > { %v1152_v17 = vadd.f32 %v1151_v16, %v1109_v3 }
 0x4a1   : > { %v2753_v18 = vpop.f32.mrf.mxu1 }
 0x4a2   : > { %v1158_v19 = vmul.f32 0.70710677, %v1152_v17  ;;  %v1157_v44 = vmul.f32 0.5, %v1152_v17 }
 0x4a3   : > { %v1154_v20 = vpop.f32.mrf.mxu1 }
 0x4a4   : > { %v1161_v21 = vand.u32 2147483647, %v1158_v19  ;;  %vm1159_vm7 = vcmp.ge.f32.partialorder %v1158_v19, 0.0 }
 0x4a5   : > { %v2754_v22 = vpop.f32.mrf.mxu1  ;;  %v1160_v42 = vsel %vm1159_vm7, 1.0, %v2977_v41 }
 0x4a6   : > { %v1162_v23 = vmul.f32 0.3275911, %v1161_v21  ;;  %v1175_v25 = vsub.f32 0.0, %v1161_v21 }
 0x4a8   : > { %v1163_v24 = vadd.f32 1.0, %v1162_v23  ;;  %v1176_v26 = vmul.f32 %v1175_v25, %v1161_v21 }
 0x4aa   : > { %2934 = vrcp.f32 %v1163_v24  ;;  %v1177_v29 = vmul.f32 1.442695, %v1176_v26 }
 0x4ac   : > { %2936 = vpow2.f32 %v1177_v29 }
 0x4b7   : > { %v2935_v27 = vpop.eup %2934 }
 0x4b8   : > { %v1166_v28 = vmul.f32 1.0614054, %v2935_v27 }
 0x4b9   : > { %v2937_v38 = vpop.eup %2936 }
 0x4ba   : > { %v1167_v30 = vadd.f32 -1.4531521, %v1166_v28 }
 0x4bc   : > { %v1168_v31 = vmul.f32 %v2935_v27, %v1167_v30 }
 0x4be   : > { %v1169_v32 = vadd.f32 1.4214138, %v1168_v31 }
 0x4c0   : > { %v1170_v33 = vmul.f32 %v2935_v27, %v1169_v32 }
 0x4c2   : > { %v1171_v34 = vadd.f32 -0.28449672, %v1170_v33 }
 0x4c4   : > { %v1172_v35 = vmul.f32 %v2935_v27, %v1171_v34 }
 0x4c6   : > { %v1173_v36 = vadd.f32 0.2548296, %v1172_v35 }
 0x4c8   : > { %v1174_v37 = vmul.f32 %v2935_v27, %v1173_v36 }
 0x4ca   : > { %v1179_v39 = vmul.f32 %v2937_v38, %v1174_v37 }
 0x4cc   : > { %v1180_v40 = vsub.f32 1.0, %v1179_v39 }
 0x4ce   : > { %v1181_v43 = vmul.f32 %v1180_v40, %v1160_v42 }
 0x4d0   : > { %v1182_v45 = vadd.f32 1.0, %v1181_v43 }
 0x4d2   : > { %v1183_v46 = vmul.f32 %v1182_v45, %v1157_v44 }
 0x4d4   : > { %v1184_v47 = vsel %vm3100_vm9, %v1183_v46, 0.0 }
 0x4d5   : > { %v3255_v48 = vpack.c.bf16 %v1184_v47, %v1184_v47 }
 0x4d7   : > { %v1188_v50 = vsel %vm3106_vm11, 0, %v3255_v48  ;;  %v1197_v51 = vsel %vm3117_vm13, 0, %v3255_v48  ;;  %v1432_v20 = vsel %vm556_vm3, %v3255_v48, 0 }
 0x4d8   : > { %1192 = vrot.lane.b32.xlu1 %v1188_v50, %s2979_s25  ;;  %1190 = vrot.lane.b32.xlu0 %v1188_v50, %s2980_s26 }
 0x4dc   : > { %1201 = vrot.lane.b32.xlu1 %v1197_v51, %s2982_s28  ;;  %1199 = vrot.lane.b32.xlu0 %v1197_v51, %s2981_s27 }
 0x4e0   : > { %1217 = vrot.lane.b32.xlu1 %v3255_v48, %s2984_s14  ;;  %1215 = vrot.lane.b32.xlu0 %v3255_v48, %s3524_s13 }
 0x4e4   : > { %1230 = vrot.lane.b32.xlu0 %v1229_v53, %s3523_s16 }
 0x54a   : > { %v1193_v54 = vpop.permute.xlu1 %1192  ;;  %v1191_v56 = vpop.permute.xlu0 %1190 }
 0x54b   : > { %v1196_v57 = vsel %vm504_vm14, %v1191_v56, %v1193_v54 }
 0x54c   : > { %1209 = vrot.lane.b32.xlu0 %v1196_v57, %s2984_s14  ;;  %1207 = vrot.lane.b32.xlu1 %v1196_v57, %s3524_s13  ;;  %v1383_v17 = vsel %vm556_vm3, %v1196_v57, 0 }
 0x54e   : > { %v1202_v58 = vpop.permute.xlu1 %1201  ;;  %v1200_v60 = vpop.permute.xlu0 %1199 }
 0x54f   : > { %v1205_v62 = vsel %vm522_vm15, %v1200_v60, %v1202_v58 }
 0x550   : > { %1325 = vrot.lane.b32.xlu0 %v1205_v62, %s2984_s14  ;;  %1323 = vrot.lane.b32.xlu1 %v1205_v62, %s3524_s13  ;;  %v1480_v23 = vsel %vm556_vm3, %v1205_v62, 0 }
 0x552   : > { %v1218_v63 = vpop.permute.xlu1 %1217  ;;  %v1216_v1 = vpop.permute.xlu0 %1215 }
 0x553   : > { %v1221_v2 = vsel %vm406_vm2, %v1216_v1, %v1218_v63 }
 0x554   : > { %v1235_v4 = vsel %vm556_vm3, %v1221_v2, 0  ;;  %1378 = vrot.lane.b32.xlu0 %v1229_v53, %s3522_s17  ;;  %1330 = vrot.lane.b32.xlu1 %v1229_v53, %s3532_s18 }
 0x555   : > { %2756 = vmatpush3.bf16.msra.mxu0 %v1235_v4 }
 0x556   : > { %v1231_v5 = vpop.permute.xlu0 %1230  ;;  %2767 = vmatprep.subr.bf16.mxu0 %v2974_v0 }
 0x558   : > { %1475 = vrot.lane.b32.xlu0 %v1229_v53, %s3533_s19  ;;  %1426 = vrot.lane.b32.xlu1 %v1229_v53, %s3534_s20 }
 0x559   : > { %2758 = vmatmul.mubr.msk.bf16.vlgmr.msra.gmra.mxu0 %vm552_vm4, %v1231_v5 }
 0x55a   : > { %2769 = vmatprep.mubr.msk.bf16.mxu0 %vm2975_vm0, %v2974_v0 }
 0x55c   : > { %1523 = vrot.lane.b32.xlu0 %v1196_v57, %s3532_s18  ;;  %1530 = vrot.lane.b32.xlu1 %v1229_v53, %s2990_s21 }
 0x560   : > { %1578 = vrot.lane.b32.xlu0 %v3255_v48, %s3532_s18  ;;  %1525 = vrot.lane.b32.xlu1 %v1196_v57, %s2990_s21 }
 0x564   : > { %1633 = vrot.lane.b32.xlu0 %v1205_v62, %s3532_s18  ;;  %1580 = vrot.lane.b32.xlu1 %v3255_v48, %s2990_s21 }
 0x568   : > { %1585 = vrot.lane.b32.xlu0 %v1229_v53, %s2991_s22  ;;  %1635 = vrot.lane.b32.xlu1 %v1205_v62, %s2990_s21 }
 0x56c   : > { %1692 = vperm.xlu0 %2924, %v2594_v6   ;;  %1640 = vrot.lane.b32.xlu1 %v1229_v53, %s2992_s29 }
 0x570   : > { %1788 = vperm.xlu0 %2924, %v2599_v7   ;;  %1777 = vperm.xlu1 %2925, %v2597_v8  }
 0x5be   : > { %v1208_v9 = vpop.permute.xlu1 %1207  ;;  %v1210_v11 = vpop.permute.xlu0 %1209 }
 0x5bf   : > { %v1213_v12 = vsel %vm406_vm2, %v1208_v9, %v1210_v11 }
 0x5c0   : > { %v1280_v13 = vsel %vm556_vm3, %v1213_v12, 0 }
 0x5c1   : > { %2762 = vmatpush3.bf16.msra.mxu1 %v1280_v13 }
 0x5c2   : > { %v1324_v14 = vpop.permute.xlu1 %1323  ;;  %v1326_v15 = vpop.permute.xlu0 %1325  ;;  %2773 = vmatprep.subr.bf16.mxu1 %v2974_v0 }
 0x5c3   : > { %v1329_v3 = vsel %vm406_vm2, %v1324_v14, %v1326_v15 }
 0x5c4   : > { %v1335_v16 = vsel %vm556_vm3, %v1329_v3, 0  ;;  %2764 = vmatmul.mubr.msk.bf16.vlgmr.msra.gmra.mxu1 %vm552_vm4, %v2584_v52 }
 0x5c5   : > { %2768 = vmatpush3.bf16.msra.mxu0 %v1335_v16  ;;  %2774 = vmatpush3.bf16.msra.mxu1 %v1383_v17 }
 0x5c6   : > { %v1331_v18 = vpop.permute.xlu1 %1330  ;;  %v1379_v19 = vpop.permute.xlu0 %1378  ;;  %2779 = vmatprep.subr.bf16.mxu0 %v2974_v0  ;;  %2775 = vmatprep.mubr.msk.bf16.mxu1 %vm2975_vm0, %v2974_v0 }
 0x5c7   : > { %2785 = vmatprep.subr.bf16.mxu1 %v2974_v0 }
 0x5c8   : > { %2770 = vmatmul.mubr.msk.bf16.vlgmr.msra.gmra.mxu0 %vm552_vm4, %v1331_v18 }
 0x5c9   : > { %2780 = vmatpush3.bf16.msra.mxu0 %v1432_v20  ;;  %2781 = vmatprep.mubr.msk.bf16.mxu0 %vm2975_vm0, %v2974_v0 }
 0x5ca   : > { %v1427_v21 = vpop.permute.xlu1 %1426  ;;  %v1476_v22 = vpop.permute.xlu0 %1475  ;;  %2791 = vmatprep.subr.bf16.mxu0 %v2974_v0 }
 0x5cc   : > { %2776 = vmatmul.mubr.msk.bf16.vlgmr.msra.gmra.mxu1 %vm552_vm4, %v1379_v19 }
 0x5cd   : > { %2786 = vmatpush3.bf16.msra.mxu1 %v1480_v23  ;;  %2787 = vmatprep.mubr.msk.bf16.mxu1 %vm2975_vm0, %v2974_v0 }
 0x5ce   : > { %v1531_v24 = vpop.permute.xlu1 %1530  ;;  %v1524_v25 = vpop.permute.xlu0 %1523  ;;  %2797 = vmatprep.subr.bf16.mxu1 %v2974_v0 }
 0x5d0   : > { %2782 = vmatmul.mubr.msk.bf16.vlgmr.msra.gmra.mxu0 %vm552_vm4, %v1427_v21 }
 0x5d1   : > { %2793 = vmatprep.mubr.msk.bf16.mxu0 %vm2975_vm0, %v2974_v0 }
 0x5d2   : > { %v1526_v26 = vpop.permute.xlu1 %1525  ;;  %v1579_v27 = vpop.permute.xlu0 %1578 }
 0x5d3   : > { %v1529_v28 = vsel %vm849_vm5, %v1524_v25, %v1526_v26 }
 0x5d4   : > { %v1535_v29 = vsel %vm556_vm3, %v1529_v28, 0  ;;  %2788 = vmatmul.mubr.msk.bf16.vlgmr.msra.gmra.mxu1 %vm552_vm4, %v1476_v22 }
 0x5d5   : > { %2792 = vmatpush3.bf16.msra.mxu0 %v1535_v29  ;;  %2799 = vmatprep.mubr.msk.bf16.mxu1 %vm2975_vm0, %v2974_v0 }
 0x5d6   : > { %v1581_v30 = vpop.permute.xlu1 %1580  ;;  %v1634_v31 = vpop.permute.xlu0 %1633  ;;  %2803 = vmatprep.subr.bf16.mxu0 %v2974_v0 }
 0x5d7   : > { %v1584_v32 = vsel %vm849_vm5, %v1579_v27, %v1581_v30 }
 0x5d8   : > { %v1590_v33 = vsel %vm556_vm3, %v1584_v32, 0  ;;  %2794 = vmatmul.mubr.msk.bf16.vlgmr.msra.gmra.mxu0 %vm552_vm4, %v1531_v24 }
 0x5d9   : > { %2798 = vmatpush3.bf16.msra.mxu1 %v1590_v33  ;;  %2805 = vmatprep.mubr.msk.bf16.mxu0 %vm2975_vm0, %v2974_v0 }
 0x5da   : > { %v1636_v34 = vpop.permute.xlu1 %1635  ;;  %v1586_v35 = vpop.permute.xlu0 %1585  ;;  %2809 = vmatprep.subr.bf16.mxu1 %v2974_v0 }
 0x5db   : > { %v1639_v36 = vsel %vm849_vm5, %v1634_v31, %v1636_v34 }
 0x5dc   : > { %v1645_v37 = vsel %vm556_vm3, %v1639_v36, 0  ;;  %2800 = vmatmul.mubr.msk.bf16.vlgmr.msra.gmra.mxu1 %vm552_vm4, %v1586_v35 }
 0x5dd   : > { %2804 = vmatpush3.bf16.msra.mxu0 %v1645_v37  ;;  %2811 = vmatprep.mubr.msk.bf16.mxu1 %vm2975_vm0, %v2974_v0 }
 0x5de   : > { %v1641_v38 = vpop.permute.xlu1 %1640  ;;  %2815 = vmatprep.subr.bf16.mxu0 %v2974_v0 }
 0x5e0   : > { %2806 = vmatmul.mubr.msk.bf16.vlgmr.msra.gmra.mxu0 %vm552_vm4, %v1641_v38 }
 0x5e1   : > { %2817 = vmatprep.mubr.msk.bf16.mxu0 %vm2975_vm0, %v2974_v0 }
 0x5e7   : > { %v1693_v21 = vpop.permute.xlu0 %1692 }
 0x619   : > { %v1271_v39 = vpop.f32.mrf.mxu0 }
 0x61b   : > { %v2759_v40 = vpop.f32.mrf.mxu0 }
 0x61d   : > { %v1274_v42 = vpop.f32.mrf.mxu0 }
 0x61f   : > { %v2760_v43 = vpop.f32.mrf.mxu0 }
 0x684   : > { %v1316_v44 = vpop.f32.mrf.mxu1 }
 0x685   : > { %v1317_v62 = vadd.f32 %v1316_v44, %v1271_v39 }
 0x686   : > { %v2765_v45 = vpop.f32.mrf.mxu1 }
 0x688   : > { %v1319_v46 = vpop.f32.mrf.mxu1  ;;  %v1371_v47 = vpop.f32.mrf.mxu0 }
 0x689   : > { %v1377_v2 = vadd.f32 %v1371_v47, %v1317_v62 }
 0x68a   : > { %v2766_v48 = vpop.f32.mrf.mxu1  ;;  %v2771_v50 = vpop.f32.mrf.mxu0 }
 0x68c   : > { %v1374_v51 = vpop.f32.mrf.mxu0  ;;  %v1419_v52 = vpop.f32.mrf.mxu1 }
 0x68d   : > { %v1425_v6 = vadd.f32 %v1419_v52, %v1377_v2 }
 0x68e   : > { %v2772_v53 = vpop.f32.mrf.mxu0  ;;  %v2777_v54 = vpop.f32.mrf.mxu1 }
 0x690   : > { %v1422_v56 = vpop.f32.mrf.mxu1  ;;  %v1468_v57 = vpop.f32.mrf.mxu0 }
 0x691   : > { %v1474_v9 = vadd.f32 %v1468_v57, %v1425_v6 }
 0x692   : > { %v2778_v58 = vpop.f32.mrf.mxu1  ;;  %v2783_v60 = vpop.f32.mrf.mxu0 }
 0x693   : > { %v2595_v58 = vld [vmem:[%s3513_s7 + $0x4] sm:$0xf] }
 0x694   : > { %v1471_v63 = vpop.f32.mrf.mxu0  ;;  %v1516_v1 = vpop.f32.mrf.mxu1 }
 0x695   : > { %v1522_v13 = vadd.f32 %v1516_v1, %v1474_v9  ;;  %v1778_v63 = vpop.permute.xlu1 %1777 }
 0x696   : > { %v2784_v4 = vpop.f32.mrf.mxu0  ;;  %v2789_v5 = vpop.f32.mrf.mxu1 }
 0x698   : > { %v1519_v7 = vpop.f32.mrf.mxu1  ;;  %v1571_v8 = vpop.f32.mrf.mxu0 }
 0x699   : > { %v1577_v3 = vadd.f32 %v1571_v8, %v1522_v13  ;;  %v2598_v8 = vld [vmem:[%s3509_s3 + $0x4] sm:$0x3] }
 0x69a   : > { %v2790_v11 = vpop.f32.mrf.mxu1  ;;  %v2795_v12 = vpop.f32.mrf.mxu0 }
 0x69c   : > { %v1574_v14 = vpop.f32.mrf.mxu0  ;;  %v1626_v15 = vpop.f32.mrf.mxu1 }
 0x69d   : > { %v1632_v18 = vadd.f32 %v1626_v15, %v1577_v3 }
 0x69e   : > { %v2796_v16 = vpop.f32.mrf.mxu0  ;;  %v2801_v17 = vpop.f32.mrf.mxu1 }
 0x6a0   : > { %v1629_v19 = vpop.f32.mrf.mxu1  ;;  %v1681_v20 = vpop.f32.mrf.mxu0 }
 0x6a1   : > { %v1687_v22 = vadd.f32 %v1681_v20, %v1632_v18 }
 0x6a2   : > { %v2802_v23 = vpop.f32.mrf.mxu1  ;;  %v2807_v24 = vpop.f32.mrf.mxu0 }
 0x6a3   : > { %v1695_v25 = vadd.f32 %v1693_v21, %v1687_v22 }
 0x6a4   : > { %v1684_v26 = vpop.f32.mrf.mxu0 }
 0x6a5   : > { %v1697_v27 = vmul.f32 0.70710677, %v1695_v25  ;;  %v1696_v52 = vmul.f32 0.5, %v1695_v25 }
 0x6a6   : > { %v2808_v28 = vpop.f32.mrf.mxu0 }
 0x6a7   : > { %v1700_v29 = vand.u32 2147483647, %v1697_v27  ;;  %vm1698_vm8 = vcmp.ge.f32.partialorder %v1697_v27, 0.0 }
 0x6a8   : > { %v1699_v50 = vsel %vm1698_vm8, 1.0, %v2977_v41 }
 0x6a9   : > { %v1701_v30 = vmul.f32 0.3275911, %v1700_v29  ;;  %v1714_v32 = vsub.f32 0.0, %v1700_v29 }
 0x6ab   : > { %v1702_v31 = vadd.f32 1.0, %v1701_v30  ;;  %v1715_v33 = vmul.f32 %v1714_v32, %v1700_v29 }
 0x6ad   : > { %2938 = vrcp.f32 %v1702_v31  ;;  %v1716_v35 = vmul.f32 1.442695, %v1715_v33 }
 0x6af   : > { %2940 = vpow2.f32 %v1716_v35 }
 0x6ba   : > { %v2939_v34 = vpop.eup %2938 }
 0x6bb   : > { %v1705_v36 = vmul.f32 1.0614054, %v2939_v34 }
 0x6bc   : > { %v2941_v46 = vpop.eup %2940 }
 0x6bd   : > { %v1706_v37 = vadd.f32 -1.4531521, %v1705_v36 }
 0x6bf   : > { %v1707_v38 = vmul.f32 %v2939_v34, %v1706_v37 }
 0x6c1   : > { %v1708_v39 = vadd.f32 1.4214138, %v1707_v38 }
 0x6c3   : > { %v1709_v40 = vmul.f32 %v2939_v34, %v1708_v39 }
 0x6c5   : > { %v1710_v42 = vadd.f32 -0.28449672, %v1709_v40 }
 0x6c7   : > { %v1711_v43 = vmul.f32 %v2939_v34, %v1710_v42 }
 0x6c9   : > { %v1712_v44 = vadd.f32 0.2548296, %v1711_v43 }
 0x6cb   : > { %v1713_v45 = vmul.f32 %v2939_v34, %v1712_v44  ;;  %v1909_v44 = vrot.slane %v2601_v49, %v3124_v61 }
 0x6cd   : > { %v1718_v47 = vmul.f32 %v2941_v46, %v1713_v45 }
 0x6cf   : > { %v1719_v48 = vsub.f32 1.0, %v1718_v47 }
 0x6d1   : > { %v1720_v51 = vmul.f32 %v1719_v48, %v1699_v50 }
 0x6d3   : > { %v1721_v53 = vadd.f32 1.0, %v1720_v51 }
 0x6d5   : > { %v1722_v54 = vmul.f32 %v1721_v53, %v1696_v52 }
 0x6d7   : > { %v1723_v56 = vpack.c.bf16 %v1722_v54, %v1722_v54  ;;  %v2611_v54 = vld [vmem:[%s3512_s6 + $0x8] sm:$0xf] }
 0x6d9   : > { %v1730_v57 = vsel %vm556_vm3, %v1723_v56, 0  ;;  %v2614_v56 = vld [vmem:[%s3514_s8 + $0x10] sm:$0xff] }
 0x6da   : > { %2810 = vmatpush3.bf16.msra.mxu1 %v1730_v57 }
 0x6db   : > { %2821 = vmatprep.subr.bf16.mxu1 %v2974_v0 }
 0x6dd   : > { %2812 = vmatmul.mubr.msk.bf16.vlgmr.msra.gmra.mxu1 %vm552_vm4, %v2595_v58 }
 0x6de   : > { %2823 = vmatprep.mubr.msk.bf16.mxu1 %vm2975_vm0, %v2974_v0 }
 0x79d   : > { %v1766_v60 = vpop.f32.mrf.mxu1 }
 0x79e   : > { %v1772_v62 = vadd.f32 %v1766_v60, %v3240_v10  ;;  %v1789_v10 = vpop.permute.xlu0 %1788 }
 0x79f   : > { %v2813_v1 = vpop.f32.mrf.mxu1 }
 0x7a0   : > { %v3368_v2 = vadd.f32 %v1778_v63, %v1772_v62 }
 0x7a1   : > { %v1769_v4 = vpop.f32.mrf.mxu1 }
 0x7a2   : > { %v1783_v5 = vpack.c.bf16 %v3368_v2, %v3368_v2 }
 0x7a3   : > { %v2814_v6 = vpop.f32.mrf.mxu1 }
 0x7a4   : > { %v1795_v7 = vsel %vm410_vm1, %v1783_v5, 0 }
 0x7a5   : > { %2816 = vmatpush3.bf16.msra.mxu0 %v1795_v7 }
 0x7a6   : > { %2827 = vmatprep.subr.bf16.mxu0 %v2974_v0 }
 0x7a8   : > { %2818 = vmatmul.mubr.msk.bf16.vlgmr.msra.gmra.mxu0 %vm406_vm2, %v2598_v8 }
 0x7a9   : > { %2829 = vmatprep.mubr.msk.bf16.mxu0 %vm2975_vm0, %v2974_v0 }
 0x868   : > { %v1831_v9 = vpop.f32.mrf.mxu0 }
 0x869   : > { %v1832_v11 = vadd.f32 %v1831_v9, %v1789_v10 }
 0x86a   : > { %v2819_v12 = vpop.f32.mrf.mxu0 }
 0x86b   : > { %v1838_v13 = vmul.f32 0.70710677, %v1832_v11  ;;  %v1837_v36 = vmul.f32 0.5, %v1832_v11 }
 0x86c   : > { %v1834_v14 = vpop.f32.mrf.mxu0 }
 0x86d   : > { %v1841_v15 = vand.u32 2147483647, %v1838_v13  ;;  %vm1839_vm1 = vcmp.ge.f32.partialorder %v1838_v13, 0.0 }
 0x86e   : > { %v2820_v3 = vpop.f32.mrf.mxu0  ;;  %v1840_v34 = vsel %vm1839_vm1, 1.0, %v2977_v41 }
 0x86f   : > { %v1842_v16 = vmul.f32 0.3275911, %v1841_v15  ;;  %v1855_v18 = vsub.f32 0.0, %v1841_v15 }
 0x871   : > { %v1843_v17 = vadd.f32 1.0, %v1842_v16  ;;  %v1856_v19 = vmul.f32 %v1855_v18, %v1841_v15 }
 0x873   : > { %2942 = vrcp.f32 %v1843_v17  ;;  %v1857_v22 = vmul.f32 1.442695, %v1856_v19 }
 0x875   : > { %2944 = vpow2.f32 %v1857_v22 }
 0x880   : > { %v2943_v20 = vpop.eup %2942 }
 0x881   : > { %v1846_v21 = vmul.f32 1.0614054, %v2943_v20 }
 0x882   : > { %v2945_v31 = vpop.eup %2944 }
 0x883   : > { %v1847_v23 = vadd.f32 -1.4531521, %v1846_v21 }
 0x885   : > { %v1848_v24 = vmul.f32 %v2943_v20, %v1847_v23 }
 0x887   : > { %v1849_v25 = vadd.f32 1.4214138, %v1848_v24 }
 0x889   : > { %v1850_v26 = vmul.f32 %v2943_v20, %v1849_v25 }
 0x88b   : > { %v1851_v27 = vadd.f32 -0.28449672, %v1850_v26 }
 0x88d   : > { %v1852_v28 = vmul.f32 %v2943_v20, %v1851_v27 }
 0x88f   : > { %v1853_v29 = vadd.f32 0.2548296, %v1852_v28 }
 0x891   : > { %v1854_v30 = vmul.f32 %v2943_v20, %v1853_v29 }
 0x893   : > { %v1859_v32 = vmul.f32 %v2945_v31, %v1854_v30 }
 0x895   : > { %v1860_v33 = vsub.f32 1.0, %v1859_v32 }
 0x897   : > { %v1861_v35 = vmul.f32 %v1860_v33, %v1840_v34 }
 0x899   : > { %v1862_v37 = vadd.f32 1.0, %v1861_v35 }
 0x89b   : > { %v1863_v38 = vmul.f32 %v1862_v37, %v1837_v36 }
 0x89d   : > { %v1864_v39 = vsel %vm3100_vm9, %v1863_v38, 0.0 }
 0x89e   : > { %v3383_v40 = vpack.c.bf16 %v1864_v39, %v1864_v39 }
 0x8a0   : > { %v1868_v42 = vsel %vm3106_vm11, 0, %v3383_v40  ;;  %v1877_v43 = vsel %vm3117_vm13, 0, %v3383_v40  ;;  %v2112_v10 = vsel %vm556_vm3, %v3383_v40, 0 }
 0x8a1   : > { %1872 = vrot.lane.b32.xlu0 %v1868_v42, %s2979_s25  ;;  %1870 = vrot.lane.b32.xlu1 %v1868_v42, %s2980_s26  ;;  %s3535_s25 = smov 24   ;;  %s3536_s26 = smov 124  }
 0x8a5   : > { %1881 = vrot.lane.b32.xlu0 %v1877_v43, %s2982_s28  ;;  %1879 = vrot.lane.b32.xlu1 %v1877_v43, %s2981_s27  ;;  %s3537_s27 = smov 116  }
 0x8a9   : > { %1897 = vrot.lane.b32.xlu0 %v3383_v40, %s2984_s14  ;;  %1895 = vrot.lane.b32.xlu1 %v3383_v40, %s3535_s25 }
 0x8ad   : > { %1910 = vrot.lane.b32.xlu1 %v1909_v44, %s3536_s26 }
 0x913   : > { %v1873_v55 = vpop.permute.xlu0 %1872  ;;  %v1871_v59 = vpop.permute.xlu1 %1870 }
 0x914   : > { %v1876_v45 = vsel %vm504_vm14, %v1871_v59, %v1873_v55 }
 0x915   : > { %1889 = vrot.lane.b32.xlu1 %v1876_v45, %s2984_s14  ;;  %1887 = vrot.lane.b32.xlu0 %v1876_v45, %s3535_s25  ;;  %v2063_v6 = vsel %vm556_vm3, %v1876_v45, 0 }
 0x917   : > { %v1882_v46 = vpop.permute.xlu0 %1881  ;;  %v1880_v47 = vpop.permute.xlu1 %1879 }
 0x918   : > { %v1885_v61 = vsel %vm522_vm15, %v1880_v47, %v1882_v46 }
 0x919   : > { %2005 = vrot.lane.b32.xlu1 %v1885_v61, %s2984_s14  ;;  %2003 = vrot.lane.b32.xlu0 %v1885_v61, %s3535_s25  ;;  %v2160_v12 = vsel %vm556_vm3, %v1885_v61, 0 }
 0x91b   : > { %v1898_v48 = vpop.permute.xlu0 %1897  ;;  %v1896_v50 = vpop.permute.xlu1 %1895 }
 0x91c   : > { %v1901_v51 = vsel %vm406_vm2, %v1896_v50, %v1898_v48 }
 0x91d   : > { %v1915_v52 = vsel %vm556_vm3, %v1901_v51, 0  ;;  %2058 = vrot.lane.b32.xlu1 %v1909_v44, %s3537_s27  ;;  %2010 = vrot.lane.b32.xlu0 %v1909_v44, %s3532_s18 }
 0x91e   : > { %2822 = vmatpush3.bf16.msra.mxu1 %v1915_v52 }
 0x91f   : > { %v1911_v53 = vpop.permute.xlu1 %1910  ;;  %2833 = vmatprep.subr.bf16.mxu1 %v2974_v0 }
 0x921   : > { %2155 = vrot.lane.b32.xlu1 %v1909_v44, %s3533_s19  ;;  %2106 = vrot.lane.b32.xlu0 %v1909_v44, %s3534_s20 }
 0x922   : > { %2824 = vmatmul.mubr.msk.bf16.vlgmr.msra.gmra.mxu1 %vm552_vm4, %v1911_v53 }
 0x923   : > { %2835 = vmatprep.mubr.msk.bf16.mxu1 %vm2975_vm0, %v2974_v0 }
 0x925   : > { %2203 = vrot.lane.b32.xlu1 %v1876_v45, %s3532_s18  ;;  %2210 = vrot.lane.b32.xlu0 %v1909_v44, %s2990_s21 }
 0x929   : > { %2258 = vrot.lane.b32.xlu1 %v3383_v40, %s3532_s18  ;;  %2205 = vrot.lane.b32.xlu0 %v1876_v45, %s2990_s21 }
 0x92d   : > { %2313 = vrot.lane.b32.xlu1 %v1885_v61, %s3532_s18  ;;  %2260 = vrot.lane.b32.xlu0 %v3383_v40, %s2990_s21  ;;  %s379_s18 = scalar_lea.vmem %s3507_s1, %s3071_s15 }
 0x92e   : > { %v2461_v31 = vld [vmem:[%s379_s18] sm:$0xff] }
 0x931   : > { %2265 = vrot.lane.b32.xlu1 %v1909_v44, %s2991_s22  ;;  %2315 = vrot.lane.b32.xlu0 %v1885_v61, %s2990_s21 }
 0x935   : > { %2372 = vperm.xlu1 %2925, %v2611_v54   ;;  %2320 = vrot.lane.b32.xlu0 %v1909_v44, %s2992_s29 }
 0x939   : > { %2457 = vperm.xlu0 %2924, %v2614_v56   ;;  %2463 = vrot.lane.b32.xlu1 %v2461_v31, %s3535_s25 }
 0x987   : > { %v1888_v57 = vpop.permute.xlu0 %1887  ;;  %v1890_v58 = vpop.permute.xlu1 %1889 }
 0x988   : > { %v1893_v60 = vsel %vm406_vm2, %v1888_v57, %v1890_v58 }
 0x989   : > { %v1960_v62 = vsel %vm556_vm3, %v1893_v60, 0 }
 0x98a   : > { %2828 = vmatpush3.bf16.msra.mxu0 %v1960_v62 }
 0x98b   : > { %v2004_v63 = vpop.permute.xlu0 %2003  ;;  %v2006_v1 = vpop.permute.xlu1 %2005  ;;  %2839 = vmatprep.subr.bf16.mxu0 %v2974_v0 }
 0x98c   : > { %v2009_v4 = vsel %vm406_vm2, %v2004_v63, %v2006_v1  ;;  %vm2471_vm2 = vcmask 523264  }
 0x98d   : > { %v2015_v5 = vsel %vm556_vm3, %v2009_v4, 0  ;;  %2830 = vmatmul.mubr.msk.bf16.vlgmr.msra.gmra.mxu0 %vm552_vm4, %v2601_v49 }
 0x98e   : > { %2834 = vmatpush3.bf16.msra.mxu1 %v2015_v5  ;;  %2840 = vmatpush3.bf16.msra.mxu0 %v2063_v6 }
 0x98f   : > { %v2011_v7 = vpop.permute.xlu0 %2010  ;;  %v2059_v8 = vpop.permute.xlu1 %2058  ;;  %2845 = vmatprep.subr.bf16.mxu1 %v2974_v0  ;;  %2841 = vmatprep.mubr.msk.bf16.mxu0 %vm2975_vm0, %v2974_v0 }
 0x990   : > { %2851 = vmatprep.subr.bf16.mxu0 %v2974_v0 }
 0x991   : > { %2836 = vmatmul.mubr.msk.bf16.vlgmr.msra.gmra.mxu1 %vm552_vm4, %v2011_v7 }
 0x992   : > { %2846 = vmatpush3.bf16.msra.mxu1 %v2112_v10  ;;  %2847 = vmatprep.mubr.msk.bf16.mxu1 %vm2975_vm0, %v2974_v0 }
 0x993   : > { %v2107_v9 = vpop.permute.xlu0 %2106  ;;  %v2156_v11 = vpop.permute.xlu1 %2155  ;;  %2857 = vmatprep.subr.bf16.mxu1 %v2974_v0 }
 0x995   : > { %2842 = vmatmul.mubr.msk.bf16.vlgmr.msra.gmra.mxu0 %vm552_vm4, %v2059_v8 }
 0x996   : > { %2852 = vmatpush3.bf16.msra.mxu0 %v2160_v12  ;;  %2853 = vmatprep.mubr.msk.bf16.mxu0 %vm2975_vm0, %v2974_v0 }
 0x997   : > { %v2211_v13 = vpop.permute.xlu0 %2210  ;;  %v2204_v14 = vpop.permute.xlu1 %2203  ;;  %2863 = vmatprep.subr.bf16.mxu0 %v2974_v0 }
 0x999   : > { %2848 = vmatmul.mubr.msk.bf16.vlgmr.msra.gmra.mxu1 %vm552_vm4, %v2107_v9 }
 0x99a   : > { %2859 = vmatprep.mubr.msk.bf16.mxu1 %vm2975_vm0, %v2974_v0 }
 0x99b   : > { %v2206_v15 = vpop.permute.xlu0 %2205  ;;  %v2259_v3 = vpop.permute.xlu1 %2258 }
 0x99c   : > { %v2209_v16 = vsel %vm849_vm5, %v2204_v14, %v2206_v15 }
 0x99d   : > { %v2215_v17 = vsel %vm556_vm3, %v2209_v16, 0  ;;  %2854 = vmatmul.mubr.msk.bf16.vlgmr.msra.gmra.mxu0 %vm552_vm4, %v2156_v11 }
 0x99e   : > { %2858 = vmatpush3.bf16.msra.mxu1 %v2215_v17  ;;  %2865 = vmatprep.mubr.msk.bf16.mxu0 %vm2975_vm0, %v2974_v0 }
 0x99f   : > { %v2261_v18 = vpop.permute.xlu0 %2260  ;;  %v2314_v19 = vpop.permute.xlu1 %2313  ;;  %2869 = vmatprep.subr.bf16.mxu1 %v2974_v0 }
 0x9a0   : > { %v2264_v20 = vsel %vm849_vm5, %v2259_v3, %v2261_v18 }
 0x9a1   : > { %v2270_v21 = vsel %vm556_vm3, %v2264_v20, 0  ;;  %2860 = vmatmul.mubr.msk.bf16.vlgmr.msra.gmra.mxu1 %vm552_vm4, %v2211_v13 }
 0x9a2   : > { %2864 = vmatpush3.bf16.msra.mxu0 %v2270_v21  ;;  %2871 = vmatprep.mubr.msk.bf16.mxu1 %vm2975_vm0, %v2974_v0 }
 0x9a3   : > { %v2316_v22 = vpop.permute.xlu0 %2315  ;;  %v2266_v23 = vpop.permute.xlu1 %2265  ;;  %2875 = vmatprep.subr.bf16.mxu0 %v2974_v0 }
 0x9a4   : > { %v2319_v24 = vsel %vm849_vm5, %v2314_v19, %v2316_v22 }
 0x9a5   : > { %v2325_v25 = vsel %vm556_vm3, %v2319_v24, 0  ;;  %2866 = vmatmul.mubr.msk.bf16.vlgmr.msra.gmra.mxu0 %vm552_vm4, %v2266_v23 }
 0x9a6   : > { %2870 = vmatpush3.bf16.msra.mxu1 %v2325_v25  ;;  %2877 = vmatprep.mubr.msk.bf16.mxu0 %vm2975_vm0, %v2974_v0 }
 0x9a7   : > { %v2321_v26 = vpop.permute.xlu0 %2320 }
 0x9a9   : > { %2872 = vmatmul.mubr.msk.bf16.vlgmr.msra.gmra.mxu1 %vm552_vm4, %v2321_v26 }
 0x9b0   : > { %v2373_v6 = vpop.permute.xlu1 %2372 }
 0x9e2   : > { %v1951_v27 = vpop.f32.mrf.mxu1 }
 0x9e4   : > { %v2825_v28 = vpop.f32.mrf.mxu1 }
 0x9e6   : > { %v1954_v29 = vpop.f32.mrf.mxu1 }
 0x9e8   : > { %v2826_v30 = vpop.f32.mrf.mxu1 }
 0xa4d   : > { %v1996_v32 = vpop.f32.mrf.mxu0 }
 0xa4e   : > { %v1997_v55 = vadd.f32 %v1996_v32, %v1951_v27 }
 0xa4f   : > { %v2831_v33 = vpop.f32.mrf.mxu0 }
 0xa51   : > { %v1999_v34 = vpop.f32.mrf.mxu0  ;;  %v2051_v35 = vpop.f32.mrf.mxu1 }
 0xa52   : > { %v2057_v46 = vadd.f32 %v2051_v35, %v1997_v55 }
 0xa53   : > { %v2832_v36 = vpop.f32.mrf.mxu0  ;;  %v2837_v0 = vpop.f32.mrf.mxu1 }
 0xa55   : > { %v2054_v37 = vpop.f32.mrf.mxu1  ;;  %v2099_v38 = vpop.f32.mrf.mxu0 }
 0xa56   : > { %v2105_v48 = vadd.f32 %v2099_v38, %v2057_v46  ;;  %v2612_v38 = vld [vmem:[%s3513_s7 + $0x8] sm:$0xf] }
 0xa57   : > { %v2838_v39 = vpop.f32.mrf.mxu1  ;;  %v2843_v40 = vpop.f32.mrf.mxu0 }
 0xa58   : > { %v2458_v40 = vpop.permute.xlu0 %2457 }
 0xa59   : > { %v2102_v42 = vpop.f32.mrf.mxu0  ;;  %v2148_v43 = vpop.f32.mrf.mxu1 }
 0xa5a   : > { %v2154_v52 = vadd.f32 %v2148_v43, %v2105_v48  ;;  %v2464_v43 = vpop.permute.xlu1 %2463 }
 0xa5b   : > { %v2844_v49 = vpop.f32.mrf.mxu0  ;;  %v2849_v44 = vpop.f32.mrf.mxu1 }
 0xa5d   : > { %v2151_v59 = vpop.f32.mrf.mxu1  ;;  %v2196_v45 = vpop.f32.mrf.mxu0 }
 0xa5e   : > { %v2202_v56 = vadd.f32 %v2196_v45, %v2154_v52 }
 0xa5f   : > { %v2850_v47 = vpop.f32.mrf.mxu1  ;;  %v2855_v61 = vpop.f32.mrf.mxu0 }
 0xa61   : > { %v2199_v50 = vpop.f32.mrf.mxu0  ;;  %v2251_v51 = vpop.f32.mrf.mxu1 }
 0xa62   : > { %v2257_v60 = vadd.f32 %v2251_v51, %v2202_v56 }
 0xa63   : > { %v2856_v53 = vpop.f32.mrf.mxu0  ;;  %v2861_v54 = vpop.f32.mrf.mxu1 }
 0xa65   : > { %v2254_v57 = vpop.f32.mrf.mxu1  ;;  %v2306_v58 = vpop.f32.mrf.mxu0 }
 0xa66   : > { %v2312_v1 = vadd.f32 %v2306_v58, %v2257_v60 }
 0xa67   : > { %v2862_v62 = vpop.f32.mrf.mxu1  ;;  %v2867_v63 = vpop.f32.mrf.mxu0 }
 0xa69   : > { %v2309_v4 = vpop.f32.mrf.mxu0  ;;  %v2361_v5 = vpop.f32.mrf.mxu1 }
 0xa6a   : > { %v2367_v7 = vadd.f32 %v2361_v5, %v2312_v1 }
 0xa6b   : > { %v2868_v8 = vpop.f32.mrf.mxu0  ;;  %v2873_v10 = vpop.f32.mrf.mxu1 }
 0xa6c   : > { %v2375_v9 = vadd.f32 %v2373_v6, %v2367_v7 }
 0xa6d   : > { %v2364_v11 = vpop.f32.mrf.mxu1 }
 0xa6e   : > { %v2377_v12 = vmul.f32 0.70710677, %v2375_v9  ;;  %v2376_v34 = vmul.f32 0.5, %v2375_v9 }
 0xa6f   : > { %v2874_v13 = vpop.f32.mrf.mxu1 }
 0xa70   : > { %v2380_v14 = vand.u32 2147483647, %v2377_v12  ;;  %vm2378_vm0 = vcmp.ge.f32.partialorder %v2377_v12, 0.0 }
 0xa71   : > { %v2379_v32 = vsel %vm2378_vm0, 1.0, %v2977_v41 }
 0xa72   : > { %v2381_v15 = vmul.f32 0.3275911, %v2380_v14  ;;  %v2394_v16 = vsub.f32 0.0, %v2380_v14 }
 0xa74   : > { %v2382_v3 = vadd.f32 1.0, %v2381_v15  ;;  %v2395_v17 = vmul.f32 %v2394_v16, %v2380_v14 }
 0xa76   : > { %2946 = vrcp.f32 %v2382_v3  ;;  %v2396_v19 = vmul.f32 1.442695, %v2395_v17 }
 0xa78   : > { %2948 = vpow2.f32 %v2396_v19 }
 0xa83   : > { %v2947_v18 = vpop.eup %2946 }
 0xa84   : > { %v2385_v20 = vmul.f32 1.0614054, %v2947_v18 }
 0xa85   : > { %v2949_v29 = vpop.eup %2948 }
 0xa86   : > { %v2386_v21 = vadd.f32 -1.4531521, %v2385_v20 }
 0xa88   : > { %v2387_v22 = vmul.f32 %v2947_v18, %v2386_v21 }
 0xa8a   : > { %v2388_v23 = vadd.f32 1.4214138, %v2387_v22 }
 0xa8c   : > { %v2389_v24 = vmul.f32 %v2947_v18, %v2388_v23 }
 0xa8e   : > { %v2390_v25 = vadd.f32 -0.28449672, %v2389_v24 }
 0xa90   : > { %v2391_v26 = vmul.f32 %v2947_v18, %v2390_v25 }
 0xa92   : > { %v2392_v27 = vadd.f32 0.2548296, %v2391_v26 }
 0xa94   : > { %v2393_v28 = vmul.f32 %v2947_v18, %v2392_v27 }
 0xa96   : > { %v2398_v30 = vmul.f32 %v2949_v29, %v2393_v28 }
 0xa98   : > { %v2399_v31 = vsub.f32 1.0, %v2398_v30 }
 0xa9a   : > { %v2400_v33 = vmul.f32 %v2399_v31, %v2379_v32 }
 0xa9c   : > { %v2401_v35 = vadd.f32 1.0, %v2400_v33 }
 0xa9e   : > { %v2402_v36 = vmul.f32 %v2401_v35, %v2376_v34 }
 0xaa0   : > { %v2403_v0 = vpack.c.bf16 %v2402_v36, %v2402_v36 }
 0xaa2   : > { %v2410_v37 = vsel %vm556_vm3, %v2403_v0, 0 }
 0xaa3   : > { %2876 = vmatpush3.bf16.msra.mxu0 %v2410_v37 }
 0xaa6   : > { %2878 = vmatmul.mubr.msk.bf16.vlgmr.msra.gmra.mxu0 %vm552_vm4, %v2612_v38 }
 0xb66   : > { %v2446_v39 = vpop.f32.mrf.mxu0 }
 0xb67   : > { %v2452_v42 = vadd.f32 %v2446_v39, %v3368_v2 }
 0xb68   : > { %v2879_v41 = vpop.f32.mrf.mxu0 }
 0xb69   : > { %v2460_v49 = vadd.f32 %v2458_v40, %v2452_v42 }
 0xb6a   : > { %v2449_v44 = vpop.f32.mrf.mxu0 }
 0xb6b   : > { %v2466_v55 = vadd.f32 %v2464_v43, %v2460_v49 }
 0xb6c   : > { %v2880_v59 = vpop.f32.mrf.mxu0 }
 0xb6d   : > { %2468 = vrot.lane.b32.xlu0 %v2466_v55, %s2990_s21 }
 0xbdf   : > { %v2469_v45 = vpop.permute.xlu0 %2468 }
 0xbe0   : > { %2472 = vst.msk [vmem:[%s386_s24] sm:$0xff] %vm2471_vm2, %v2469_v45 }
 0xbe1 PF: > { %s19_s11 = sadd.s32 1, %s2972_s11   ;;  %s3538_s30 = smov %s2968_s10 }
 0xbe2   : > { %p16_p5 = scmp.ge.s32.totalorder %s19_s11, 4   ;;  %s3539_s10 = smov %s3541_s12 }
 0xbe4   :  { %18 = sbr.rel (!%p16_p5) target bundleno = 2 (0x2), region = 101 }

</bundles_post_ra>
